<compile_context>
chip_gen: v5e
topology: v5e:2x2
jax: 0.10.0
libtpu: 0.0.40
codegen_flags: <defaults>
</compile_context>

<pallas_src>
import functools

import jax
import jax.numpy as jnp
from jax import lax
from jax.experimental import pallas as pl
from jax.experimental.pallas import tpu as pltpu

BN_EPS = 1e-5


def _round_up(x, m):
    return ((x + m - 1) // m) * m


def _deconv_block_kernel(xu_ref, res_ref, w1_ref, w2_ref, b1_ref, mask_ref,
                         gamma_ref, beta_ref, o_ref,
                         xpad_ref, catpad_ref, stk1_ref, stk2_ref,
                         *, cin, cmid, cres, row_len, m, pad, n_batch):
    """One batch image per grid step; BN finalize on the last step."""
    f32 = jnp.float32
    ccat = cmid + cres
    n = pl.program_id(0)

    # ---- zero the halo regions once; scratches persist across grid steps ----
    @pl.when(n == 0)
    def _init_halo():
        xpad_ref[:, :pad] = jnp.zeros((cin, pad), f32)
        xpad_ref[:, pad + m:] = jnp.zeros((cin, pad), f32)
        catpad_ref[:, :pad] = jnp.zeros((ccat, pad), f32)
        catpad_ref[:, pad + m:] = jnp.zeros((ccat, pad), f32)

    # ---- interiors: upsampled input, residual rows of the "concat" scratch --
    xpad_ref[:, pad:pad + m] = xu_ref[...]
    catpad_ref[cmid:, pad:pad + m] = res_ref[...]

    mask_m1 = mask_ref[0:1, :]   # zero where w == 0            (taps dw = -1)
    mask_p1 = mask_ref[1:2, :]   # zero where w == row_len - 1  (taps dw = +1)

    def build_stack(pad_src, stk_ref, ci):
        # im2col in VMEM: shifted (and dw-masked) copies stacked along the
        # contraction axis; row boundaries are handled by the zero halo.
        for dh in (-1, 0, 1):
            for dw in (-1, 0, 1):
                k = (dh + 1) * 3 + (dw + 1)
                s = pad + dh * row_len + dw
                piece = pad_src[:, s:s + m]
                if dw == -1:
                    piece = piece * mask_m1
                elif dw == 1:
                    piece = piece * mask_p1
                stk_ref[k * ci:(k + 1) * ci, :] = piece

    # ---- stage 1: conv3x3 on the upsampled input, bias, ReLU (one matmul) ---
    build_stack(xpad_ref, stk1_ref, cin)
    a1 = jnp.dot(w1_ref[...], stk1_ref[...], preferred_element_type=f32)
    a1 = jnp.maximum(a1 + b1_ref[...], 0.0)
    catpad_ref[:cmid, pad:pad + m] = a1          # "concat" never materialized

    # ---- stage 2: conv3x3 over concat([a1, residual]) (one matmul, K=9*Ccat)
    build_stack(catpad_ref, stk2_ref, ccat)
    y = jnp.dot(w2_ref[...], stk2_ref[...], preferred_element_type=f32)
    # b2 intentionally omitted: constant per-channel shift cancels in train BN.

    # store pre-BN result into the batch-resident output block
    o_ref[n] = y

    # ---- last step: two-pass BatchNorm (train-mode) + affine + ReLU ---------
    @pl.when(n == n_batch - 1)
    def _finalize_bn():
        yall = o_ref[...]                                   # [N, Cout, M]
        cnt = float(n_batch * m)
        mean = jnp.sum(jnp.sum(yall, axis=0), axis=1, keepdims=True) / cnt
        centered = yall - mean[None, :, :]
        var = jnp.sum(jnp.sum(centered * centered, axis=0),
                      axis=1, keepdims=True) / cnt          # biased, two-pass
        scale = gamma_ref[...] * lax.rsqrt(var + BN_EPS)
        shift = beta_ref[...] - mean * scale
        o_ref[...] = jnp.maximum(yall * scale[None, :, :] + shift[None, :, :],
                                 0.0)


@jax.jit
def deconv_block_forward(x, residual, w1, b1, w2, b2, gamma, beta):
    """DeconvBlock forward.

    x:        [N, Cin, H, W]              (NCHW, like PyTorch)
    residual: [N, Cres, 2H, 2W]
    w1:       [Cmid, Cin, 3, 3]           (DeconvBlock.conv)
    b1:       [Cmid]
    w2:       [Cout, Cmid + Cres, 3, 3]   (ConvBlock.conv on the concat)
    b2:       [Cout]                      (cancels under train-mode BN)
    returns:  [N, Cout, 2H, 2W]
    """
    f32 = jnp.float32
    N, Cin, H, W = x.shape
    _, Cres, H2, W2 = residual.shape
    Cmid = w1.shape[0]
    Cout = w2.shape[0]
    Ccat = Cmid + Cres
    assert H2 == 2 * H and W2 == 2 * W
    assert w2.shape[1] == Ccat
    M = H2 * W2
    assert M % 128 == 0, "H2*W2 must be a multiple of 128 for lane-dense tiles"
    P = _round_up(W2 + 1, 128)          # lane-aligned halo on both flat ends
    Mp = M + 2 * P

    # ---- wrapper-side prep (layout-only / tiny) -----------------------------
    # TODO(synk): move this 2x nearest upsample into the kernel.
    x_up = jnp.repeat(jnp.repeat(x.astype(f32), 2, axis=2), 2, axis=3)
    xu_flat = x_up.reshape(N, Cin, M)                      # free reshape
    res_flat = residual.astype(f32).reshape(N, Cres, M)    # free reshape

    # weights rearranged to [Co, 9*Ci], tap-major (k = (dh+1)*3 + (dw+1)),
    # matching the im2col row order built inside the kernel.
    w1s = jnp.transpose(w1.astype(f32), (0, 2, 3, 1)).reshape(Cmid, 9 * Cin)
    w2s = jnp.transpose(w2.astype(f32), (0, 2, 3, 1)).reshape(Cout, 9 * Ccat)
    b1_c = b1.astype(f32).reshape(Cmid, 1)
    gamma_c = gamma.astype(f32).reshape(Cout, 1)
    beta_c = beta.astype(f32).reshape(Cout, 1)

    # column-boundary masks for the dw = -1 / dw = +1 taps of the flat conv
    col = jnp.arange(M, dtype=jnp.int32) % W2
    masks = jnp.stack([(col != 0), (col != W2 - 1)], axis=0).astype(f32)  # [2,M]

    kernel = functools.partial(
        _deconv_block_kernel, cin=Cin, cmid=Cmid, cres=Cres,
        row_len=W2, m=M, pad=P, n_batch=N)

    out = pl.pallas_call(
        kernel,
        out_shape=jax.ShapeDtypeStruct((N, Cout, M), f32),
        grid_spec=pltpu.PrefetchScalarGridSpec(
            num_scalar_prefetch=0,
            grid=(N,),
            in_specs=[
                pl.BlockSpec((None, Cin, M), lambda n: (n, 0, 0)),
                pl.BlockSpec((None, Cres, M), lambda n: (n, 0, 0)),
                pl.BlockSpec((Cmid, 9 * Cin), lambda n: (0, 0)),
                pl.BlockSpec((Cout, 9 * Ccat), lambda n: (0, 0)),
                pl.BlockSpec((Cmid, 1), lambda n: (0, 0)),
                pl.BlockSpec((2, M), lambda n: (0, 0)),
                pl.BlockSpec((Cout, 1), lambda n: (0, 0)),
                pl.BlockSpec((Cout, 1), lambda n: (0, 0)),
            ],
            # constant block index -> output stays resident in VMEM across the
            # whole batch grid and is written to HBM exactly once, post-BN.
            out_specs=pl.BlockSpec((N, Cout, M), lambda n: (0, 0, 0)),
            scratch_shapes=[
                pltpu.VMEM((Cin, Mp), f32),        # padded upsampled input
                pltpu.VMEM((Ccat, Mp), f32),       # padded [a1 ; residual]
                pltpu.VMEM((9 * Cin, M), f32),     # im2col stack, conv 1
                pltpu.VMEM((9 * Ccat, M), f32),    # im2col stack, conv 2
            ]),
        compiler_params=pltpu.CompilerParams(
            dimension_semantics=("arbitrary",),     # output revisited each step
            vmem_limit_bytes=32 * 1024 * 1024),
    )(xu_flat, res_flat, w1s, w2s, b1_c, masks, gamma_c, beta_c)

    # [N, Cout, M] -> NCHW via a free contiguous reshape (no transpose).
    return out.reshape(N, Cout, H2, W2)


def _reference_forward(x, residual, w1, b1, w2, b2, gamma, beta):
    """Pure-JAX reference matching DeconvBlock.forward (BN in train mode)."""
    f32 = jnp.float32
    dn = ("NCHW", "OIHW", "NCHW")
    hp = lax.Precision.HIGHEST
    xu = jnp.repeat(jnp.repeat(x.astype(f32), 2, axis=2), 2, axis=3)
    y = lax.conv_general_dilated(xu, w1.astype(f32), window_strides=(1, 1),
                                 padding=((1, 1), (1, 1)),
                                 dimension_numbers=dn, precision=hp)
    y = jnp.maximum(y + b1.reshape(1, -1, 1, 1), 0.0)
    cat = jnp.concatenate([y, residual.astype(f32)], axis=1)
    z = lax.conv_general_dilated(cat, w2.astype(f32), window_strides=(1, 1),
                                 padding=((1, 1), (1, 1)),
                                 dimension_numbers=dn, precision=hp)
    z = z + b2.reshape(1, -1, 1, 1)
    mean = jnp.mean(z, axis=(0, 2, 3), keepdims=True)
    var = jnp.mean((z - mean) ** 2, axis=(0, 2, 3), keepdims=True)
    z = (z - mean) * lax.rsqrt(var + BN_EPS)
    z = z * gamma.reshape(1, -1, 1, 1) + beta.reshape(1, -1, 1, 1)
    return jnp.maximum(z, 0.0)


def _run_case(seed, N, Cin, Cout, Cres, H, W):
    key = jax.random.PRNGKey(seed)
    k_x, k_r, k_w1, k_b1, k_w2, k_b2 = jax.random.split(key, 6)
    H2, W2 = 2 * H, 2 * W
    Ccat = Cout + Cres   # ConvBlock's conv must accept the concat channels.

    x = jax.random.normal(k_x, (N, Cin, H, W), dtype=jnp.float32)
    residual = jax.random.normal(k_r, (N, Cres, H2, W2), dtype=jnp.float32)

    # Parameter init mirroring the module: kaiming_normal_ conv weights,
    # PyTorch-default uniform conv biases, BN affine gamma=1 / beta=0.
    fan1 = Cin * 9
    w1 = jax.random.normal(k_w1, (Cout, Cin, 3, 3), jnp.float32) * jnp.sqrt(2.0 / fan1)
    b1 = jax.random.uniform(k_b1, (Cout,), minval=-1.0 / fan1 ** 0.5,
                            maxval=1.0 / fan1 ** 0.5, dtype=jnp.float32)
    fan2 = Ccat * 9
    w2 = jax.random.normal(k_w2, (Cout, Ccat, 3, 3), jnp.float32) * jnp.sqrt(2.0 / fan2)
    b2 = jax.random.uniform(k_b2, (Cout,), minval=-1.0 / fan2 ** 0.5,
                            maxval=1.0 / fan2 ** 0.5, dtype=jnp.float32)
    gamma = jnp.ones((Cout,), dtype=jnp.float32)
    beta = jnp.zeros((Cout,), dtype=jnp.float32)

    out = jax.block_until_ready(
        deconv_block_forward(x, residual, w1, b1, w2, b2, gamma, beta))
    ref = jax.block_until_ready(
        _reference_forward(x, residual, w1, b1, w2, b2, gamma, beta))
    assert out.shape == (N, Cout, H2, W2)
    err = float(jnp.max(jnp.abs(out - ref)))
    assert jnp.allclose(out, ref, atol=1e-3, rtol=1e-3), err


if __name__ == "__main__":
    # module-sized case (matches the PyTorch spec example)
    _run_case(0, N=2, Cin=4, Cout=8, Cres=4, H=16, W=16)
    # non-square spatial + odd channel counts: guards the flat-shift / column
    # mask logic and the im2col row packing.
    _run_case(1, N=3, Cin=3, Cout=8, Cres=5, H=16, W=8)
    print("KERNEL_OK")
</pallas_src>

<mosaic_0001>
module attributes {stable_mosaic.version = 11 : i64} {
  func.func @_deconv_block_kernel(%arg0: i32, %arg1: memref<1x4x1024xf32, #tpu.memory_space<vmem>>, %arg2: memref<1x4x1024xf32, #tpu.memory_space<vmem>>, %arg3: memref<8x36xf32, #tpu.memory_space<vmem>>, %arg4: memref<8x108xf32, #tpu.memory_space<vmem>>, %arg5: memref<8x1xf32, #tpu.memory_space<vmem>>, %arg6: memref<2x1024xf32, #tpu.memory_space<vmem>>, %arg7: memref<8x1xf32, #tpu.memory_space<vmem>>, %arg8: memref<8x1xf32, #tpu.memory_space<vmem>>, %arg9: memref<2x8x1024xf32, #tpu.memory_space<vmem>>, %arg10: memref<4x1280xf32, #tpu.memory_space<vmem>>, %arg11: memref<12x1280xf32, #tpu.memory_space<vmem>>, %arg12: memref<36x1024xf32, #tpu.memory_space<vmem>>, %arg13: memref<108x1024xf32, #tpu.memory_space<vmem>>) attributes {dimension_semantics = [#tpu.dimension_semantics<arbitrary>], iteration_bounds = array<i64: 2>, scalar_prefetch = 0 : i64, scratch_operands = 4 : i64, tpu.core_type = #tpu.core_type<tc>, window_params = [{transform_indices = @transform_0, window_bounds = array<i64: 1, 4, 1024>}, {transform_indices = @transform_1, window_bounds = array<i64: 1, 4, 1024>}, {pipeline_mode = #tpu.pipeline_mode<synchronous>, transform_indices = @transform_2, window_bounds = array<i64: 8, 36>}, {pipeline_mode = #tpu.pipeline_mode<synchronous>, transform_indices = @transform_3, window_bounds = array<i64: 8, 108>}, {pipeline_mode = #tpu.pipeline_mode<synchronous>, transform_indices = @transform_4, window_bounds = array<i64: 8, 1>}, {pipeline_mode = #tpu.pipeline_mode<synchronous>, transform_indices = @transform_5, window_bounds = array<i64: 2, 1024>}, {pipeline_mode = #tpu.pipeline_mode<synchronous>, transform_indices = @transform_6, window_bounds = array<i64: 8, 1>}, {pipeline_mode = #tpu.pipeline_mode<synchronous>, transform_indices = @transform_7, window_bounds = array<i64: 8, 1>}, {pipeline_mode = #tpu.pipeline_mode<synchronous>, transform_indices = @transform_8, window_bounds = array<i64: 2, 8, 1024>}]} {
    %c0_i32 = arith.constant 0 : i32
    %0 = arith.cmpi eq, %arg0, %c0_i32 : i32
    %1 = arith.extui %0 : i1 to i32
    %c0_i32_0 = arith.constant 0 : i32
    %2 = arith.cmpi ne, %1, %c0_i32_0 : i32
    scf.if %2 {
      %cst_80 = arith.constant 0.000000e+00 : f32
      %90 = vector.broadcast %cst_80 : f32 to vector<4x128xf32>
      %c0_81 = arith.constant 0 : index
      %c0_82 = arith.constant 0 : index
      %91 = vector.load %arg10[%c0_81, %c0_82] : memref<4x1280xf32, #tpu.memory_space<vmem>>, vector<4x128xf32>
      tpu.vector_store %arg10[%c0_81, %c0_82], %90 {strides = array<i32>} : memref<4x1280xf32, #tpu.memory_space<vmem>>, vector<4x128xf32>,
      %cst_83 = arith.constant 0.000000e+00 : f32
      %92 = vector.broadcast %cst_83 : f32 to vector<4x128xf32>
      %c0_84 = arith.constant 0 : index
      %c1152 = arith.constant 1152 : index
      %93 = vector.load %arg10[%c0_84, %c1152] : memref<4x1280xf32, #tpu.memory_space<vmem>>, vector<4x128xf32>
      tpu.vector_store %arg10[%c0_84, %c1152], %92 {strides = array<i32>} : memref<4x1280xf32, #tpu.memory_space<vmem>>, vector<4x128xf32>,
      %cst_85 = arith.constant 0.000000e+00 : f32
      %94 = vector.broadcast %cst_85 : f32 to vector<12x128xf32>
      %c0_86 = arith.constant 0 : index
      %c0_87 = arith.constant 0 : index
      %95 = vector.load %arg11[%c0_86, %c0_87] : memref<12x1280xf32, #tpu.memory_space<vmem>>, vector<12x128xf32>
      tpu.vector_store %arg11[%c0_86, %c0_87], %94 {strides = array<i32>} : memref<12x1280xf32, #tpu.memory_space<vmem>>, vector<12x128xf32>,
      %cst_88 = arith.constant 0.000000e+00 : f32
      %96 = vector.broadcast %cst_88 : f32 to vector<12x128xf32>
      %c0_89 = arith.constant 0 : index
      %c1152_90 = arith.constant 1152 : index
      %97 = vector.load %arg11[%c0_89, %c1152_90] : memref<12x1280xf32, #tpu.memory_space<vmem>>, vector<12x128xf32>
      tpu.vector_store %arg11[%c0_89, %c1152_90], %96 {strides = array<i32>} : memref<12x1280xf32, #tpu.memory_space<vmem>>, vector<12x128xf32>,
    } else {
    }
    %c0 = arith.constant 0 : index
    %c0_1 = arith.constant 0 : index
    %c0_2 = arith.constant 0 : index
    %3 = vector.load %arg1[%c0, %c0_1, %c0_2] : memref<1x4x1024xf32, #tpu.memory_space<vmem>>, vector<1x4x1024xf32>
    %4 = vector.shape_cast %3 : vector<1x4x1024xf32> to vector<4x1024xf32>
    %c0_3 = arith.constant 0 : index
    %c128 = arith.constant 128 : index
    %5 = vector.load %arg10[%c0_3, %c128] : memref<4x1280xf32, #tpu.memory_space<vmem>>, vector<4x1024xf32>
    tpu.vector_store %arg10[%c0_3, %c128], %4 {strides = array<i32>} : memref<4x1280xf32, #tpu.memory_space<vmem>>, vector<4x1024xf32>,
    %c0_4 = arith.constant 0 : index
    %c0_5 = arith.constant 0 : index
    %c0_6 = arith.constant 0 : index
    %6 = vector.load %arg2[%c0_4, %c0_5, %c0_6] : memref<1x4x1024xf32, #tpu.memory_space<vmem>>, vector<1x4x1024xf32>
    %7 = vector.shape_cast %6 : vector<1x4x1024xf32> to vector<4x1024xf32>
    %c8 = arith.constant 8 : index
    %c128_7 = arith.constant 128 : index
    %8 = vector.load %arg11[%c8, %c128_7] : memref<12x1280xf32, #tpu.memory_space<vmem>>, vector<4x1024xf32>
    tpu.vector_store %arg11[%c8, %c128_7], %7 {strides = array<i32>} : memref<12x1280xf32, #tpu.memory_space<vmem>>, vector<4x1024xf32>,
    %c0_8 = arith.constant 0 : index
    %c0_9 = arith.constant 0 : index
    %9 = vector.load %arg6[%c0_8, %c0_9] : memref<2x1024xf32, #tpu.memory_space<vmem>>, vector<1x1024xf32>
    %c1 = arith.constant 1 : index
    %c0_10 = arith.constant 0 : index
    %10 = vector.load %arg6[%c1, %c0_10] : memref<2x1024xf32, #tpu.memory_space<vmem>>, vector<1x1024xf32>
    %c0_11 = arith.constant 0 : index
    %c95 = arith.constant 95 : index
    %11 = vector.load %arg10[%c0_11, %c95] : memref<4x1280xf32, #tpu.memory_space<vmem>>, vector<4x1024xf32>
    %12 = vector.broadcast %9 : vector<1x1024xf32> to vector<4x1024xf32>
    %13 = arith.mulf %11, %12 : vector<4x1024xf32>
    %c0_12 = arith.constant 0 : index
    %c0_13 = arith.constant 0 : index
    %14 = vector.load %arg12[%c0_12, %c0_13] : memref<36x1024xf32, #tpu.memory_space<vmem>>, vector<4x1024xf32>
    tpu.vector_store %arg12[%c0_12, %c0_13], %13 {strides = array<i32>} : memref<36x1024xf32, #tpu.memory_space<vmem>>, vector<4x1024xf32>,
    %c0_14 = arith.constant 0 : index
    %c96 = arith.constant 96 : index
    %15 = vector.load %arg10[%c0_14, %c96] : memref<4x1280xf32, #tpu.memory_space<vmem>>, vector<4x1024xf32>
    %c4 = arith.constant 4 : index
    %c0_15 = arith.constant 0 : index
    %16 = vector.load %arg12[%c4, %c0_15] : memref<36x1024xf32, #tpu.memory_space<vmem>>, vector<4x1024xf32>
    tpu.vector_store %arg12[%c4, %c0_15], %15 {strides = array<i32>} : memref<36x1024xf32, #tpu.memory_space<vmem>>, vector<4x1024xf32>,
    %c0_16 = arith.constant 0 : index
    %c97 = arith.constant 97 : index
    %17 = vector.load %arg10[%c0_16, %c97] : memref<4x1280xf32, #tpu.memory_space<vmem>>, vector<4x1024xf32>
    %18 = vector.broadcast %10 : vector<1x1024xf32> to vector<4x1024xf32>
    %19 = arith.mulf %17, %18 : vector<4x1024xf32>
    %c8_17 = arith.constant 8 : index
    %c0_18 = arith.constant 0 : index
    %20 = vector.load %arg12[%c8_17, %c0_18] : memref<36x1024xf32, #tpu.memory_space<vmem>>, vector<4x1024xf32>
    tpu.vector_store %arg12[%c8_17, %c0_18], %19 {strides = array<i32>} : memref<36x1024xf32, #tpu.memory_space<vmem>>, vector<4x1024xf32>,
    %c0_19 = arith.constant 0 : index
    %c127 = arith.constant 127 : index
    %21 = vector.load %arg10[%c0_19, %c127] : memref<4x1280xf32, #tpu.memory_space<vmem>>, vector<4x1024xf32>
    %22 = vector.broadcast %9 : vector<1x1024xf32> to vector<4x1024xf32>
    %23 = arith.mulf %21, %22 : vector<4x1024xf32>
    %c12 = arith.constant 12 : index
    %c0_20 = arith.constant 0 : index
    %24 = vector.load %arg12[%c12, %c0_20] : memref<36x1024xf32, #tpu.memory_space<vmem>>, vector<4x1024xf32>
    tpu.vector_store %arg12[%c12, %c0_20], %23 {strides = array<i32>} : memref<36x1024xf32, #tpu.memory_space<vmem>>, vector<4x1024xf32>,
    %c0_21 = arith.constant 0 : index
    %c128_22 = arith.constant 128 : index
    %25 = vector.load %arg10[%c0_21, %c128_22] : memref<4x1280xf32, #tpu.memory_space<vmem>>, vector<4x1024xf32>
    %c16 = arith.constant 16 : index
    %c0_23 = arith.constant 0 : index
    %26 = vector.load %arg12[%c16, %c0_23] : memref<36x1024xf32, #tpu.memory_space<vmem>>, vector<4x1024xf32>
    tpu.vector_store %arg12[%c16, %c0_23], %25 {strides = array<i32>} : memref<36x1024xf32, #tpu.memory_space<vmem>>, vector<4x1024xf32>,
    %c0_24 = arith.constant 0 : index
    %c129 = arith.constant 129 : index
    %27 = vector.load %arg10[%c0_24, %c129] : memref<4x1280xf32, #tpu.memory_space<vmem>>, vector<4x1024xf32>
    %28 = vector.broadcast %10 : vector<1x1024xf32> to vector<4x1024xf32>
    %29 = arith.mulf %27, %28 : vector<4x1024xf32>
    %c20 = arith.constant 20 : index
    %c0_25 = arith.constant 0 : index
    %30 = vector.load %arg12[%c20, %c0_25] : memref<36x1024xf32, #tpu.memory_space<vmem>>, vector<4x1024xf32>
    tpu.vector_store %arg12[%c20, %c0_25], %29 {strides = array<i32>} : memref<36x1024xf32, #tpu.memory_space<vmem>>, vector<4x1024xf32>,
    %c0_26 = arith.constant 0 : index
    %c159 = arith.constant 159 : index
    %31 = vector.load %arg10[%c0_26, %c159] : memref<4x1280xf32, #tpu.memory_space<vmem>>, vector<4x1024xf32>
    %32 = vector.broadcast %9 : vector<1x1024xf32> to vector<4x1024xf32>
    %33 = arith.mulf %31, %32 : vector<4x1024xf32>
    %c24 = arith.constant 24 : index
    %c0_27 = arith.constant 0 : index
    %34 = vector.load %arg12[%c24, %c0_27] : memref<36x1024xf32, #tpu.memory_space<vmem>>, vector<4x1024xf32>
    tpu.vector_store %arg12[%c24, %c0_27], %33 {strides = array<i32>} : memref<36x1024xf32, #tpu.memory_space<vmem>>, vector<4x1024xf32>,
    %c0_28 = arith.constant 0 : index
    %c160 = arith.constant 160 : index
    %35 = vector.load %arg10[%c0_28, %c160] : memref<4x1280xf32, #tpu.memory_space<vmem>>, vector<4x1024xf32>
    %c28 = arith.constant 28 : index
    %c0_29 = arith.constant 0 : index
    %36 = vector.load %arg12[%c28, %c0_29] : memref<36x1024xf32, #tpu.memory_space<vmem>>, vector<4x1024xf32>
    tpu.vector_store %arg12[%c28, %c0_29], %35 {strides = array<i32>} : memref<36x1024xf32, #tpu.memory_space<vmem>>, vector<4x1024xf32>,
    %c0_30 = arith.constant 0 : index
    %c161 = arith.constant 161 : index
    %37 = vector.load %arg10[%c0_30, %c161] : memref<4x1280xf32, #tpu.memory_space<vmem>>, vector<4x1024xf32>
    %38 = vector.broadcast %10 : vector<1x1024xf32> to vector<4x1024xf32>
    %39 = arith.mulf %37, %38 : vector<4x1024xf32>
    %c32 = arith.constant 32 : index
    %c0_31 = arith.constant 0 : index
    %40 = vector.load %arg12[%c32, %c0_31] : memref<36x1024xf32, #tpu.memory_space<vmem>>, vector<4x1024xf32>
    tpu.vector_store %arg12[%c32, %c0_31], %39 {strides = array<i32>} : memref<36x1024xf32, #tpu.memory_space<vmem>>, vector<4x1024xf32>,
    %c0_32 = arith.constant 0 : index
    %c0_33 = arith.constant 0 : index
    %41 = vector.load %arg3[%c0_32, %c0_33] : memref<8x36xf32, #tpu.memory_space<vmem>>, vector<8x36xf32>
    %c0_34 = arith.constant 0 : index
    %c0_35 = arith.constant 0 : index
    %42 = vector.load %arg12[%c0_34, %c0_35] : memref<36x1024xf32, #tpu.memory_space<vmem>>, vector<36x1024xf32>
    %cst = arith.constant dense<0.000000e+00> : vector<8x1024xf32>
    %43 = tpu.matmul %41, %42, %cst {dimension_numbers = #tpu.dot_dimension_numbers<[1], [0], [0], [1], [0, 0, 1, 1], [], []>} : vector<8x36xf32>, vector<36x1024xf32>, vector<8x1024xf32> -> vector<8x1024xf32>
    %c0_36 = arith.constant 0 : index
    %c0_37 = arith.constant 0 : index
    %44 = vector.load %arg5[%c0_36, %c0_37] : memref<8x1xf32, #tpu.memory_space<vmem>>, vector<8x1xf32>
    %45 = vector.broadcast %44 : vector<8x1xf32> to vector<8x1024xf32>
    %46 = arith.addf %43, %45 : vector<8x1024xf32>
    %cst_38 = arith.constant 0.000000e+00 : f32
    %47 = vector.broadcast %cst_38 : f32 to vector<8x1024xf32>
    %48 = arith.maximumf %46, %47 : vector<8x1024xf32>
    %c0_39 = arith.constant 0 : index
    %c128_40 = arith.constant 128 : index
    %49 = vector.load %arg11[%c0_39, %c128_40] : memref<12x1280xf32, #tpu.memory_space<vmem>>, vector<8x1024xf32>
    tpu.vector_store %arg11[%c0_39, %c128_40], %48 {strides = array<i32>} : memref<12x1280xf32, #tpu.memory_space<vmem>>, vector<8x1024xf32>,
    %c0_41 = arith.constant 0 : index
    %c95_42 = arith.constant 95 : index
    %50 = vector.load %arg11[%c0_41, %c95_42] : memref<12x1280xf32, #tpu.memory_space<vmem>>, vector<12x1024xf32>
    %51 = vector.broadcast %9 : vector<1x1024xf32> to vector<12x1024xf32>
    %52 = arith.mulf %50, %51 : vector<12x1024xf32>
    %c0_43 = arith.constant 0 : index
    %c0_44 = arith.constant 0 : index
    %53 = vector.load %arg13[%c0_43, %c0_44] : memref<108x1024xf32, #tpu.memory_space<vmem>>, vector<12x1024xf32>
    tpu.vector_store %arg13[%c0_43, %c0_44], %52 {strides = array<i32>} : memref<108x1024xf32, #tpu.memory_space<vmem>>, vector<12x1024xf32>,
    %c0_45 = arith.constant 0 : index
    %c96_46 = arith.constant 96 : index
    %54 = vector.load %arg11[%c0_45, %c96_46] : memref<12x1280xf32, #tpu.memory_space<vmem>>, vector<12x1024xf32>
    %c12_47 = arith.constant 12 : index
    %c0_48 = arith.constant 0 : index
    %55 = vector.load %arg13[%c12_47, %c0_48] : memref<108x1024xf32, #tpu.memory_space<vmem>>, vector<12x1024xf32>
    tpu.vector_store %arg13[%c12_47, %c0_48], %54 {strides = array<i32>} : memref<108x1024xf32, #tpu.memory_space<vmem>>, vector<12x1024xf32>,
    %c0_49 = arith.constant 0 : index
    %c97_50 = arith.constant 97 : index
    %56 = vector.load %arg11[%c0_49, %c97_50] : memref<12x1280xf32, #tpu.memory_space<vmem>>, vector<12x1024xf32>
    %57 = vector.broadcast %10 : vector<1x1024xf32> to vector<12x1024xf32>
    %58 = arith.mulf %56, %57 : vector<12x1024xf32>
    %c24_51 = arith.constant 24 : index
    %c0_52 = arith.constant 0 : index
    %59 = vector.load %arg13[%c24_51, %c0_52] : memref<108x1024xf32, #tpu.memory_space<vmem>>, vector<12x1024xf32>
    tpu.vector_store %arg13[%c24_51, %c0_52], %58 {strides = array<i32>} : memref<108x1024xf32, #tpu.memory_space<vmem>>, vector<12x1024xf32>,
    %c0_53 = arith.constant 0 : index
    %c127_54 = arith.constant 127 : index
    %60 = vector.load %arg11[%c0_53, %c127_54] : memref<12x1280xf32, #tpu.memory_space<vmem>>, vector<12x1024xf32>
    %61 = vector.broadcast %9 : vector<1x1024xf32> to vector<12x1024xf32>
    %62 = arith.mulf %60, %61 : vector<12x1024xf32>
    %c36 = arith.constant 36 : index
    %c0_55 = arith.constant 0 : index
    %63 = vector.load %arg13[%c36, %c0_55] : memref<108x1024xf32, #tpu.memory_space<vmem>>, vector<12x1024xf32>
    tpu.vector_store %arg13[%c36, %c0_55], %62 {strides = array<i32>} : memref<108x1024xf32, #tpu.memory_space<vmem>>, vector<12x1024xf32>,
    %c0_56 = arith.constant 0 : index
    %c128_57 = arith.constant 128 : index
    %64 = vector.load %arg11[%c0_56, %c128_57] : memref<12x1280xf32, #tpu.memory_space<vmem>>, vector<12x1024xf32>
    %c48 = arith.constant 48 : index
    %c0_58 = arith.constant 0 : index
    %65 = vector.load %arg13[%c48, %c0_58] : memref<108x1024xf32, #tpu.memory_space<vmem>>, vector<12x1024xf32>
    tpu.vector_store %arg13[%c48, %c0_58], %64 {strides = array<i32>} : memref<108x1024xf32, #tpu.memory_space<vmem>>, vector<12x1024xf32>,
    %c0_59 = arith.constant 0 : index
    %c129_60 = arith.constant 129 : index
    %66 = vector.load %arg11[%c0_59, %c129_60] : memref<12x1280xf32, #tpu.memory_space<vmem>>, vector<12x1024xf32>
    %67 = vector.broadcast %10 : vector<1x1024xf32> to vector<12x1024xf32>
    %68 = arith.mulf %66, %67 : vector<12x1024xf32>
    %c60 = arith.constant 60 : index
    %c0_61 = arith.constant 0 : index
    %69 = vector.load %arg13[%c60, %c0_61] : memref<108x1024xf32, #tpu.memory_space<vmem>>, vector<12x1024xf32>
    tpu.vector_store %arg13[%c60, %c0_61], %68 {strides = array<i32>} : memref<108x1024xf32, #tpu.memory_space<vmem>>, vector<12x1024xf32>,
    %c0_62 = arith.constant 0 : index
    %c159_63 = arith.constant 159 : index
    %70 = vector.load %arg11[%c0_62, %c159_63] : memref<12x1280xf32, #tpu.memory_space<vmem>>, vector<12x1024xf32>
    %71 = vector.broadcast %9 : vector<1x1024xf32> to vector<12x1024xf32>
    %72 = arith.mulf %70, %71 : vector<12x1024xf32>
    %c72 = arith.constant 72 : index
    %c0_64 = arith.constant 0 : index
    %73 = vector.load %arg13[%c72, %c0_64] : memref<108x1024xf32, #tpu.memory_space<vmem>>, vector<12x1024xf32>
    tpu.vector_store %arg13[%c72, %c0_64], %72 {strides = array<i32>} : memref<108x1024xf32, #tpu.memory_space<vmem>>, vector<12x1024xf32>,
    %c0_65 = arith.constant 0 : index
    %c160_66 = arith.constant 160 : index
    %74 = vector.load %arg11[%c0_65, %c160_66] : memref<12x1280xf32, #tpu.memory_space<vmem>>, vector<12x1024xf32>
    %c84 = arith.constant 84 : index
    %c0_67 = arith.constant 0 : index
    %75 = vector.load %arg13[%c84, %c0_67] : memref<108x1024xf32, #tpu.memory_space<vmem>>, vector<12x1024xf32>
    tpu.vector_store %arg13[%c84, %c0_67], %74 {strides = array<i32>} : memref<108x1024xf32, #tpu.memory_space<vmem>>, vector<12x1024xf32>,
    %c0_68 = arith.constant 0 : index
    %c161_69 = arith.constant 161 : index
    %76 = vector.load %arg11[%c0_68, %c161_69] : memref<12x1280xf32, #tpu.memory_space<vmem>>, vector<12x1024xf32>
    %77 = vector.broadcast %10 : vector<1x1024xf32> to vector<12x1024xf32>
    %78 = arith.mulf %76, %77 : vector<12x1024xf32>
    %c96_70 = arith.constant 96 : index
    %c0_71 = arith.constant 0 : index
    %79 = vector.load %arg13[%c96_70, %c0_71] : memref<108x1024xf32, #tpu.memory_space<vmem>>, vector<12x1024xf32>
    tpu.vector_store %arg13[%c96_70, %c0_71], %78 {strides = array<i32>} : memref<108x1024xf32, #tpu.memory_space<vmem>>, vector<12x1024xf32>,
    %c0_72 = arith.constant 0 : index
    %c0_73 = arith.constant 0 : index
    %80 = vector.load %arg4[%c0_72, %c0_73] : memref<8x108xf32, #tpu.memory_space<vmem>>, vector<8x108xf32>
    %c0_74 = arith.constant 0 : index
    %c0_75 = arith.constant 0 : index
    %81 = vector.load %arg13[%c0_74, %c0_75] : memref<108x1024xf32, #tpu.memory_space<vmem>>, vector<108x1024xf32>
    %cst_76 = arith.constant dense<0.000000e+00> : vector<8x1024xf32>
    %82 = tpu.matmul %80, %81, %cst_76 {dimension_numbers = #tpu.dot_dimension_numbers<[1], [0], [0], [1], [0, 0, 1, 1], [], []>} : vector<8x108xf32>, vector<108x1024xf32>, vector<8x1024xf32> -> vector<8x1024xf32>
    %83 = arith.index_cast %arg0 : i32 to index
    %c0_77 = arith.constant 0 : index
    %c0_78 = arith.constant 0 : index
    %84 = vector.load %arg9[%83, %c0_77, %c0_78] : memref<2x8x1024xf32, #tpu.memory_space<vmem>>, vector<1x8x1024xf32>
    %85 = vector.shape_cast %84 : vector<1x8x1024xf32> to vector<8x1024xf32>
    %86 = vector.shape_cast %82 : vector<8x1024xf32> to vector<1x8x1024xf32>
    tpu.vector_store %arg9[%83, %c0_77, %c0_78], %86 {strides = array<i32>} : memref<2x8x1024xf32, #tpu.memory_space<vmem>>, vector<1x8x1024xf32>,
    %c1_i32 = arith.constant 1 : i32
    %87 = arith.cmpi eq, %arg0, %c1_i32 : i32
    %88 = arith.extui %87 : i1 to i32
    %c0_i32_79 = arith.constant 0 : i32
    %89 = arith.cmpi ne, %88, %c0_i32_79 : i32
    scf.if %89 {
      %c0_80 = arith.constant 0 : index
      %c0_81 = arith.constant 0 : index
      %c0_82 = arith.constant 0 : index
      %90 = vector.load %arg9[%c0_80, %c0_81, %c0_82] : memref<2x8x1024xf32, #tpu.memory_space<vmem>>, vector<2x8x1024xf32>
      %cst_83 = arith.constant dense<0.000000e+00> : vector<8x1024xf32>
      %91 = vector.multi_reduction <add>, %90, %cst_83 [0] : vector<2x8x1024xf32> to vector<8x1024xf32>
      %cst_84 = arith.constant dense<0.000000e+00> : vector<8xf32>
      %92 = vector.multi_reduction <add>, %91, %cst_84 [1] : vector<8x1024xf32> to vector<8xf32>
      %93 = vector.shape_cast %92 : vector<8xf32> to vector<8x1xf32>
      %cst_85 = arith.constant 2.048000e+03 : f32
      %94 = vector.broadcast %cst_85 : f32 to vector<8x1xf32>
      %95 = arith.divf %93, %94 : vector<8x1xf32>
      %96 = vector.shape_cast %95 : vector<8x1xf32> to vector<1x8x1xf32>
      %97 = vector.broadcast %96 : vector<1x8x1xf32> to vector<2x8x1024xf32>
      %98 = arith.subf %90, %97 : vector<2x8x1024xf32>
      %99 = arith.mulf %98, %98 : vector<2x8x1024xf32>
      %cst_86 = arith.constant dense<0.000000e+00> : vector<8x1024xf32>
      %100 = vector.multi_reduction <add>, %99, %cst_86 [0] : vector<2x8x1024xf32> to vector<8x1024xf32>
      %cst_87 = arith.constant dense<0.000000e+00> : vector<8xf32>
      %101 = vector.multi_reduction <add>, %100, %cst_87 [1] : vector<8x1024xf32> to vector<8xf32>
      %102 = vector.shape_cast %101 : vector<8xf32> to vector<8x1xf32>
      %cst_88 = arith.constant 2.048000e+03 : f32
      %103 = vector.broadcast %cst_88 : f32 to vector<8x1xf32>
      %104 = arith.divf %102, %103 : vector<8x1xf32>
      %c0_89 = arith.constant 0 : index
      %c0_90 = arith.constant 0 : index
      %105 = vector.load %arg7[%c0_89, %c0_90] : memref<8x1xf32, #tpu.memory_space<vmem>>, vector<8x1xf32>
      %cst_91 = arith.constant 9.99999974E-6 : f32
      %106 = vector.broadcast %cst_91 : f32 to vector<8x1xf32>
      %107 = arith.addf %104, %106 : vector<8x1xf32>
      %108 = math.rsqrt %107 : vector<8x1xf32>
      %109 = arith.mulf %105, %108 : vector<8x1xf32>
      %c0_92 = arith.constant 0 : index
      %c0_93 = arith.constant 0 : index
      %110 = vector.load %arg8[%c0_92, %c0_93] : memref<8x1xf32, #tpu.memory_space<vmem>>, vector<8x1xf32>
      %111 = arith.mulf %95, %109 : vector<8x1xf32>
      %112 = arith.subf %110, %111 : vector<8x1xf32>
      %113 = vector.shape_cast %109 : vector<8x1xf32> to vector<1x8x1xf32>
      %114 = vector.broadcast %113 : vector<1x8x1xf32> to vector<2x8x1024xf32>
      %115 = arith.mulf %90, %114 : vector<2x8x1024xf32>
      %116 = vector.shape_cast %112 : vector<8x1xf32> to vector<1x8x1xf32>
      %117 = vector.broadcast %116 : vector<1x8x1xf32> to vector<2x8x1024xf32>
      %118 = arith.addf %115, %117 : vector<2x8x1024xf32>
      %cst_94 = arith.constant 0.000000e+00 : f32
      %119 = vector.broadcast %cst_94 : f32 to vector<2x8x1024xf32>
      %120 = arith.maximumf %118, %119 : vector<2x8x1024xf32>
      %c0_95 = arith.constant 0 : index
      %c0_96 = arith.constant 0 : index
      %c0_97 = arith.constant 0 : index
      %121 = vector.load %arg9[%c0_95, %c0_96, %c0_97] : memref<2x8x1024xf32, #tpu.memory_space<vmem>>, vector<2x8x1024xf32>
      tpu.vector_store %arg9[%c0_95, %c0_96, %c0_97], %120 {strides = array<i32>} : memref<2x8x1024xf32, #tpu.memory_space<vmem>>, vector<2x8x1024xf32>,
    } else {
    }
    return
  }
  func.func @transform_0(%arg0: i32) -> (i32, i32, i32) {
    %c0_i32 = arith.constant 0 : i32
    %c0_i32_0 = arith.constant 0 : i32
    %c0_i32_1 = arith.constant 0 : i32
    return %arg0, %c0_i32, %c0_i32_0 : i32, i32, i32
  }
  func.func @transform_1(%arg0: i32) -> (i32, i32, i32) {
    %c0_i32 = arith.constant 0 : i32
    %c0_i32_0 = arith.constant 0 : i32
    %c0_i32_1 = arith.constant 0 : i32
    return %arg0, %c0_i32, %c0_i32_0 : i32, i32, i32
  }
  func.func @transform_2(%arg0: i32) -> (i32, i32) {
    %c0_i32 = arith.constant 0 : i32
    %c0_i32_0 = arith.constant 0 : i32
    %c0_i32_1 = arith.constant 0 : i32
    return %c0_i32, %c0_i32_0 : i32, i32
  }
  func.func @transform_3(%arg0: i32) -> (i32, i32) {
    %c0_i32 = arith.constant 0 : i32
    %c0_i32_0 = arith.constant 0 : i32
    %c0_i32_1 = arith.constant 0 : i32
    return %c0_i32, %c0_i32_0 : i32, i32
  }
  func.func @transform_4(%arg0: i32) -> (i32, i32) {
    %c0_i32 = arith.constant 0 : i32
    %c0_i32_0 = arith.constant 0 : i32
    %c0_i32_1 = arith.constant 0 : i32
    return %c0_i32, %c0_i32_0 : i32, i32
  }
  func.func @transform_5(%arg0: i32) -> (i32, i32) {
    %c0_i32 = arith.constant 0 : i32
    %c0_i32_0 = arith.constant 0 : i32
    %c0_i32_1 = arith.constant 0 : i32
    return %c0_i32, %c0_i32_0 : i32, i32
  }
  func.func @transform_6(%arg0: i32) -> (i32, i32) {
    %c0_i32 = arith.constant 0 : i32
    %c0_i32_0 = arith.constant 0 : i32
    %c0_i32_1 = arith.constant 0 : i32
    return %c0_i32, %c0_i32_0 : i32, i32
  }
  func.func @transform_7(%arg0: i32) -> (i32, i32) {
    %c0_i32 = arith.constant 0 : i32
    %c0_i32_0 = arith.constant 0 : i32
    %c0_i32_1 = arith.constant 0 : i32
    return %c0_i32, %c0_i32_0 : i32, i32
  }
  func.func @transform_8(%arg0: i32) -> (i32, i32, i32) {
    %c0_i32 = arith.constant 0 : i32
    %c0_i32_0 = arith.constant 0 : i32
    %c0_i32_1 = arith.constant 0 : i32
    %c0_i32_2 = arith.constant 0 : i32
    return %c0_i32, %c0_i32_0, %c0_i32_1 : i32, i32, i32
  }
}

</mosaic_0001>

<bundles_post_ra>
// kernel: deconv_block_forward.1
= control target key start
LH: loop header
LB: loop body
LE: loop exit
PB: predicated region body
PF: predicated region fallthrough
CT: control target
= control target key end

     0   :  { %s3521_s27 = smov 0   ;;  %s5321_s0 = inlined_call_operand.vmem [shape: f32[2,4,1024], index: 0, kind: input, shape index: {}]   ;;  %s5322_s1 = inlined_call_operand.vmem [shape: f32[2,4,1024], index: 1, kind: input, shape index: {}]   ;;  %s5323_s2 = inlined_call_operand.vmem [shape: f32[8,36], index: 2, kind: input, shape index: {}]   ;;  %s5324_s3 = inlined_call_operand.vmem [shape: f32[8,108], index: 3, kind: input, shape index: {}]   ;;  %s5325_s4 = inlined_call_operand.vmem [shape: f32[8,1], index: 4, kind: input, shape index: {}]   ;;  %s5326_s5 = inlined_call_operand.vmem [shape: f32[2,1024], index: 5, kind: input, shape index: {}]   ;;  %s5327_s6 = inlined_call_operand.vmem [shape: f32[8,1], index: 6, kind: input, shape index: {}]   ;;  %s5328_s7 = inlined_call_operand.vmem [shape: f32[8,1], index: 7, kind: input, shape index: {}]   ;;  %s5329_s8 = inlined_call_operand.vmem [shape: f32[2,8,1024], index: 8, kind: output, shape index: {}]  }
   0x1 LB: > { %s3527_s28 = sadd.s32 4294967295, %s3462_s27   ;;  %p3376_p0 = scmp.ge.s32.totalorder %s3462_s27, 1  ;;  %s3462_s27 = sphi %s3521_s27, %s18_s27  }
   0x2   : > { %p267_p1 = scmp.lt.s32.totalorder %s3462_s27, 3 }
   0x4   : > { %p268_p2 = pnand %p3376_p0, %p267_p1 }
   0x6   : > { %271 = sbr.rel (%p268_p2) target bundleno = 2116 (0x844), region = 52 }
   0xb   : > { %p301_p3 = scmp.lt.s32.totalorder %s3527_s28, 1  ;;  %p3381_p4 = scmp.ne.s32.totalorder %s3527_s28, 0 }
   0xd   : > { %s302_s29 = scalar_select %p301_p3, %s3527_s28, 1 }
   0xe   : > { %314 = sbr.rel (%p3381_p4) target bundleno = 26 (0x1a), region = 56 }
   0xf   : > { %s3420_s30 = sshll.u32 %s302_s29, 5 }
  0x10   : > { %s3536_s11 = scalar_lea.vmem %s5321_s0, %s3420_s30  ;;  %s3541_s14 = scalar_lea.vmem %s5322_s1, %s3420_s30 }
  0x13   : > { %v3464_v0 = vmov 0.0  }
  0x14   : > { %315 = vst [vmem:[#allocation2] sm:$0xf] %v3464_v0 }
  0x15   : > { %316 = vst [vmem:[#allocation2 + $0x24] sm:$0xf] %v3464_v0 }
  0x16   : > { %317 = vst [vmem:[#allocation3] sm:$0xff] %v3464_v0 }
  0x17   : > { %318 = vst [vmem:[#allocation3 + $0x70] sm:$0xf] %v3464_v0 }
  0x18   : > { %319 = vst [vmem:[#allocation3 + $0x88] sm:$0xff] %v3464_v0 }
  0x19   : > { %320 = vst [vmem:[#allocation3 + $0x98] sm:$0xf] %v3464_v0 }
  0x1a PF: > { %v368_v1 = vld [vmem:[%s5326_s5] ss:$2 sm:$0xff]  ;;  %vm389_vm0 = vcmask 1043456   ;;  %s3465_s17 = smov 95   ;;  %v3382_v14 = vld [vmem:[%s5326_s5 + $0x1] ss:$2 sm:$0xff] }
  0x1b   : > { %v3547_v2 = vperm.slane %v368_v1, 4  ;;  %v3549_v3 = vperm.slane %v368_v1, 5  ;;  %v3551_v4 = vperm.slane %v368_v1, 0  ;;  %v3553_v5 = vperm.slane %v368_v1, 1  ;;  %s3466_s20 = smov 97   ;;  %s3467_s21 = smov 127  }
  0x1c   : > { %v3557_v8 = vperm.slane %v368_v1, 7  ;;  %v3559_v9 = vperm.slane %v368_v1, 3  ;;  %v3567_v12 = vperm.slane %v368_v1, 6  ;;  %v3569_v13 = vperm.slane %v368_v1, 2  ;;  %s3468_s22 = smov 1   ;;  %s3469_s23 = smov 31  }
  0x1d   : > { %v387_v6 = vrot.slane %v3549_v3, 4  ;;  %v385_v7 = vrot.slane %v3553_v5, 4  ;;  %v3576_v17 = vperm.slane %v3382_v14, 2  ;;  %v3578_v18 = vperm.slane %v3382_v14, 3  ;;  %v3643_v35 = vld [vmem:[%s3536_s11] sm:$0xff]  ;;  %v3648_v37 = vld [vmem:[%s3536_s11 + $0x18] sm:$0xff] }
  0x1e   : > { %v388_v15 = vrot.slane %v3557_v8, 4  ;;  %v386_v16 = vrot.slane %v3559_v9, 4  ;;  %v3581_v20 = vperm.slane %v3382_v14, 1  ;;  %v3587_v23 = vperm.slane %v3382_v14, 5  ;;  %325 = vst [vmem:[#allocation2 + $0x4] sm:$0xff] %v3643_v35  ;;  %v329_v36 = vld [vmem:[%s3541_s14] sm:$0xff] }
  0x1f   : > { %v392_v10 = vsel %vm389_vm0, %v3547_v2, %v387_v6  ;;  %v390_v11 = vsel %vm389_vm0, %v3551_v4, %v385_v7  ;;  %v575_v19 = vrot.slane %v3578_v18, 4  ;;  %v3597_v25 = vperm.slane %v3382_v14, 0  ;;  %337 = vst [vmem:[#allocation1] ss:$2 sm:$0xff] %v329_v36  ;;  %v3652_v39 = vld [vmem:[%s3536_s11 + $0x10] sm:$0xff]  ;;  %v332_v41 = vld [vmem:[%s3541_s14 + $0x18] sm:$0xff] }
  0x20   : > { %398 = vrot.lane.b32.xlu1 %v392_v10, %s3465_s17  ;;  %394 = vrot.lane.b32.xlu0 %v390_v11, %s3465_s17  ;;  %v393_v21 = vsel %vm389_vm0, %v3567_v12, %v388_v15  ;;  %v391_v22 = vsel %vm389_vm0, %v3569_v13, %v386_v16  ;;  %v574_v26 = vrot.slane %v3581_v20, 4  ;;  %v3600_v27 = vperm.slane %v3382_v14, 4  ;;  %328 = vst [vmem:[#allocation2 + $0x1c] sm:$0xff] %v3648_v37  ;;  %v3656_v42 = vld [vmem:[%s3536_s11 + $0x8] sm:$0xff]  ;;  %v331_v44 = vld [vmem:[%s3541_s14 + $0x10] sm:$0xff]  ;;  %s3470_s24 = smov 33  }
  0x21   : > { %v3591_v24 = vsel %vm389_vm0, %v3576_v17, %v575_v19  ;;  %v576_v28 = vrot.slane %v3587_v23, 4  ;;  %v3607_v30 = vperm.slane %v3382_v14, 7  ;;  %v3618_v32 = vperm.slane %v3382_v14, 6  ;;  %327 = vst [vmem:[#allocation2 + $0x14] sm:$0xff] %v3652_v39  ;;  %v330_v43 = vld [vmem:[%s3541_s14 + $0x8] sm:$0xff]  ;;  %s3471_s25 = smov 32  }
  0x22   : > { %584 = vrot.lane.b32.xlu2 %v3591_v24, %s3466_s20  ;;  %v3605_v29 = vsel %vm389_vm0, %v3597_v25, %v574_v26  ;;  %343 = vst [vmem:[#allocation1 + $0x30] ss:$2 sm:$0xff] %v332_v41  ;;  %vm406_vm1 = vcmask 777216   ;;  %vm594_vm2 = vcmask 793600   ;;  %vm694_vm3 = vcmask 1039360   ;;  %s3472_s26 = smov 96  }
  0x23   : > { %v3611_v31 = vsel %vm389_vm0, %v3600_v27, %v576_v28  ;;  %5339 = vst [vmem:[#allocation6_spill] sm:$0xff] %v3618_v32  ;;  %v577_v33 = vrot.slane %v3607_v30, 4  ;;  %vm753_vm4 = vcmask 7168   ;;  %vm652_vm5 = vcmask 252928   ;;  %s3422_s13 = sshll.u32 %s3527_s28, 6  ;;  %p3417_p5 = scmp.ne.s32.totalorder %s3527_s28, 1 }
  0x24   : > { %326 = vst [vmem:[#allocation2 + $0xc] sm:$0xff] %v3656_v42  ;;  %vm464_vm6 = vcmask 269312   ;;  %vm535_vm7 = vcmask 261120   ;;  %vm1060_vm8 = vcmask 785408   ;;  %vm1230_vm9 = vcmask 293888   ;;  %s3137_s16 = scalar_lea.vmem %s5329_s8, %s3422_s13 }
  0x25   : > { %v3623_v34 = vsel %vm389_vm0, %v3618_v32, %v577_v33  ;;  %339 = vst [vmem:[#allocation1 + $0x10] ss:$2 sm:$0xff] %v330_v43  ;;  %v3662_v53 = vld [vmem:[#allocation2] sm:$0xff]  ;;  %vm2947_vm10 = vcmask 883712  }
  0x26   : > { %v344_v38 = vld.sshfl [vmem:[#allocation1] sm:$0xff pattern:$0x75316420]  ;;  %v345_v40 = vld.sshfl [vmem:[#allocation1 + $0x8] sm:$0xff pattern:$0x75316420] }
  0x27   : > { %360 = vst [vmem:[#allocation3 + $0x68] sm:$0xf] %v344_v38  ;;  %v375_v60 = vld [vmem:[#allocation2 + $0x20] sm:$0xf] }
  0x28   : > { %400 = vrot.lane.b32.xlu1 %v393_v21, %s3465_s17  ;;  %396 = vrot.lane.b32.xlu0 %v391_v22, %s3465_s17  ;;  %361 = vst [vmem:[#allocation3 + $0x10] sm:$0xf] %v345_v40  ;;  %v3666_v0 = vld [vmem:[#allocation2 + $0x18] sm:$0xff] }
  0x29   : > { %341 = vst [vmem:[#allocation1 + $0x20] ss:$2 sm:$0xff] %v331_v44  ;;  %v350_v45 = vld.sshfl [vmem:[#allocation1 + $0x30] sm:$0xff pattern:$0x75316420] }
  0x2a   : > { %682 = vrot.lane.b32.xlu2 %v390_v11, %s3467_s21  ;;  %v351_v46 = vld.sshfl [vmem:[#allocation1 + $0x38] sm:$0xff pattern:$0x75316420]  ;;  %366 = vst [vmem:[#allocation3 + $0x60] sm:$0xf] %v350_v45 }
  0x2b   : > { %367 = vst [vmem:[#allocation3 + $0x78] sm:$0xf] %v351_v46  ;;  %v3668_v1 = vld [vmem:[#allocation2 + $0x8] sm:$0xff]  ;;  %v3670_v6 = vld [vmem:[#allocation2 + $0x10] sm:$0xff] }
  0x2c   : > { %v346_v47 = vld.sshfl [vmem:[#allocation1 + $0x10] sm:$0xff pattern:$0x75316420]  ;;  %v347_v48 = vld.sshfl [vmem:[#allocation1 + $0x18] sm:$0xff pattern:$0x75316420] }
  0x2d   : > { %362 = vst [vmem:[#allocation3 + $0x20] sm:$0xf] %v346_v47 }
  0x2e   : > { %363 = vst [vmem:[#allocation3 + $0x28] sm:$0xf] %v347_v48 }
  0x30   : > { %582 = vrot.lane.b32.xlu1 %v3605_v29, %s3466_s20  ;;  %586 = vrot.lane.b32.xlu0 %v3611_v31, %s3466_s20  ;;  %v348_v49 = vld.sshfl [vmem:[#allocation1 + $0x20] sm:$0xff pattern:$0x75316420]  ;;  %v349_v50 = vld.sshfl [vmem:[#allocation1 + $0x28] sm:$0xff pattern:$0x75316420] }
  0x31   : > { %364 = vst [vmem:[#allocation3 + $0x50] sm:$0xf] %v348_v49 }
  0x32   : > { %688 = vrot.lane.b32.xlu2 %v393_v21, %s3467_s21  ;;  %365 = vst [vmem:[#allocation3 + $0x30] sm:$0xf] %v349_v50 }
  0x38   : > { %588 = vrot.lane.b32.xlu1 %v3623_v34, %s3466_s20  ;;  %684 = vrot.lane.b32.xlu0 %v391_v22, %s3467_s21 }
  0x3a   : > { %826 = vrot.lane.b32.xlu2 %v3611_v31, %s3468_s22 }
  0x40   : > { %686 = vrot.lane.b32.xlu1 %v392_v10, %s3467_s21  ;;  %822 = vrot.lane.b32.xlu0 %v3605_v29, %s3468_s22 }
  0x42   : > { %923 = vrot.lane.b32.xlu2 %v391_v22, %s3469_s23 }
  0x48   : > { %824 = vrot.lane.b32.xlu1 %v3591_v24, %s3468_s22  ;;  %828 = vrot.lane.b32.xlu0 %v3623_v34, %s3468_s22 }
  0x50   : > { %921 = vrot.lane.b32.xlu1 %v390_v11, %s3469_s23  ;;  %925 = vrot.lane.b32.xlu0 %v392_v10, %s3469_s23 }
  0x58   : > { %927 = vrot.lane.b32.xlu1 %v393_v21, %s3469_s23 }
  0x7c   : > { %v585_v58 = vpop.permute.xlu2 %584 }
  0x7d   : > { %v591_v41 = vrot.slane %v585_v58, 4 }
  0x84   : > { %v3682_v40 = vpop.permute.xlu2 %682 }
  0x92   : > { %v399_v51 = vpop.permute.xlu1 %398  ;;  %v395_v52 = vpop.permute.xlu0 %394 }
  0x93   : > { %v402_v54 = vrot.slane %v395_v52, 4  ;;  %v404_v57 = vrot.slane %v399_v51, 4 }
  0x95   : > { %v407_v55 = vsel %vm406_vm1, %v402_v54, %v395_v52 }
  0x96   : > { %v419_v56 = vmul.f32 %v407_v55, %v3662_v53 }
  0x98   : > { %429 = vst [vmem:[#allocation1] ss:$2 sm:$0xff] %v419_v56 }
  0x9a   : > { %v401_v59 = vpop.permute.xlu1 %400  ;;  %v397_v61 = vpop.permute.xlu0 %396 }
  0x9b   : > { %v405_v62 = vrot.slane %v401_v59, 4  ;;  %v403_v63 = vrot.slane %v397_v61, 4 }
  0x9d   : > { %v412_v7 = vsel %vm389_vm0, %v404_v57, %v405_v62  ;;  %v423_v10 = vmul.f32 %v405_v62, %v375_v60  ;;  %v408_v11 = vsel %vm389_vm0, %v402_v54, %v403_v63  ;;  %v410_v14 = vsel %vm389_vm0, %v403_v63, %v404_v57  ;;  %v493_v62 = vld [vmem:[#allocation2 + $0x20] sm:$0xf] }
  0x9e   : > { %v413_v15 = vsel %vm406_vm1, %v412_v7, %v401_v59  ;;  %v409_v16 = vsel %vm406_vm1, %v408_v11, %v397_v61  ;;  %v411_v19 = vsel %vm406_vm1, %v410_v14, %v399_v51  ;;  %v690_v57 = vrot.slane %v3682_v40, 4  ;;  %v3703_v7 = vpop.permute.xlu2 %688 }
  0x9f   : > { %v436_v21 = vld.sshfl [vmem:[#allocation1] sm:$0xff pattern:$0x75316420]  ;;  %v437_v22 = vld.sshfl [vmem:[#allocation1 + $0x8] sm:$0xff pattern:$0x75316420]  ;;  %v422_v26 = vmul.f32 %v413_v15, %v3666_v0  ;;  %v420_v28 = vmul.f32 %v409_v16, %v3668_v1  ;;  %v421_v33 = vmul.f32 %v411_v19, %v3670_v6 }
  0xa0   : > { %444 = vst [vmem:[#allocation1] ss:$2 sm:$0xff] %v423_v10  ;;  %446 = vrot.lane.b32.xlu2 %v436_v21, %s3470_s24  ;;  %v5333_v19 = vrot.slane %v3703_v7, 4 }
  0xa1   : > { %435 = vst [vmem:[#allocation1 + $0x30] ss:$2 sm:$0xff] %v422_v26 }
  0xa2   : > { %431 = vst [vmem:[#allocation1 + $0x10] ss:$2 sm:$0xff] %v420_v28  ;;  %v583_v36 = vpop.permute.xlu1 %582  ;;  %v587_v38 = vpop.permute.xlu0 %586 }
  0xa3   : > { %433 = vst [vmem:[#allocation1 + $0x20] ss:$2 sm:$0xff] %v421_v33  ;;  %v590_v43 = vrot.slane %v583_v36, 4  ;;  %v592_v47 = vrot.slane %v587_v38, 4 }
  0xa5   : > { %v596_v46 = vsel %vm389_vm0, %v590_v43, %v591_v41  ;;  %v598_v59 = vsel %vm389_vm0, %v591_v41, %v592_v47  ;;  %v595_v21 = vsel %vm594_vm2, %v590_v43, %v583_v36 }
  0xa6   : > { %v597_v55 = vsel %vm594_vm2, %v596_v46, %v585_v58  ;;  %v599_v15 = vsel %vm594_vm2, %v598_v59, %v587_v38 }
  0xa7   : > { %v3684_v44 = vld.sshfl [vmem:[#allocation1] sm:$0xff pattern:$0x75316420]  ;;  %v608_v58 = vmul.f32 %v597_v55, %v3668_v1  ;;  %v609_v33 = vmul.f32 %v599_v15, %v3670_v6  ;;  %v564_v15 = vld [vmem:[#allocation2 + $0x20] sm:$0xf] }
  0xa8   : > { %500 = vst [vmem:[#allocation1 + $0x1] ss:$2 sm:$0xff] %v3662_v53  ;;  %448 = vrot.lane.b32.xlu2 %v437_v22, %s3470_s24  ;;  %v442_v45 = vld.sshfl [vmem:[#allocation1 + $0x30] sm:$0xff pattern:$0x75316420] }
  0xa9   : > { %v439_v48 = vld.sshfl [vmem:[#allocation1 + $0x18] sm:$0xff pattern:$0x75316420]  ;;  %v438_v49 = vld.sshfl [vmem:[#allocation1 + $0x10] sm:$0xff pattern:$0x75316420] }
  0xaa   : > { %452 = vrot.lane.b32.xlu1 %v439_v48, %s3470_s24  ;;  %450 = vrot.lane.b32.xlu0 %v438_v49, %s3470_s24  ;;  %502 = vst [vmem:[#allocation1 + $0x11] ss:$2 sm:$0xff] %v3668_v1  ;;  %v440_v50 = vld.sshfl [vmem:[#allocation1 + $0x20] sm:$0xff pattern:$0x75316420]  ;;  %v3692_v51 = vpop.permute.xlu1 %588  ;;  %v685_v52 = vpop.permute.xlu0 %684  ;;  %v607_v48 = vmul.f32 %v595_v21, %v3662_v53 }
  0xab   : > { %v441_v54 = vld.sshfl [vmem:[#allocation1 + $0x28] sm:$0xff pattern:$0x75316420]  ;;  %v593_v56 = vrot.slane %v3692_v51, 4  ;;  %v691_v61 = vrot.slane %v685_v52, 4 }
  0xac   : > { %504 = vst [vmem:[#allocation1 + $0x21] ss:$2 sm:$0xff] %v3670_v6  ;;  %v443_v60 = vld.sshfl [vmem:[#allocation1 + $0x38] sm:$0xff pattern:$0x75316420] }
  0xad   : > { %v600_v63 = vsel %vm389_vm0, %v592_v47, %v593_v56  ;;  %506 = vst [vmem:[#allocation1 + $0x31] ss:$2 sm:$0xff] %v3666_v0  ;;  %v696_v16 = vsel %vm389_vm0, %v690_v57, %v691_v61 }
  0xae   : > { %v601_v10 = vsel %vm594_vm2, %v600_v63, %v3692_v51  ;;  %v697_v46 = vsel %vm694_vm3, %v696_v16, %v685_v52 }
  0xaf   : > { %v3708_v11 = vld.sshfl [vmem:[#allocation1] sm:$0xff pattern:$0x75316420]  ;;  %v3710_v14 = vld.sshfl [vmem:[#allocation1 + $0x8] sm:$0xff pattern:$0x75316420]  ;;  %v610_v22 = vmul.f32 %v601_v10, %v3666_v0  ;;  %v827_v10 = vpop.permute.xlu2 %826 }
  0xb0   : > { %515 = vst [vmem:[#allocation1 + $0x1] ss:$2 sm:$0xff] %v493_v62  ;;  %454 = vrot.lane.b32.xlu2 %v440_v50, %s3470_s24 }
  0xb1   : > { %v510_v26 = vld.sshfl [vmem:[#allocation1 + $0x18] sm:$0xff pattern:$0x75316420]  ;;  %v509_v28 = vld.sshfl [vmem:[#allocation1 + $0x10] sm:$0xff pattern:$0x75316420] }
  0xb2   : > { %458 = vrot.lane.b32.xlu1 %v442_v45, %s3470_s24  ;;  %456 = vrot.lane.b32.xlu0 %v441_v54, %s3470_s24  ;;  %v687_v38 = vpop.permute.xlu1 %686  ;;  %619 = vst [vmem:[#allocation1 + $0x10] ss:$2 sm:$0xff] %v608_v58  ;;  %v708_v54 = vmul.f32 %v697_v46, %v3668_v1  ;;  %v3744_v63 = vpop.permute.xlu0 %822 }
  0xb3   : > { %v692_v41 = vrot.slane %v687_v38, 4  ;;  %v511_v47 = vld.sshfl [vmem:[#allocation1 + $0x20] sm:$0xff pattern:$0x75316420] }
  0xb4   : > { %v513_v49 = vld.sshfl [vmem:[#allocation1 + $0x30] sm:$0xff pattern:$0x75316420]  ;;  %v514_v36 = vld.sshfl [vmem:[#allocation1 + $0x38] sm:$0xff pattern:$0x75316420] }
  0xb5   : > { %v698_v43 = vsel %vm389_vm0, %v691_v61, %v692_v41  ;;  %v700_v45 = vsel %vm389_vm0, %v692_v41, %v5333_v19  ;;  %623 = vst [vmem:[#allocation1 + $0x30] ss:$2 sm:$0xff] %v610_v22  ;;  %v512_v50 = vld.sshfl [vmem:[#allocation1 + $0x28] sm:$0xff pattern:$0x75316420] }
  0xb6   : > { %621 = vst [vmem:[#allocation1 + $0x20] ss:$2 sm:$0xff] %v609_v33  ;;  %v699_v55 = vsel %vm694_vm3, %v698_v43, %v687_v38  ;;  %v701_v52 = vsel %vm694_vm3, %v700_v45, %v3703_v7  ;;  %v832_v38 = vrot.slane %v827_v10, 4  ;;  %v695_v45 = vsel %vm694_vm3, %v690_v57, %v3682_v40 }
  0xb7   : > { %v3731_v59 = vld.sshfl [vmem:[#allocation1] sm:$0xff pattern:$0x75316420]  ;;  %v709_v1 = vmul.f32 %v699_v55, %v3670_v6  ;;  %v710_v58 = vmul.f32 %v701_v52, %v3666_v0  ;;  %v611_v6 = vmul.f32 %v593_v56, %v564_v15  ;;  %v707_v15 = vmul.f32 %v695_v45, %v3662_v53 }
  0xb8   : > { %460 = vrot.lane.b32.xlu2 %v443_v60, %s3470_s24  ;;  %617 = vst [vmem:[#allocation1] ss:$2 sm:$0xff] %v607_v48 }
  0xb9   : > { %v3736_v61 = vld.sshfl [vmem:[#allocation1 + $0x10] sm:$0xff pattern:$0x75316420]  ;;  %v3738_v62 = vld.sshfl [vmem:[#allocation1 + $0x18] sm:$0xff pattern:$0x75316420] }
  0xba   : > { %523 = vrot.lane.b32.xlu1 %v510_v26, %s3471_s25  ;;  %462 = vrot.lane.b32.xlu0 %v3684_v44, %s3470_s24  ;;  %720 = vst [vmem:[#allocation1 + $0x11] ss:$2 sm:$0xff] %v708_v54  ;;  %v825_v60 = vpop.permute.xlu1 %824  ;;  %v5332_v44 = vrot.slane %v3744_v63, 4  ;;  %v3772_v56 = vpop.permute.xlu0 %828 }
  0xbb   : > { %v831_v26 = vrot.slane %v825_v60, 4  ;;  %v5330_v52 = vrot.slane %v3772_v56, 4 }
  0xbc   : > { %v3747_v16 = vld.sshfl [vmem:[#allocation1 + $0x38] sm:$0xff pattern:$0x75316420]  ;;  %v3753_v33 = vld.sshfl [vmem:[#allocation1 + $0x30] sm:$0xff pattern:$0x75316420] }
  0xbd   : > { %v3749_v21 = vld.sshfl [vmem:[#allocation1 + $0x20] sm:$0xff pattern:$0x75316420]  ;;  %v3751_v22 = vld.sshfl [vmem:[#allocation1 + $0x28] sm:$0xff pattern:$0x75316420]  ;;  %v835_v51 = vsel %vm389_vm0, %v5332_v44, %v831_v26 }
  0xbe   : > { %722 = vst [vmem:[#allocation1 + $0x21] ss:$2 sm:$0xff] %v709_v1 }
  0xbf   : > { %724 = vst [vmem:[#allocation1 + $0x31] ss:$2 sm:$0xff] %v710_v58  ;;  %v3759_v0 = vld.sshfl [vmem:[#allocation1] sm:$0xff pattern:$0x75316420] }
  0xc0   : > { %525 = vrot.lane.b32.xlu2 %v511_v47, %s3471_s25  ;;  %v3761_v41 = vld.sshfl [vmem:[#allocation1 + $0x8] sm:$0xff pattern:$0x75316420]  ;;  %v924_v47 = vpop.permute.xlu2 %923 }
  0xc1   : > { %v3763_v46 = vld.sshfl [vmem:[#allocation1 + $0x10] sm:$0xff pattern:$0x75316420]  ;;  %v3765_v48 = vld.sshfl [vmem:[#allocation1 + $0x18] sm:$0xff pattern:$0x75316420] }
  0xc2   : > { %529 = vrot.lane.b32.xlu1 %v513_v49, %s3471_s25  ;;  %521 = vrot.lane.b32.xlu0 %v509_v28, %s3471_s25  ;;  %v3774_v43 = vpop.permute.xlu1 %921  ;;  %788 = vst [vmem:[#allocation1 + $0x10] ss:$2 sm:$0xff] %v3656_v42  ;;  %v836_v28 = vsel %vm753_vm4, %v835_v51, %v825_v60  ;;  %v837_v49 = vsel %vm389_vm0, %v831_v26, %v832_v38  ;;  %v930_v58 = vrot.slane %v924_v47, 4 }
  0xc3   : > { %632 = vst [vmem:[#allocation1] ss:$2 sm:$0xff] %v611_v6  ;;  %v5331_v1 = vrot.slane %v3774_v43, 4  ;;  %v847_v57 = vmul.f32 %v836_v28, %v3656_v42  ;;  %v838_v60 = vsel %vm753_vm4, %v837_v49, %v827_v10  ;;  %v839_v26 = vsel %vm389_vm0, %v832_v38, %v5330_v52 }
  0xc4   : > { %v848_v38 = vmul.f32 %v838_v60, %v3652_v39  ;;  %v840_v28 = vsel %vm753_vm4, %v839_v26, %v3772_v56  ;;  %v681_v60 = vld [vmem:[#allocation2 + $0x20] sm:$0xf] }
  0xc5   : > { %v3783_v54 = vld.sshfl [vmem:[#allocation1 + $0x20] sm:$0xff pattern:$0x75316420]  ;;  %v3785_v55 = vld.sshfl [vmem:[#allocation1 + $0x28] sm:$0xff pattern:$0x75316420]  ;;  %v934_v53 = vsel %vm389_vm0, %v5331_v1, %v930_v58  ;;  %v849_v44 = vmul.f32 %v840_v28, %v3648_v37 }
  0xc6   : > { %790 = vst [vmem:[#allocation1 + $0x20] ss:$2 sm:$0xff] %v3652_v39  ;;  %v3791_v6 = vld.sshfl [vmem:[#allocation1 + $0x38] sm:$0xff pattern:$0x75316420] }
  0xc7   : > { %v3793_v40 = vld.sshfl [vmem:[#allocation1 + $0x30] sm:$0xff pattern:$0x75316420] }
  0xc8   : > { %531 = vrot.lane.b32.xlu2 %v514_v36, %s3471_s25  ;;  %792 = vst [vmem:[#allocation1 + $0x30] ss:$2 sm:$0xff] %v3648_v37  ;;  %v926_v36 = vpop.permute.xlu0 %925 }
  0xc9   : > { %v795_v45 = vld.sshfl [vmem:[#allocation1 + $0x10] sm:$0xff pattern:$0x75316420]  ;;  %v931_v49 = vrot.slane %v926_v36, 4 }
  0xca   : > { %527 = vrot.lane.b32.xlu0 %v512_v50, %s3471_s25  ;;  %517 = vrot.lane.b32.xlu1 %v3708_v11, %s3471_s25  ;;  %v3808_v51 = vpop.permute.xlu1 %927  ;;  %v3810_v10 = vld.sshfl [vmem:[#allocation1] sm:$0xff pattern:$0x75316420]  ;;  %v796_v50 = vld.sshfl [vmem:[#allocation1 + $0x18] sm:$0xff pattern:$0x75316420]  ;;  %v935_v11 = vsel %vm652_vm5, %v934_v53, %v924_v47 }
  0xcb   : > { %718 = vst [vmem:[#allocation1 + $0x1] ss:$2 sm:$0xff] %v707_v15  ;;  %v932_v52 = vrot.slane %v3808_v51, 4  ;;  %v936_v19 = vsel %vm389_vm0, %v930_v58, %v931_v49  ;;  %v946_v15 = vmul.f32 %v935_v11, %v3656_v42 }
  0xcc   : > { %859 = vst [vmem:[#allocation1 + $0x11] ss:$2 sm:$0xff] %v847_v57  ;;  %v937_v47 = vsel %vm652_vm5, %v936_v19, %v926_v36 }
  0xcd   : > { %811 = vst [vmem:[#allocation4 + $0x60] sm:$0xf] %v795_v45  ;;  %v797_v1 = vld.sshfl [vmem:[#allocation1 + $0x20] sm:$0xff pattern:$0x75316420]  ;;  %v938_v26 = vsel %vm389_vm0, %v931_v49, %v932_v52  ;;  %v947_v36 = vmul.f32 %v937_v47, %v3652_v39 }
  0xce   : > { %812 = vst [vmem:[#allocation4 + $0xc0] sm:$0xf] %v796_v50  ;;  %v798_v32 = vld.sshfl [vmem:[#allocation1 + $0x28] sm:$0xff pattern:$0x75316420] }
  0xcf   : > { %861 = vst [vmem:[#allocation1 + $0x21] ss:$2 sm:$0xff] %v848_v38  ;;  %v799_v57 = vld.sshfl [vmem:[#allocation1 + $0x30] sm:$0xff pattern:$0x75316420] }
  0xd0   : > { %519 = vrot.lane.b32.xlu2 %v3710_v14, %s3471_s25  ;;  %813 = vst [vmem:[#allocation4 + $0x110] sm:$0xf] %v797_v1  ;;  %v800_v53 = vld.sshfl [vmem:[#allocation1 + $0x38] sm:$0xff pattern:$0x75316420]  ;;  %v5340_v1 = vrot.slane %v3703_v7, 4 }
  0xd1   : > { %814 = vst [vmem:[#allocation4 + $0x20] sm:$0xf] %v798_v32  ;;  %v939_v32 = vsel %vm652_vm5, %v938_v26, %v3808_v51 }
  0xd2   : > { %642 = vrot.lane.b32.xlu0 %v3749_v21, %s3469_s23  ;;  %638 = vrot.lane.b32.xlu1 %v3736_v61, %s3469_s23  ;;  %863 = vst [vmem:[#allocation1 + $0x31] ss:$2 sm:$0xff] %v849_v44  ;;  %v3830_v14 = vld.sshfl [vmem:[#allocation1 + $0x8] sm:$0xff pattern:$0x75316420]  ;;  %v711_v58 = vmul.f32 %v5340_v1, %v681_v60  ;;  %v948_v61 = vmul.f32 %v939_v32, %v3648_v37 }
  0xd3   : > { %v867_v45 = vld.sshfl [vmem:[#allocation1 + $0x18] sm:$0xff pattern:$0x75316420]  ;;  %v866_v19 = vld.sshfl [vmem:[#allocation1 + $0x10] sm:$0xff pattern:$0x75316420] }
  0xd4   : > { %957 = vst [vmem:[#allocation1 + $0x10] ss:$2 sm:$0xff] %v946_v15  ;;  %v3837_v38 = vld.sshfl [vmem:[#allocation1] sm:$0xff pattern:$0x75316420] }
  0xd5   : > { %815 = vst [vmem:[#allocation4 + $0x50] sm:$0xf] %v799_v57 }
  0xd6   : > { %v868_v21 = vld.sshfl [vmem:[#allocation1 + $0x20] sm:$0xff pattern:$0x75316420]  ;;  %816 = vst [vmem:[#allocation4 + $0xa0] sm:$0xf] %v800_v53 }
  0xd7   : > { %v869_v44 = vld.sshfl [vmem:[#allocation1 + $0x28] sm:$0xff pattern:$0x75316420]  ;;  %733 = vst [vmem:[#allocation1 + $0x1] ss:$2 sm:$0xff] %v711_v58 }
  0xd8   : > { %640 = vrot.lane.b32.xlu2 %v3738_v62, %s3469_s23  ;;  %959 = vst [vmem:[#allocation1 + $0x20] ss:$2 sm:$0xff] %v947_v36  ;;  %v5341_v62 = vrot.slane %v3744_v63, 4 }
  0xd9   : > { %v870_v7 = vld.sshfl [vmem:[#allocation1 + $0x30] sm:$0xff pattern:$0x75316420]  ;;  %v871_v28 = vld.sshfl [vmem:[#allocation1 + $0x38] sm:$0xff pattern:$0x75316420] }
  0xda   : > { %648 = vrot.lane.b32.xlu0 %v3747_v16, %s3469_s23  ;;  %644 = vrot.lane.b32.xlu1 %v3751_v22, %s3469_s23  ;;  %961 = vst [vmem:[#allocation1 + $0x30] ss:$2 sm:$0xff] %v948_v61  ;;  %v834_v16 = vsel %vm753_vm4, %v5341_v62, %v3744_v63  ;;  %v821_v63 = vld [vmem:[#allocation2 + $0x24] sm:$0xf] }
  0xdb   : > { %v965_v49 = vld.sshfl [vmem:[#allocation1 + $0x18] sm:$0xff pattern:$0x75316420]  ;;  %v964_v50 = vld.sshfl [vmem:[#allocation1 + $0x10] sm:$0xff pattern:$0x75316420]  ;;  %v846_v22 = vmul.f32 %v834_v16, %v3643_v35 }
  0xdc   : > { %1027 = vst [vmem:[#allocation1 + $0x11] ss:$2 sm:$0xff] %v3656_v42 }
  0xde   : > { %v3847_v11 = vld.sshfl [vmem:[#allocation1] sm:$0xff pattern:$0x75316420] }
  0xdf   : > { %v967_v60 = vld.sshfl [vmem:[#allocation1 + $0x28] sm:$0xff pattern:$0x75316420]  ;;  %v966_v15 = vld.sshfl [vmem:[#allocation1 + $0x20] sm:$0xff pattern:$0x75316420] }
  0xe0   : > { %646 = vrot.lane.b32.xlu2 %v3753_v33, %s3469_s23  ;;  %1029 = vst [vmem:[#allocation1 + $0x21] ss:$2 sm:$0xff] %v3652_v39 }
  0xe1   : > { %786 = vst [vmem:[#allocation1] ss:$2 sm:$0xff] %v3643_v35  ;;  %v968_v57 = vld.sshfl [vmem:[#allocation1 + $0x30] sm:$0xff pattern:$0x75316420] }
  0xe2   : > { %743 = vrot.lane.b32.xlu1 %v3783_v54, %s3468_s22  ;;  %533 = vrot.lane.b32.xlu0 %v3731_v59, %s3471_s25  ;;  %v3862_v47 = vld.sshfl [vmem:[#allocation1 + $0x38] sm:$0xff pattern:$0x75316420]  ;;  %v5342_v59 = vrot.slane %v3772_v56, 4 }
  0xe3   : > { %1031 = vst [vmem:[#allocation1 + $0x31] ss:$2 sm:$0xff] %v3648_v37 }
  0xe4   : > { %v850_v54 = vmul.f32 %v5342_v59, %v821_v63 }
  0xe8   : > { %739 = vrot.lane.b32.xlu2 %v3763_v46, %s3468_s22  ;;  %v793_v33 = vld.sshfl [vmem:[#allocation1] sm:$0xff pattern:$0x75316420]  ;;  %v794_v26 = vld.sshfl [vmem:[#allocation1 + $0x8] sm:$0xff pattern:$0x75316420] }
  0xe9   : > { %857 = vst [vmem:[#allocation1 + $0x1] ss:$2 sm:$0xff] %v846_v22  ;;  %v1037_v22 = vld.sshfl [vmem:[#allocation1 + $0x28] sm:$0xff pattern:$0x75316420] }
  0xea   : > { %749 = vrot.lane.b32.xlu1 %v3791_v6, %s3468_s22  ;;  %741 = vrot.lane.b32.xlu0 %v3765_v48, %s3468_s22  ;;  %809 = vst [vmem:[#allocation4 + $0xe0] sm:$0xf] %v793_v33  ;;  %v5343_v48 = vrot.slane %v3774_v43, 4 }
  0xeb   : > { %810 = vst [vmem:[#allocation4 + $0x8] sm:$0xf] %v794_v26 }
  0xec   : > { %v933_v56 = vsel %vm652_vm5, %v5343_v48, %v3774_v43  ;;  %v1039_v48 = vld.sshfl [vmem:[#allocation1 + $0x38] sm:$0xff pattern:$0x75316420] }
  0xed   : > { %v945_v6 = vmul.f32 %v933_v56, %v3643_v35 }
  0xf0   : > { %745 = vrot.lane.b32.xlu2 %v3785_v55, %s3468_s22  ;;  %v3875_v53 = vld.sshfl [vmem:[#allocation1] sm:$0xff pattern:$0x75316420]  ;;  %v3877_v46 = vld.sshfl [vmem:[#allocation1 + $0x8] sm:$0xff pattern:$0x75316420] }
  0xf1   : > { %872 = vst [vmem:[#allocation1 + $0x1] ss:$2 sm:$0xff] %v850_v54  ;;  %v1038_v54 = vld.sshfl [vmem:[#allocation1 + $0x30] sm:$0xff pattern:$0x75316420] }
  0xf2   : > { %747 = vrot.lane.b32.xlu0 %v3793_v40, %s3468_s22  ;;  %650 = vrot.lane.b32.xlu1 %v3810_v10, %s3469_s23  ;;  %v920_v10 = vld [vmem:[#allocation2 + $0x24] sm:$0xf] }
  0xf3   : > { %v949_v1 = vmul.f32 %v932_v52, %v920_v10 }
  0xf8   : > { %634 = vrot.lane.b32.xlu2 %v3759_v0, %s3469_s23  ;;  %v3890_v55 = vld.sshfl [vmem:[#allocation1] sm:$0xff pattern:$0x75316420] }
  0xf9   : > { %955 = vst [vmem:[#allocation1] ss:$2 sm:$0xff] %v945_v6 }
  0xfa   : > { %636 = vrot.lane.b32.xlu0 %v3761_v41, %s3469_s23  ;;  %880 = vrot.lane.b32.xlu1 %v867_v45, %s3467_s21  ;;  %v447_v40 = vpop.permute.xlu2 %446  ;;  %v1018_v45 = vld [vmem:[#allocation2 + $0x24] sm:$0xf] }
 0x100   : > { %882 = vrot.lane.b32.xlu2 %v868_v21, %s3467_s21  ;;  %v3900_v43 = vld.sshfl [vmem:[#allocation1 + $0x8] sm:$0xff pattern:$0x75316420]  ;;  %v3902_v58 = vld.sshfl [vmem:[#allocation1] sm:$0xff pattern:$0x75316420] }
 0x101   : > { %970 = vst [vmem:[#allocation1] ss:$2 sm:$0xff] %v949_v1 }
 0x102   : > { %878 = vrot.lane.b32.xlu0 %v866_v19, %s3467_s21  ;;  %886 = vrot.lane.b32.xlu1 %v870_v7, %s3467_s21  ;;  %v449_v0 = vpop.permute.xlu2 %448 }
 0x103   : > { %v465_v41 = vsel %vm464_vm6, %v447_v40, %v449_v0 }
 0x104   : > { %481 = vst [vmem:[#allocation4 + $0xb0] sm:$0xf] %v465_v41 }
 0x108   : > { %888 = vrot.lane.b32.xlu2 %v871_v28, %s3467_s21  ;;  %v3909_v51 = vld.sshfl [vmem:[#allocation1] sm:$0xff pattern:$0x75316420]  ;;  %v1034_v28 = vld.sshfl [vmem:[#allocation1 + $0x10] sm:$0xff pattern:$0x75316420] }
 0x109   : > { %1025 = vst [vmem:[#allocation1 + $0x1] ss:$2 sm:$0xff] %v3643_v35 }
 0x10a   : > { %884 = vrot.lane.b32.xlu0 %v869_v44, %s3467_s21  ;;  %737 = vrot.lane.b32.xlu1 %v3830_v14, %s3468_s22  ;;  %v455_v52 = vpop.permute.xlu2 %454 }
 0x110   : > { %978 = vrot.lane.b32.xlu2 %v965_v49, %s3466_s20  ;;  %v3916_v36 = vld.sshfl [vmem:[#allocation1 + $0x8] sm:$0xff pattern:$0x75316420]  ;;  %v3918_v32 = vld.sshfl [vmem:[#allocation1] sm:$0xff pattern:$0x75316420] }
 0x111   : > { %1040 = vst [vmem:[#allocation1 + $0x1] ss:$2 sm:$0xff] %v1018_v45 }
 0x112   : > { %976 = vrot.lane.b32.xlu1 %v964_v50, %s3466_s20  ;;  %735 = vrot.lane.b32.xlu0 %v3837_v38, %s3468_s22  ;;  %v461_v19 = vpop.permute.xlu2 %460 }
 0x118   : > { %984 = vrot.lane.b32.xlu2 %v968_v57, %s3466_s20  ;;  %v1036_v57 = vld.sshfl [vmem:[#allocation1 + $0x20] sm:$0xff pattern:$0x75316420] }
 0x11a   : > { %982 = vrot.lane.b32.xlu1 %v967_v60, %s3466_s20  ;;  %980 = vrot.lane.b32.xlu0 %v966_v15, %s3466_s20  ;;  %v526_v14 = vpop.permute.xlu2 %525 }
 0x11c   : > { %v453_v21 = vpop.permute.xlu1 %452  ;;  %v451_v61 = vpop.permute.xlu0 %450 }
 0x11d   : > { %v468_v44 = vsel %vm464_vm6, %v453_v21, %v455_v52  ;;  %v466_v7 = vsel %vm464_vm6, %v449_v0, %v451_v61  ;;  %v467_v38 = vsel %vm464_vm6, %v451_v61, %v453_v21 }
 0x11e   : > { %484 = vst [vmem:[#allocation4 + $0xa8] sm:$0xf] %v468_v44 }
 0x11f   : > { %482 = vst [vmem:[#allocation4 + $0x130] sm:$0xf] %v466_v7 }
 0x120   : > { %483 = vst [vmem:[#allocation4 + $0x40] sm:$0xf] %v467_v38  ;;  %751 = vrot.lane.b32.xlu2 %v3847_v11, %s3468_s22  ;;  %v1035_v11 = vld.sshfl [vmem:[#allocation1 + $0x18] sm:$0xff pattern:$0x75316420] }
 0x122   : > { %1046 = vrot.lane.b32.xlu1 %v1034_v28, %s3472_s26  ;;  %986 = vrot.lane.b32.xlu0 %v3862_v47, %s3466_s20  ;;  %v3931_v49 = vpop.permute.xlu2 %531 }
 0x124   : > { %v459_v50 = vpop.permute.xlu1 %458  ;;  %v457_v60 = vpop.permute.xlu0 %456 }
 0x125   : > { %v471_v15 = vsel %vm464_vm6, %v459_v50, %v461_v19  ;;  %v469_v62 = vsel %vm464_vm6, %v455_v52, %v457_v60  ;;  %v470_v16 = vsel %vm464_vm6, %v457_v60, %v459_v50 }
 0x126   : > { %487 = vst [vmem:[#allocation4 + $0x100] sm:$0xf] %v471_v15 }
 0x127   : > { %485 = vst [vmem:[#allocation4 + $0x78] sm:$0xf] %v469_v62 }
 0x128   : > { %486 = vst [vmem:[#allocation4 + $0x128] sm:$0xf] %v470_v16  ;;  %1048 = vrot.lane.b32.xlu2 %v1035_v11, %s3472_s26 }
 0x12a   : > { %1052 = vrot.lane.b32.xlu1 %v1037_v22, %s3472_s26  ;;  %1050 = vrot.lane.b32.xlu0 %v1036_v57, %s3472_s26  ;;  %v520_v47 = vpop.permute.xlu2 %519 }
 0x12c   : > { %v524_v33 = vpop.permute.xlu1 %523  ;;  %v463_v26 = vpop.permute.xlu0 %462 }
 0x12d   : > { %v539_v63 = vsel %vm535_vm7, %v524_v33, %v526_v14  ;;  %v472_v59 = vsel %vm464_vm6, %v461_v19, %v463_v26 }
 0x12e   : > { %555 = vst [vmem:[#allocation4 + $0xa8] sm:$0xf0] %v539_v63 }
 0x12f   : > { %488 = vst [vmem:[#allocation4 + $0x38] sm:$0xf] %v472_v59 }
 0x130   : > { %1054 = vrot.lane.b32.xlu2 %v1038_v54, %s3472_s26 }
 0x132   : > { %1056 = vrot.lane.b32.xlu0 %v1039_v48, %s3472_s26  ;;  %874 = vrot.lane.b32.xlu1 %v3875_v53, %s3467_s21  ;;  %v641_v56 = vpop.permute.xlu2 %640 }
 0x134   : > { %v530_v6 = vpop.permute.xlu1 %529  ;;  %v522_v40 = vpop.permute.xlu0 %521 }
 0x135   : > { %v542_v10 = vsel %vm535_vm7, %v530_v6, %v3931_v49  ;;  %v537_v1 = vsel %vm535_vm7, %v520_v47, %v522_v40  ;;  %v538_v0 = vsel %vm535_vm7, %v522_v40, %v524_v33 }
 0x136   : > { %558 = vst [vmem:[#allocation4 + $0x100] sm:$0xf0] %v542_v10 }
 0x137   : > { %553 = vst [vmem:[#allocation4 + $0x130] sm:$0xf0] %v537_v1 }
 0x138   : > { %554 = vst [vmem:[#allocation4 + $0x40] sm:$0xf0] %v538_v0  ;;  %1090 = vrot.lane.b32.xlu2 %v3605_v29, %s3470_s24 }
 0x13a   : > { %1092 = vrot.lane.b32.xlu0 %v3591_v24, %s3470_s24  ;;  %1094 = vrot.lane.b32.xlu1 %v3611_v31, %s3470_s24  ;;  %v647_v53 = vpop.permute.xlu2 %646 }
 0x13c   : > { %v528_v41 = vpop.permute.xlu0 %527  ;;  %v518_v52 = vpop.permute.xlu1 %517 }
 0x13d   : > { %v540_v45 = vsel %vm535_vm7, %v526_v14, %v528_v41  ;;  %v541_v19 = vsel %vm535_vm7, %v528_v41, %v530_v6  ;;  %v536_v21 = vsel %vm535_vm7, %v518_v52, %v520_v47 }
 0x13e   : > { %556 = vst [vmem:[#allocation4 + $0x78] sm:$0xf0] %v540_v45 }
 0x13f   : > { %557 = vst [vmem:[#allocation4 + $0x128] sm:$0xf0] %v541_v19 }
 0x140   : > { %552 = vst [vmem:[#allocation4 + $0xb0] sm:$0xf0] %v536_v21  ;;  %876 = vrot.lane.b32.xlu2 %v3877_v46, %s3467_s21 }
 0x142   : > { %890 = vrot.lane.b32.xlu0 %v3890_v55, %s3467_s21  ;;  %v3962_v24 = vpop.permute.xlu2 %739 }
 0x144   : > { %v643_v29 = vpop.permute.xlu0 %642  ;;  %v639_v31 = vpop.permute.xlu1 %638 }
 0x145   : > { %v656_v61 = vsel %vm652_vm5, %v641_v56, %v643_v29  ;;  %v655_v14 = vsel %vm652_vm5, %v639_v31, %v641_v56 }
 0x146   : > { %672 = vst [vmem:[#allocation4 + $0x48] sm:$0xf] %v656_v61 }
 0x147   : > { %671 = vst [vmem:[#allocation4 + $0x118] sm:$0xf] %v655_v14 }
 0x148   : > { %1096 = vrot.lane.b32.xlu2 %v3623_v34, %s3470_s24 }
 0x14a   : > { %974 = vrot.lane.b32.xlu0 %v3900_v43, %s3466_s20  ;;  %v746_v46 = vpop.permute.xlu2 %745 }
 0x14c   : > { %v649_v44 = vpop.permute.xlu0 %648  ;;  %v645_v7 = vpop.permute.xlu1 %644 }
 0x14d   : > { %v659_v55 = vsel %vm652_vm5, %v647_v53, %v649_v44  ;;  %v657_v38 = vsel %vm652_vm5, %v643_v29, %v645_v7  ;;  %v658_v28 = vsel %vm652_vm5, %v645_v7, %v647_v53 }
 0x14e   : > { %675 = vst [vmem:[#allocation4 + $0xf0] sm:$0xf] %v659_v55 }
 0x14f   : > { %673 = vst [vmem:[#allocation4 + $0x10] sm:$0xf] %v657_v38 }
 0x150   : > { %674 = vst [vmem:[#allocation4 + $0xc8] sm:$0xf] %v658_v28  ;;  %972 = vrot.lane.b32.xlu2 %v3902_v58, %s3466_s20 }
 0x152   : > { %v635_v50 = vpop.permute.xlu2 %634 }
 0x154   : > { %v744_v34 = vpop.permute.xlu1 %743  ;;  %v534_v60 = vpop.permute.xlu0 %533 }
 0x155   : > { %v758_v43 = vsel %vm753_vm4, %v744_v34, %v746_v46  ;;  %v543_v15 = vsel %vm535_vm7, %v3931_v49, %v534_v60 }
 0x156   : > { %774 = vst [vmem:[#allocation4 + $0x10] sm:$0xf0] %v758_v43 }
 0x157   : > { %559 = vst [vmem:[#allocation4 + $0x38] sm:$0xf0] %v543_v15 }
 0x15a   : > { %v883_v62 = vpop.permute.xlu2 %882 }
 0x15c   : > { %v750_v16 = vpop.permute.xlu1 %749  ;;  %v742_v11 = vpop.permute.xlu0 %741 }
 0x15d   : > { %v756_v22 = vsel %vm753_vm4, %v3962_v24, %v742_v11  ;;  %v757_v57 = vsel %vm753_vm4, %v742_v11, %v744_v34 }
 0x15e   : > { %772 = vst [vmem:[#allocation4 + $0x118] sm:$0xf0] %v756_v22 }
 0x15f   : > { %773 = vst [vmem:[#allocation4 + $0x48] sm:$0xf0] %v757_v57 }
 0x162   : > { %v3981_v58 = vpop.permute.xlu2 %888 }
 0x164   : > { %v748_v47 = vpop.permute.xlu0 %747  ;;  %v651_v33 = vpop.permute.xlu1 %650 }
 0x165   : > { %v759_v26 = vsel %vm753_vm4, %v746_v46, %v748_v47  ;;  %v760_v49 = vsel %vm753_vm4, %v748_v47, %v750_v16  ;;  %v660_v63 = vsel %vm652_vm5, %v649_v44, %v651_v33  ;;  %v4015_v33 = vld.sshfl [vmem:[#allocation1] sm:$0xff pattern:$0x75316420] }
 0x166   : > { %775 = vst [vmem:[#allocation4 + $0xc8] sm:$0xf0] %v759_v26 }
 0x167   : > { %776 = vst [vmem:[#allocation4 + $0xf0] sm:$0xf0] %v760_v49 }
 0x168   : > { %676 = vst [vmem:[#allocation4 + $0x138] sm:$0xf] %v660_v63 }
 0x16a   : > { %v979_v59 = vpop.permute.xlu2 %978 }
 0x16c   : > { %v637_v54 = vpop.permute.xlu0 %636  ;;  %v881_v48 = vpop.permute.xlu1 %880 }
 0x16d   : > { %v653_v56 = vsel %vm652_vm5, %v635_v50, %v637_v54  ;;  %v654_v6 = vsel %vm652_vm5, %v637_v54, %v639_v31  ;;  %v895_v40 = vsel %vm694_vm3, %v881_v48, %v883_v62 }
 0x16e   : > { %669 = vst [vmem:[#allocation4 + $0xf8] sm:$0xf] %v653_v56 }
 0x16f   : > { %670 = vst [vmem:[#allocation4 + $0x90] sm:$0xf] %v654_v6 }
 0x170   : > { %911 = vst [vmem:[#allocation4 + $0xc0] sm:$0xf0] %v895_v40 }
 0x172   : > { %v985_v10 = vpop.permute.xlu2 %984 }
 0x174   : > { %v879_v1 = vpop.permute.xlu0 %878  ;;  %v887_v0 = vpop.permute.xlu1 %886 }
 0x175   : > { %v894_v53 = vsel %vm694_vm3, %v879_v1, %v881_v48  ;;  %v898_v41 = vsel %vm694_vm3, %v887_v0, %v3981_v58 }
 0x176   : > { %910 = vst [vmem:[#allocation4 + $0x60] sm:$0xf0] %v894_v53 }
 0x177   : > { %914 = vst [vmem:[#allocation4 + $0x50] sm:$0xf0] %v898_v41 }
 0x17a   : > { %v752_v52 = vpop.permute.xlu2 %751 }
 0x17b   : > { %v761_v45 = vsel %vm753_vm4, %v750_v16, %v752_v52 }
 0x17c   : > { %777 = vst [vmem:[#allocation4 + $0x138] sm:$0xf0] %v761_v45  ;;  %v885_v19 = vpop.permute.xlu0 %884  ;;  %v738_v21 = vpop.permute.xlu1 %737 }
 0x17d   : > { %v896_v29 = vsel %vm694_vm3, %v883_v62, %v885_v19  ;;  %v897_v31 = vsel %vm694_vm3, %v885_v19, %v887_v0  ;;  %v755_v61 = vsel %vm753_vm4, %v738_v21, %v3962_v24 }
 0x17e   : > { %912 = vst [vmem:[#allocation4 + $0x110] sm:$0xf0] %v896_v29 }
 0x17f   : > { %913 = vst [vmem:[#allocation4 + $0x20] sm:$0xf0] %v897_v31 }
 0x180   : > { %771 = vst [vmem:[#allocation4 + $0x90] sm:$0xf0] %v755_v61 }
 0x182   : > { %v1049_v14 = vpop.permute.xlu2 %1048 }
 0x184   : > { %v3997_v46 = vpop.permute.xlu1 %976  ;;  %v736_v44 = vpop.permute.xlu0 %735 }
 0x185   : > { %v992_v7 = vsel %vm594_vm2, %v3997_v46, %v979_v59  ;;  %v754_v55 = vsel %vm753_vm4, %v736_v44, %v738_v21 }
 0x186   : > { %1008 = vst [vmem:[#allocation4 + $0xe8] sm:$0xf] %v992_v7 }
 0x187   : > { %770 = vst [vmem:[#allocation4 + $0xf8] sm:$0xf0] %v754_v55 }
 0x18a   : > { %v1055_v38 = vpop.permute.xlu2 %1054 }
 0x18c   : > { %v983_v28 = vpop.permute.xlu1 %982  ;;  %v981_v50 = vpop.permute.xlu0 %980 }
 0x18d   : > { %v995_v34 = vsel %vm594_vm2, %v983_v28, %v985_v10  ;;  %v993_v24 = vsel %vm594_vm2, %v979_v59, %v981_v50  ;;  %v994_v60 = vsel %vm594_vm2, %v981_v50, %v983_v28 }
 0x18e   : > { %1011 = vst [vmem:[#allocation4 + $0xb8] sm:$0xf] %v995_v34 }
 0x18f   : > { %1009 = vst [vmem:[#allocation4 + $0x108] sm:$0xf] %v993_v24 }
 0x190   : > { %1010 = vst [vmem:[#allocation4] sm:$0xf] %v994_v60 }
 0x192   : > { %v1091_v43 = vpop.permute.xlu2 %1090 }
 0x193   : > { %v1098_v15 = vrot.slane %v1091_v43, 4 }
 0x194   : > { %v4005_v62 = vpop.permute.xlu1 %1046  ;;  %v4007_v16 = vpop.permute.xlu0 %986 }
 0x195   : > { %v1102_v11 = vsel %vm464_vm6, %v1098_v15, %v1091_v43  ;;  %v1063_v22 = vsel %vm1060_vm8, %v4005_v62, %v1049_v14  ;;  %v996_v57 = vsel %vm594_vm2, %v985_v10, %v4007_v16 }
 0x196   : > { %v1114_v47 = vmul.f32 %v1102_v11, %v3643_v35  ;;  %1079 = vst [vmem:[#allocation4 + $0xe8] sm:$0xf0] %v1063_v22  ;;  %v1089_v35 = vld [vmem:[#allocation2 + $0x24] sm:$0xf] }
 0x197   : > { %1012 = vst [vmem:[#allocation4 + $0x58] sm:$0xf] %v996_v57 }
 0x198   : > { %1124 = vst [vmem:[#allocation1] ss:$2 sm:$0xff] %v1114_v47 }
 0x19a   : > { %v877_v26 = vpop.permute.xlu2 %876 }
 0x19b   : > { %v893_v49 = vsel %vm694_vm3, %v877_v26, %v879_v1 }
 0x19c   : > { %909 = vst [vmem:[#allocation4 + $0x8] sm:$0xf0] %v893_v49  ;;  %v1053_v63 = vpop.permute.xlu1 %1052  ;;  %v1051_v59 = vpop.permute.xlu0 %1050 }
 0x19d   : > { %v1066_v54 = vsel %vm1060_vm8, %v1053_v63, %v1055_v38  ;;  %v1064_v48 = vsel %vm1060_vm8, %v1049_v14, %v1051_v59  ;;  %v1065_v56 = vsel %vm1060_vm8, %v1051_v59, %v1053_v63 }
 0x19e   : > { %1082 = vst [vmem:[#allocation4 + $0xb8] sm:$0xf0] %v1066_v54 }
 0x19f   : > { %1080 = vst [vmem:[#allocation4 + $0x108] sm:$0xf0] %v1064_v48  ;;  %v1131_v52 = vld.sshfl [vmem:[#allocation1] sm:$0xff pattern:$0x75316420] }
 0x1a0   : > { %1081 = vst [vmem:[#allocation4] sm:$0xf0] %v1065_v56  ;;  %v1132_v45 = vld.sshfl [vmem:[#allocation1 + $0x8] sm:$0xff pattern:$0x75316420] }
 0x1a2   : > { %v1097_v6 = vpop.permute.xlu2 %1096 }
 0x1a3   : > { %v1101_v40 = vrot.slane %v1097_v6, 4 }
 0x1a4   : > { %v4021_v10 = vpop.permute.xlu0 %1056  ;;  %v875_v0 = vpop.permute.xlu1 %874 }
 0x1a5   : > { %v1118_v53 = vmul.f32 %v1101_v40, %v1089_v35  ;;  %v1067_v1 = vsel %vm1060_vm8, %v1055_v38, %v4021_v10  ;;  %v892_v41 = vsel %vm694_vm3, %v875_v0, %v877_v26 }
 0x1a6   : > { %1083 = vst [vmem:[#allocation4 + $0x58] sm:$0xf0] %v1067_v1 }
 0x1a7   : > { %908 = vst [vmem:[#allocation4 + $0xe0] sm:$0xf0] %v892_v41 }
 0x1a8   : > { %1139 = vst [vmem:[#allocation1] ss:$2 sm:$0xff] %v1118_v53 }
 0x1ac   : > { %v1093_v19 = vpop.permute.xlu0 %1092  ;;  %v1095_v21 = vpop.permute.xlu1 %1094 }
 0x1ad   : > { %v1099_v29 = vrot.slane %v1093_v19, 4  ;;  %v1100_v31 = vrot.slane %v1095_v21, 4 }
 0x1af   : > { %v1103_v61 = vsel %vm389_vm0, %v1098_v15, %v1099_v29  ;;  %v1105_v14 = vsel %vm389_vm0, %v1099_v29, %v1100_v31  ;;  %v1107_v44 = vsel %vm389_vm0, %v1100_v31, %v1101_v40 }
 0x1b0   : > { %v1104_v7 = vsel %vm464_vm6, %v1103_v61, %v1093_v19  ;;  %v1106_v55 = vsel %vm464_vm6, %v1105_v14, %v1095_v21  ;;  %v1108_v38 = vsel %vm464_vm6, %v1107_v44, %v1097_v6  ;;  %v1202_v19 = vld [vmem:[#allocation4 + $0x60] sm:$0xff]  ;;  %v1195_v61 = vld [vmem:[#allocation4 + $0x48] sm:$0xff] }
 0x1b1   : > { %v1115_v28 = vmul.f32 %v1104_v7, %v3656_v42  ;;  %v1116_v50 = vmul.f32 %v1106_v55, %v3652_v39  ;;  %v1117_v34 = vmul.f32 %v1108_v38, %v3648_v37  ;;  %v973_v42 = vpop.permute.xlu2 %972  ;;  %v1203_v21 = vld [vmem:[#allocation4 + $0xc0] sm:$0xff] }
 0x1b2   : > { %v1186_v7 = vld [vmem:[#allocation4 + $0x40] sm:$0xff] }
 0x1b3   : > { %1126 = vst [vmem:[#allocation1 + $0x10] ss:$2 sm:$0xff] %v1115_v28  ;;  %v1187_v28 = vld [vmem:[#allocation4 + $0xa8] sm:$0xff] }
 0x1b4   : > { %1128 = vst [vmem:[#allocation1 + $0x20] ss:$2 sm:$0xff] %v1116_v50  ;;  %v891_v24 = vpop.permute.xlu0 %890 }
 0x1b5   : > { %1130 = vst [vmem:[#allocation1 + $0x30] ss:$2 sm:$0xff] %v1117_v34  ;;  %v899_v60 = vsel %vm694_vm3, %v3981_v58, %v891_v24  ;;  %v3473_v58 = vmov 0  }
 0x1b6   : > { %915 = vst [vmem:[#allocation4 + $0xa0] sm:$0xf0] %v899_v60  ;;  %3443 = vset.pattern.permute.xlu0 %v3473_v58 }
 0x1ba   : > { %v1134_v43 = vld.sshfl [vmem:[#allocation1 + $0x18] sm:$0xff pattern:$0x75316420]  ;;  %v1133_v15 = vld.sshfl [vmem:[#allocation1 + $0x10] sm:$0xff pattern:$0x75316420] }
 0x1bb   : > { %v1135_v11 = vld.sshfl [vmem:[#allocation1 + $0x20] sm:$0xff pattern:$0x75316420]  ;;  %1147 = vrot.lane.b32.xlu0 %v1134_v43, %s3465_s17  ;;  %1145 = vrot.lane.b32.xlu2 %v1133_v15, %s3465_s17  ;;  %v1136_v47 = vld.sshfl [vmem:[#allocation1 + $0x28] sm:$0xff pattern:$0x75316420] }
 0x1bc   : > { %1149 = vrot.lane.b32.xlu1 %v1135_v11, %s3465_s17  ;;  %v975_v39 = vpop.permute.xlu0 %974  ;;  %v1137_v57 = vld.sshfl [vmem:[#allocation1 + $0x30] sm:$0xff pattern:$0x75316420]  ;;  %v1138_v26 = vld.sshfl [vmem:[#allocation1 + $0x38] sm:$0xff pattern:$0x75316420] }
 0x1bd   : > { %v990_v37 = vsel %vm594_vm2, %v973_v42, %v975_v39  ;;  %v991_v22 = vsel %vm594_vm2, %v975_v39, %v3997_v46  ;;  %v1214_v15 = vld [vmem:[#allocation4 + $0x58] sm:$0xff]  ;;  %v1206_v11 = vld [vmem:[#allocation4 + $0x50] sm:$0xff] }
 0x1be   : > { %1006 = vst [vmem:[#allocation4 + $0x18] sm:$0xf] %v990_v37  ;;  %v1198_v42 = vld [vmem:[#allocation4 + $0xf0] sm:$0xff] }
 0x1bf   : > { %1007 = vst [vmem:[#allocation4 + $0x68] sm:$0xf] %v991_v22 }
 0x1c3   : > { %1044 = vrot.lane.b32.xlu0 %v3916_v36, %s3472_s26  ;;  %1042 = vrot.lane.b32.xlu2 %v3918_v32, %s3472_s26  ;;  %v1140_v36 = vld.sshfl [vmem:[#allocation1] sm:$0xff pattern:$0x75316420] }
 0x1c4   : > { %988 = vrot.lane.b32.xlu1 %v3909_v51, %s3466_s20  ;;  %v1224_v51 = vld [vmem:[%s5325_s4] sm:$0xff] }
 0x1cb   : > { %1153 = vrot.lane.b32.xlu0 %v1137_v57, %s3465_s17  ;;  %1151 = vrot.lane.b32.xlu2 %v1136_v47, %s3465_s17  ;;  %v1190_v57 = vld [vmem:[#allocation4 + $0x100] sm:$0xff] }
 0x1cc   : > { %1155 = vrot.lane.b32.xlu1 %v1138_v26, %s3465_s17  ;;  %v1207_v47 = vld [vmem:[#allocation4 + $0xa0] sm:$0xff]  ;;  %v1199_v26 = vld [vmem:[#allocation4 + $0x138] sm:$0xff] }
 0x1d3   : > { %1454 = vrot.lane.b32.xlu2 %v3553_v5, %s3465_s17  ;;  %1141 = vrot.lane.b32.xlu0 %v1131_v52, %s3465_s17  ;;  %v1210_v52 = vld [vmem:[#allocation4 + $0xe8] sm:$0xff] }
 0x1d4   : > { %1058 = vrot.lane.b32.xlu1 %v4015_v33, %s3472_s26 }
 0x1db   : > { %1157 = vrot.lane.b32.xlu2 %v1140_v36, %s3465_s17  ;;  %1227 = vperm.xlu0 %3443, %v1224_v51   ;;  %v4114_v51 = vld [vmem:[#allocation3] sm:$0xff]  ;;  %v1191_v36 = vld [vmem:[#allocation4 + $0x38] sm:$0xff] }
 0x1dc   : > { %1143 = vrot.lane.b32.xlu1 %v1132_v45, %s3465_s17  ;;  %v1211_v45 = vld [vmem:[#allocation4 + $0x108] sm:$0xff] }
 0x1e3   : > { %1460 = vrot.lane.b32.xlu0 %v3547_v2, %s3465_s17  ;;  %1458 = vrot.lane.b32.xlu2 %v3559_v9, %s3465_s17 }
 0x1e4   : > { %1452 = vrot.lane.b32.xlu1 %v3551_v4, %s3465_s17 }
 0x1eb   : > { %1466 = vrot.lane.b32.xlu0 %v3557_v8, %s3465_s17  ;;  %1464 = vrot.lane.b32.xlu2 %v3567_v12, %s3465_s17 }
 0x1ec   : > { %1456 = vrot.lane.b32.xlu1 %v3569_v13, %s3465_s17 }
 0x1f4   : > { %1462 = vrot.lane.b32.xlu1 %v3549_v3, %s3465_s17 }
 0x215   : > { %v4076_v32 = vpop.permute.xlu2 %1145 }
 0x21d   : > { %v1043_v46 = vpop.permute.xlu2 %1042 }
 0x225   : > { %v1152_v33 = vpop.permute.xlu2 %1151 }
 0x22d   : > { %v1148_v49 = vpop.permute.xlu0 %1147  ;;  %v4082_v56 = vpop.permute.xlu2 %1454 }
 0x22e   : > { %v1150_v63 = vpop.permute.xlu1 %1149  ;;  %v1161_v59 = vsel %vm406_vm1, %v4076_v32, %v1148_v49 }
 0x22f   : > { %v1163_v54 = vsel %vm406_vm1, %v1150_v63, %v1152_v33  ;;  %v1162_v48 = vsel %vm406_vm1, %v1148_v49, %v1150_v63  ;;  %1177 = vst [vmem:[#allocation4 + $0x28] sm:$0xf] %v1161_v59 }
 0x230   : > { %1179 = vst [vmem:[#allocation4 + $0x98] sm:$0xf] %v1163_v54 }
 0x231   : > { %1178 = vst [vmem:[#allocation4 + $0x30] sm:$0xf] %v1162_v48 }
 0x235   : > { %v1045_v35 = vpop.permute.xlu0 %1044  ;;  %v1158_v31 = vpop.permute.xlu2 %1157 }
 0x236   : > { %v989_v6 = vpop.permute.xlu1 %988  ;;  %v1061_v40 = vsel %vm1060_vm8, %v1043_v46, %v1045_v35  ;;  %v1062_v0 = vsel %vm1060_vm8, %v1045_v35, %v4005_v62  ;;  %v1218_v53 = vld [vmem:[#allocation4 + $0x28] sm:$0xf]  ;;  %v1194_v62 = vld [vmem:[#allocation4 + $0x118] sm:$0xff] }
 0x237   : > { %v997_v1 = vsel %vm594_vm2, %v4007_v16, %v989_v6  ;;  %1077 = vst [vmem:[#allocation4 + $0x18] sm:$0xf0] %v1061_v40  ;;  %3387 = vmatpush.msk.msra.mxu2 %vm389_vm0, %v1218_v53  ;;  %v4094_v16 = vld [vmem:[%s5323_s2] sm:$0xff]  ;;  %v1444_v46 = vld [vmem:[#allocation3 + $0x68] sm:$0xf] }
 0x238   : > { %1013 = vst [vmem:[#allocation4 + $0xd0] sm:$0xf] %v997_v1  ;;  %v1219_v41 = vld [vmem:[#allocation4 + $0x30] sm:$0xf]  ;;  %v1201_v53 = vld [vmem:[#allocation4 + $0x8] sm:$0xff] }
 0x239   : > { %1078 = vst [vmem:[#allocation4 + $0x68] sm:$0xf0] %v1062_v0  ;;  %3389 = vmatpush.msk.msra.mxu3 %vm389_vm0, %v1219_v41  ;;  %1310 = vmatpush.msra.mxu2 %v1210_v52  ;;  %v1200_v0 = vld [vmem:[#allocation4 + $0xe0] sm:$0xff]  ;;  %v1443_v1 = vld [vmem:[#allocation3 + $0x70] sm:$0xf]  ;;  %v1192_v41 = vld [vmem:[#allocation4 + $0xf8] sm:$0xff] }
 0x23a   : > { %v1445_v52 = vld [vmem:[#allocation3 + $0x10] sm:$0xf] }
 0x23b   : > { %1330 = vmatpush.msra.mxu3 %v1211_v45  ;;  %1311 = vmatpush.msra.mxu2 %v1202_v19  ;;  %v1447_v19 = vld [vmem:[#allocation3 + $0x28] sm:$0xf] }
 0x23d   : > { %1331 = vmatpush.msra.mxu3 %v1203_v21  ;;  %1312 = vmatpush.msra.mxu2 %v1194_v62  ;;  %v1154_v29 = vpop.permute.xlu0 %1153  ;;  %v1459_v6 = vpop.permute.xlu2 %1458  ;;  %v1193_v21 = vld [vmem:[#allocation4 + $0x90] sm:$0xff] }
 0x23e   : > { %v1156_v14 = vpop.permute.xlu1 %1155  ;;  %v1164_v44 = vsel %vm406_vm1, %v1152_v33, %v1154_v29  ;;  %v1208_v48 = vld [vmem:[#allocation4 + $0x18] sm:$0xff] }
 0x23f   : > { %1332 = vmatpush.msra.mxu3 %v1195_v61  ;;  %v1166_v55 = vsel %vm406_vm1, %v1156_v14, %v1158_v31  ;;  %v1165_v38 = vsel %vm406_vm1, %v1154_v29, %v1156_v14  ;;  %1180 = vst [vmem:[#allocation4 + $0x70] sm:$0xf] %v1164_v44  ;;  %1313 = vmatpush.msra.mxu2 %v1186_v7  ;;  %v1184_v31 = vld [vmem:[#allocation4 + $0xb0] sm:$0xff] }
 0x240   : > { %1182 = vst [vmem:[#allocation4 + $0x120] sm:$0xf] %v1166_v55  ;;  %3388 = vmatmul.msk.f32.vlgmr.msra.gmra.mxu2 %vm1230_vm9, %v4094_v16  ;;  %v1209_v40 = vld [vmem:[#allocation4 + $0x68] sm:$0xff]  ;;  %v1185_v14 = vld [vmem:[#allocation4 + $0x130] sm:$0xff] }
 0x241   : > { %1181 = vst [vmem:[#allocation4 + $0x80] sm:$0xf] %v1165_v38  ;;  %1333 = vmatpush.msra.mxu3 %v1187_v28  ;;  %v1446_v28 = vld [vmem:[#allocation3 + $0x20] sm:$0xf] }
 0x242   : > { %3390 = vmatmul.msk.f32.vlgmr.msra.gmra.mxu3 %vm1230_vm9, %v4094_v16 }
 0x245   : > { %v1142_v24 = vpop.permute.xlu0 %1141 }
 0x246   : > { %v1059_v50 = vpop.permute.xlu1 %1058  ;;  %v1221_v55 = vld [vmem:[#allocation4 + $0x70] sm:$0xf] }
 0x247   : > { %v1068_v34 = vsel %vm1060_vm8, %v4021_v10, %v1059_v50  ;;  %v1223_v60 = vld [vmem:[#allocation4 + $0x120] sm:$0xf] }
 0x248   : > { %1084 = vst [vmem:[#allocation4 + $0xd0] sm:$0xf0] %v1068_v34  ;;  %v1222_v43 = vld [vmem:[#allocation4 + $0x80] sm:$0xf]  ;;  %3397 = vmatpush.msk.msrb.mxu3 %vm389_vm0, %v1223_v60  ;;  %v1465_v34 = vpop.permute.xlu2 %1464  ;;  %v1213_v60 = vld [vmem:[#allocation4 + $0xb8] sm:$0xff] }
 0x249   : > { %3395 = vmatpush.msk.msrb.mxu2 %vm389_vm0, %v1222_v43  ;;  %v1448_v43 = vld [vmem:[#allocation3 + $0x50] sm:$0xf] }
 0x24b   : > { %1390 = vmatpush.msrb.mxu2 %v1214_v15  ;;  %v1205_v15 = vld [vmem:[#allocation4 + $0x20] sm:$0xff] }
 0x24d   : > { %1391 = vmatpush.msrb.mxu2 %v1206_v11  ;;  %v4110_v58 = vpop.permute.xlu0 %1227  ;;  %v1204_v11 = vld [vmem:[#allocation4 + $0x110] sm:$0xff] }
 0x24e   : > { %v1144_v39 = vpop.permute.xlu1 %1143 }
 0x24f   : > { %1392 = vmatpush.msrb.mxu2 %v1198_v42  ;;  %v1159_v37 = vsel %vm406_vm1, %v1142_v24, %v1144_v39  ;;  %v1160_v10 = vsel %vm406_vm1, %v1144_v39, %v4076_v32  ;;  %v1215_v22 = vld [vmem:[#allocation4 + $0xd0] sm:$0xff]  ;;  %v1212_v24 = vld [vmem:[#allocation4] sm:$0xff] }
 0x250   : > { %1175 = vst [vmem:[#allocation4 + $0xd8] sm:$0xf] %v1159_v37  ;;  %1410 = vmatpush.msrb.mxu3 %v1215_v22 }
 0x251   : > { %1176 = vst [vmem:[#allocation4 + $0x88] sm:$0xf] %v1160_v10  ;;  %1393 = vmatpush.msrb.mxu2 %v1190_v57  ;;  %v1450_v10 = vld [vmem:[#allocation3 + $0x60] sm:$0xf]  ;;  %v1196_v57 = vld [vmem:[#allocation4 + $0x10] sm:$0xff] }
 0x252   : > { %3396 = vmatmul.msk.f32.vlgmr.msrb.gmra.mxu2 %vm1230_vm9, %v4094_v16  ;;  %1411 = vmatpush.msrb.mxu3 %v1207_v47  ;;  %v1197_v47 = vld [vmem:[#allocation4 + $0xc8] sm:$0xff] }
 0x254   : > { %1412 = vmatpush.msrb.mxu3 %v1199_v26 }
 0x255   : > { %v1461_v35 = vpop.permute.xlu0 %1460 }
 0x256   : > { %v1453_v32 = vpop.permute.xlu1 %1452  ;;  %1413 = vmatpush.msrb.mxu3 %v1191_v36  ;;  %v4129_v45 = vsel %vm406_vm1, %v1459_v6, %v1461_v35 }
 0x257   : > { %3398 = vmatmul.msk.f32.vlgmr.msrb.gmra.mxu3 %vm1230_vm9, %v4094_v16  ;;  %v1216_v33 = vld [vmem:[#allocation4 + $0xd8] sm:$0xf]  ;;  %v1484_v49 = vmul.f32 %v1453_v32, %v4114_v51  ;;  %v4121_v63 = vsel %vm406_vm1, %v1453_v32, %v4082_v56  ;;  %v1493_v61 = vmul.f32 %v1453_v32, %v1443_v1  ;;  %v1497_v7 = vmul.f32 %v4129_v45, %v1447_v19 }
 0x258   : > { %3383 = vmatpush.msk.msra.mxu0 %vm389_vm0, %v1216_v33  ;;  %v1217_v59 = vld [vmem:[#allocation4 + $0x88] sm:$0xf]  ;;  %v1494_v54 = vmul.f32 %v4121_v63, %v1444_v46  ;;  %v1188_v32 = vld [vmem:[#allocation4 + $0x78] sm:$0xff] }
 0x259   : > { %3385 = vmatpush.msk.msra.mxu1 %vm389_vm0, %v1217_v59  ;;  %1520 = vrot.lane.b32.xlu1 %v1484_v49, %s3470_s24  ;;  %v1189_v46 = vld [vmem:[#allocation4 + $0x128] sm:$0xff]  ;;  %v1449_v49 = vld [vmem:[#allocation3 + $0x30] sm:$0xf]  ;;  %v1451_v59 = vld [vmem:[#allocation3 + $0x78] sm:$0xf] }
 0x25a   : > { %1270 = vmatpush.msra.mxu0 %v1208_v48  ;;  %1540 = vrot.lane.b32.xlu2 %v1494_v54, %s3470_s24 }
 0x25b   : > { %1290 = vmatpush.msra.mxu1 %v1209_v40 }
 0x25c   : > { %1271 = vmatpush.msra.mxu0 %v1200_v0  ;;  %v5344_v0 = vld [vmem:[#allocation6_spill] sm:$0xff] }
 0x25d   : > { %1291 = vmatpush.msra.mxu1 %v1201_v53  ;;  %v4147_v50 = vpop.permute.xlu0 %1466 }
 0x25e   : > { %v1457_v62 = vpop.permute.xlu1 %1456  ;;  %1272 = vmatpush.msra.mxu0 %v1192_v41  ;;  %v4154_v37 = vsel %vm406_vm1, %v1465_v34, %v4147_v50  ;;  %v1501_v48 = vmul.f32 %v4147_v50, %v1451_v59 }
 0x25f   : > { %1292 = vmatpush.msra.mxu1 %v1193_v21  ;;  %v4133_v29 = vsel %vm406_vm1, %v4082_v56, %v1457_v62  ;;  %v1220_v56 = vld [vmem:[#allocation4 + $0x98] sm:$0xf]  ;;  %v4145_v38 = vsel %vm406_vm1, %v1457_v62, %v1459_v6  ;;  %v1500_v36 = vmul.f32 %v4154_v37, %v1450_v10  ;;  %v1613_v6 = vld [vmem:[#allocation3 + $0x70] sm:$0xf] }
 0x260   : > { %1273 = vmatpush.msra.mxu0 %v1184_v31  ;;  %v1495_v44 = vmul.f32 %v4133_v29, %v1445_v52  ;;  %v1496_v39 = vmul.f32 %v4145_v38, %v1446_v28 }
 0x261   : > { %1293 = vmatpush.msra.mxu1 %v1185_v14  ;;  %1538 = vrot.lane.b32.xlu1 %v1493_v61, %s3470_s24 }
 0x262   : > { %3386 = vmatmul.msk.f32.vlgmr.msra.gmra.mxu1 %vm1230_vm9, %v4094_v16  ;;  %3384 = vmatmul.msk.f32.vlgmr.msra.gmra.mxu0 %vm1230_vm9, %v4094_v16 }
 0x263   : > { %3393 = vmatpush.msk.msrb.mxu1 %vm389_vm0, %v1221_v55  ;;  %3391 = vmatpush.msk.msrb.mxu0 %vm389_vm0, %v1220_v56 }
 0x264   : > { %1542 = vrot.lane.b32.xlu0 %v1495_v44, %s3470_s24  ;;  %1546 = vrot.lane.b32.xlu2 %v1497_v7, %s3470_s24 }
 0x265   : > { %1350 = vmatpush.msrb.mxu0 %v1212_v24  ;;  %1370 = vmatpush.msrb.mxu1 %v1213_v60 }
 0x266   : > { %v1463_v42 = vpop.permute.xlu1 %1462 }
 0x267   : > { %1371 = vmatpush.msrb.mxu1 %v1205_v15  ;;  %1351 = vmatpush.msrb.mxu0 %v1204_v11  ;;  %v4157_v22 = vsel %vm406_vm1, %v1461_v35, %v1463_v42  ;;  %v4163_v33 = vsel %vm406_vm1, %v1463_v42, %v1465_v34  ;;  %v1640_v35 = vrot.slane %v4114_v51, 4 }
 0x268   : > { %v1498_v26 = vmul.f32 %v4157_v22, %v1448_v43  ;;  %v1499_v54 = vmul.f32 %v4163_v33, %v1449_v49 }
 0x269   : > { %1352 = vmatpush.msrb.mxu0 %v1196_v57  ;;  %1372 = vmatpush.msrb.mxu1 %v1197_v47 }
 0x26a   : > { %1544 = vrot.lane.b32.xlu1 %v1496_v39, %s3470_s24 }
 0x26b   : > { %1373 = vmatpush.msrb.mxu1 %v1189_v46  ;;  %1353 = vmatpush.msrb.mxu0 %v1188_v32 }
 0x26c   : > { %3394 = vmatmul.msk.f32.vlgmr.msrb.gmra.mxu1 %vm1230_vm9, %v4094_v16  ;;  %1548 = vrot.lane.b32.xlu0 %v1498_v26, %s3470_s24 }
 0x26d   : > { %3392 = vmatmul.msk.f32.vlgmr.msrb.gmra.mxu0 %vm1230_vm9, %v4094_v16  ;;  %1552 = vrot.lane.b32.xlu2 %v1500_v36, %s3470_s24  ;;  %v1649_v16 = vrot.slane %v1613_v6, 4 }
 0x26f   : > { %v1650_v40 = vsel %vm389_vm0, %v1640_v35, %v1649_v16 }
 0x272   : > { %1550 = vrot.lane.b32.xlu1 %v1499_v54, %s3470_s24 }
 0x274   : > { %1554 = vrot.lane.b32.xlu0 %v1501_v48, %s3470_s24 }
 0x275   : > { %1771 = vrot.lane.b32.xlu2 %v3581_v20, %s3466_s20 }
 0x27a   : > { %1667 = vrot.lane.b32.xlu1 %v1640_v35, %s3471_s25 }
 0x27c   : > { %1773 = vrot.lane.b32.xlu0 %v3576_v17, %s3466_s20 }
 0x27d   : > { %1777 = vrot.lane.b32.xlu2 %v3600_v27, %s3466_s20 }
 0x282   : > { %1685 = vrot.lane.b32.xlu1 %v1650_v40, %s3471_s25 }
 0x284   : > { %1779 = vrot.lane.b32.xlu0 %v3587_v23, %s3466_s20 }
 0x285   : > { %1783 = vrot.lane.b32.xlu2 %v3607_v30, %s3466_s20 }
 0x28a   : > { %1769 = vrot.lane.b32.xlu1 %v3597_v25, %s3466_s20 }
 0x292   : > { %1775 = vrot.lane.b32.xlu1 %v3578_v18, %s3466_s20 }
 0x29a   : > { %1781 = vrot.lane.b32.xlu1 %v5344_v0, %s3466_s20 }
 0x2b4   : > { %v1541_v31 = vpop.permute.xlu2 %1540 }
 0x2be   : > { %v1547_v28 = vpop.permute.xlu2 %1546 }
 0x2c3   : > { %v1315_v53 = vpop.f32.mrf.mxu2 }
 0x2c4   : > { %v1316_v1 = vadd.f32 %v1315_v53, %v4110_v58 }
 0x2c5   : > { %v1335_v41 = vpop.f32.mrf.mxu3 }
 0x2c6   : > { %v4196_v52 = vmax.f32 %v1316_v1, 0.0  ;;  %v1336_v19 = vadd.f32 %v1335_v41, %v4110_v58 }
 0x2c7   : > { %v1553_v46 = vpop.permute.xlu2 %1552 }
 0x2c8   : > { %1428 = vst [vmem:[#allocation3 + $0x40] sm:$0xff] %v4196_v52  ;;  %v4200_v21 = vmax.f32 %v1336_v19, 0.0 }
 0x2c9   : > { %2136 = vst [vmem:[#allocation5 + $0x238] sm:$0xff] %v4196_v52 }
 0x2ca   : > { %1429 = vst [vmem:[#allocation3 + $0x8] sm:$0xff] %v4200_v21 }
 0x2cb   : > { %2137 = vst [vmem:[#allocation5 + $0x1e0] sm:$0xff] %v4200_v21  ;;  %v4205_v62 = vpop.permute.xlu1 %1520 }
 0x2cf   : > { %v1772_v41 = vpop.permute.xlu2 %1771 }
 0x2d3   : > { %v1539_v61 = vpop.permute.xlu1 %1538 }
 0x2d4   : > { %v1564_v14 = vsel %vm464_vm6, %v1539_v61, %v1541_v31 }
 0x2d5   : > { %1596 = vst [vmem:[#allocation5 + $0x118] sm:$0xf] %v1564_v14  ;;  %v1395_v44 = vpop.f32.mrf.mxu2 }
 0x2d6   : > { %v1396_v7 = vadd.f32 %v1395_v44, %v4110_v58  ;;  %v1543_v55 = vpop.permute.xlu0 %1542 }
 0x2d7   : > { %v1565_v56 = vsel %vm464_vm6, %v1541_v31, %v1543_v55 }
 0x2d8   : > { %v4210_v34 = vmax.f32 %v1396_v7, 0.0  ;;  %1597 = vst [vmem:[#allocation5 + $0x210] sm:$0xf] %v1565_v56  ;;  %v1762_v7 = vld [vmem:[#allocation3 + $0x10] sm:$0xf]  ;;  %v1778_v56 = vpop.permute.xlu2 %1777 }
 0x2da   : > { %1432 = vst [vmem:[#allocation3 + $0x18] sm:$0xff] %v4210_v34  ;;  %v1415_v24 = vpop.f32.mrf.mxu3 }
 0x2db   : > { %2140 = vst [vmem:[#allocation5 + $0x40] sm:$0xff] %v4210_v34  ;;  %v1416_v60 = vadd.f32 %v1415_v24, %v4110_v58 }
 0x2dc   : > { %v1545_v43 = vpop.permute.xlu1 %1544 }
 0x2dd   : > { %v4215_v15 = vmax.f32 %v1416_v60, 0.0  ;;  %v1566_v11 = vsel %vm464_vm6, %v1543_v55, %v1545_v43  ;;  %v1567_v42 = vsel %vm464_vm6, %v1545_v43, %v1547_v28  ;;  %v1765_v60 = vld [vmem:[#allocation3 + $0x50] sm:$0xf] }
 0x2de   : > { %1598 = vst [vmem:[#allocation5 + $0x338] sm:$0xf] %v1566_v11  ;;  %v1549_v39 = vpop.permute.xlu0 %1548  ;;  %v1761_v11 = vld [vmem:[#allocation3 + $0x68] sm:$0xf] }
 0x2df   : > { %1433 = vst [vmem:[#allocation3 + $0x38] sm:$0xff] %v4215_v15  ;;  %v1568_v10 = vsel %vm464_vm6, %v1547_v28, %v1549_v39  ;;  %v1295_v57 = vpop.f32.mrf.mxu1  ;;  %v1275_v47 = vpop.f32.mrf.mxu0 }
 0x2e0   : > { %2141 = vst [vmem:[#allocation5 + $0x250] sm:$0xff] %v4215_v15  ;;  %v1296_v26 = vadd.f32 %v1295_v57, %v4110_v58  ;;  %v1276_v36 = vadd.f32 %v1275_v47, %v4110_v58  ;;  %v1760_v47 = vld [vmem:[#allocation3 + $0x70] sm:$0xf] }
 0x2e1   : > { %1599 = vst [vmem:[#allocation5 + $0x270] sm:$0xf] %v1567_v42 }
 0x2e2   : > { %1600 = vst [vmem:[#allocation5 + $0x1c8] sm:$0xf] %v1568_v10  ;;  %v4224_v32 = vmax.f32 %v1296_v26, 0.0  ;;  %v4226_v49 = vmax.f32 %v1276_v36, 0.0  ;;  %v1764_v26 = vld [vmem:[#allocation3 + $0x28] sm:$0xf] }
 0x2e4   : > { %1427 = vst [vmem:[#allocation3 + $0x48] sm:$0xff] %v4224_v32  ;;  %v1551_v59 = vpop.permute.xlu1 %1550 }
 0x2e5   : > { %2135 = vst [vmem:[#allocation5 + $0x120] sm:$0xff] %v4224_v32  ;;  %v1569_v54 = vsel %vm464_vm6, %v1549_v39, %v1551_v59  ;;  %v1570_v48 = vsel %vm464_vm6, %v1551_v59, %v1553_v46 }
 0x2e6   : > { %1426 = vst [vmem:[#allocation3 + $0x90] sm:$0xff] %v4226_v49  ;;  %v1555_v35 = vpop.permute.xlu0 %1554 }
 0x2e7   : > { %2134 = vst [vmem:[#allocation5 + $0x170] sm:$0xff] %v4226_v49  ;;  %v1571_v6 = vsel %vm464_vm6, %v1553_v46, %v1555_v35  ;;  %v1768_v35 = vld [vmem:[#allocation3 + $0x78] sm:$0xf] }
 0x2e8   : > { %1601 = vst [vmem:[#allocation5 + $0xc8] sm:$0xf] %v1569_v54 }
 0x2e9   : > { %1602 = vst [vmem:[#allocation5 + $0x58] sm:$0xf] %v1570_v48  ;;  %v1375_v16 = vpop.f32.mrf.mxu1  ;;  %v4264_v48 = vpop.permute.xlu2 %1783 }
 0x2ea   : > { %1603 = vst [vmem:[#allocation5 + $0x190] sm:$0xf] %v1571_v6  ;;  %v1355_v40 = vpop.f32.mrf.mxu0  ;;  %v1376_v53 = vadd.f32 %v1375_v16, %v4110_v58  ;;  %v1763_v6 = vld [vmem:[#allocation3 + $0x20] sm:$0xf]  ;;  %v1818_v16 = vmul.f32 %v4264_v48, %v1768_v35 }
 0x2eb   : > { %v1356_v1 = vadd.f32 %v1355_v40, %v4110_v58 }
 0x2ec   : > { %v4237_v19 = vmax.f32 %v1376_v53, 0.0  ;;  %v4239_v31 = vpop.permute.xlu1 %1667 }
 0x2ed   : > { %v4241_v61 = vmax.f32 %v1356_v1, 0.0  ;;  %v1767_v1 = vld [vmem:[#allocation3 + $0x60] sm:$0xf] }
 0x2ee   : > { %1431 = vst [vmem:[#allocation3 + $0x80] sm:$0xff] %v4237_v19  ;;  %v1774_v14 = vpop.permute.xlu0 %1773 }
 0x2ef   : > { %1430 = vst [vmem:[#allocation3 + $0x58] sm:$0xff] %v4241_v61  ;;  %v4246_v44 = vsel %vm594_vm2, %v1772_v41, %v1774_v14 }
 0x2f0   : > { %2138 = vst [vmem:[#allocation5 + $0x158] sm:$0xff] %v4241_v61  ;;  %v1812_v58 = vmul.f32 %v4246_v44, %v1762_v7 }
 0x2f1   : > { %2139 = vst [vmem:[#allocation5 + $0x220] sm:$0xff] %v4237_v19 }
 0x2f2   : > { %1859 = vrot.lane.b32.xlu2 %v1812_v58, %s3469_s23 }
 0x2f4   : > { %v4252_v55 = vpop.permute.xlu1 %1685 }
 0x2f6   : > { %v1780_v28 = vpop.permute.xlu0 %1779 }
 0x2f7   : > { %v4255_v24 = vsel %vm594_vm2, %v1778_v56, %v1780_v28 }
 0x2f8   : > { %v1815_v43 = vmul.f32 %v4255_v24, %v1765_v60 }
 0x2fa   : > { %1865 = vrot.lane.b32.xlu2 %v1815_v43, %s3469_s23  ;;  %v1643_v43 = vrot.slane %v4196_v52, 4 }
 0x2fc   : > { %v1770_v42 = vpop.permute.xlu1 %1769 }
 0x2fd   : > { %v1801_v39 = vmul.f32 %v1770_v42, %v4114_v51  ;;  %v1785_v10 = vsel %vm594_vm2, %v1770_v42, %v1772_v41  ;;  %v1810_v59 = vmul.f32 %v1770_v42, %v1760_v47 }
 0x2fe   : > { %v1811_v57 = vmul.f32 %v1785_v10, %v1761_v11 }
 0x2ff   : > { %1837 = vrot.lane.b32.xlu0 %v1801_v39, %s3469_s23 }
 0x300   : > { %1857 = vrot.lane.b32.xlu1 %v1811_v57, %s3469_s23 }
 0x302   : > { %1871 = vrot.lane.b32.xlu2 %v1818_v16, %s3469_s23 }
 0x304   : > { %v1776_v36 = vpop.permute.xlu1 %1775 }
 0x305   : > { %v1788_v46 = vsel %vm594_vm2, %v1776_v36, %v1778_v56  ;;  %v1787_v40 = vsel %vm594_vm2, %v1774_v14, %v1776_v36  ;;  %v1766_v56 = vld [vmem:[#allocation3 + $0x30] sm:$0xf] }
 0x306   : > { %v1814_v54 = vmul.f32 %v1788_v46, %v1764_v26  ;;  %v1813_v53 = vmul.f32 %v1787_v40, %v1763_v6  ;;  %v1804_v11 = vmul.f32 %v1787_v40, %v4196_v52  ;;  %v1805_v42 = vmul.f32 %v1788_v46, %v4200_v21 }
 0x307   : > { %1855 = vrot.lane.b32.xlu0 %v1810_v59, %s3469_s23  ;;  %v1802_v26 = vmul.f32 %v1785_v10, %v4226_v49 }
 0x308   : > { %1863 = vrot.lane.b32.xlu1 %v1814_v54, %s3469_s23 }
 0x30a   : > { %1943 = vrot.lane.b32.xlu2 %v3569_v13, %s3467_s21 }
 0x30c   : > { %v1782_v41 = vpop.permute.xlu1 %1781 }
 0x30d   : > { %v1791_v7 = vsel %vm594_vm2, %v1782_v41, %v4264_v48  ;;  %v4276_v60 = vsel %vm594_vm2, %v1780_v28, %v1782_v41  ;;  %v1487_v28 = vmul.f32 %v4145_v38, %v4196_v52  ;;  %v1616_v38 = vld [vmem:[#allocation3 + $0x20] sm:$0xf] }
 0x30e   : > { %v1817_v58 = vmul.f32 %v1791_v7, %v1767_v1  ;;  %v1816_v14 = vmul.f32 %v4276_v60, %v1766_v56  ;;  %v1655_v39 = vrot.slane %v1616_v38, 4  ;;  %v1808_v47 = vmul.f32 %v1791_v7, %v4210_v34 }
 0x30f   : > { %1861 = vrot.lane.b32.xlu0 %v1813_v53, %s3469_s23 }
 0x310   : > { %1869 = vrot.lane.b32.xlu1 %v1817_v58, %s3469_s23  ;;  %v1656_v57 = vsel %vm389_vm0, %v1643_v43, %v1655_v39 }
 0x312   : > { %1949 = vrot.lane.b32.xlu2 %v3549_v3, %s3467_s21 }
 0x317   : > { %1867 = vrot.lane.b32.xlu0 %v1816_v14, %s3469_s23 }
 0x318   : > { %1941 = vrot.lane.b32.xlu1 %v3553_v5, %s3467_s21 }
 0x31f   : > { %1939 = vrot.lane.b32.xlu0 %v3551_v4, %s3467_s21 }
 0x320   : > { %1947 = vrot.lane.b32.xlu1 %v3547_v2, %s3467_s21 }
 0x327   : > { %1945 = vrot.lane.b32.xlu0 %v3559_v9, %s3467_s21 }
 0x328   : > { %1953 = vrot.lane.b32.xlu1 %v3557_v8, %s3467_s21 }
 0x32f   : > { %1951 = vrot.lane.b32.xlu0 %v3567_v12, %s3467_s21 }
 0x330   : > { %2172 = vrot.lane.b32.xlu1 %v3576_v17, %s3468_s22 }
 0x337   : > { %2170 = vrot.lane.b32.xlu0 %v3581_v20, %s3468_s22 }
 0x338   : > { %2178 = vrot.lane.b32.xlu1 %v3587_v23, %s3468_s22 }
 0x33f   : > { %2176 = vrot.lane.b32.xlu0 %v3600_v27, %s3468_s22 }
 0x340   : > { %1526 = vrot.lane.b32.xlu1 %v1487_v28, %s3470_s24 }
 0x347   : > { %2182 = vrot.lane.b32.xlu0 %v3607_v30, %s3468_s22 }
 0x348   : > { %1673 = vrot.lane.b32.xlu1 %v1643_v43, %s3471_s25  ;;  %v1932_v43 = vld [vmem:[#allocation3 + $0x10] sm:$0xf] }
 0x34c   : > { %v1860_v36 = vpop.permute.xlu2 %1859 }
 0x34f   : > { %1843 = vrot.lane.b32.xlu0 %v1804_v11, %s3469_s23 }
 0x350   : > { %1845 = vrot.lane.b32.xlu1 %v1805_v42, %s3469_s23 }
 0x354   : > { %v1866_v35 = vpop.permute.xlu2 %1865 }
 0x358   : > { %1691 = vrot.lane.b32.xlu1 %v1656_v57, %s3471_s25 }
 0x35c   : > { %v1872_v1 = vpop.permute.xlu2 %1871 }
 0x360   : > { %1851 = vrot.lane.b32.xlu1 %v1808_v47, %s3469_s23 }
 0x364   : > { %v4329_v14 = vpop.permute.xlu2 %1943 }
 0x368   : > { %1839 = vrot.lane.b32.xlu1 %v1802_v26, %s3469_s23 }
 0x371   : > { %v4321_v46 = vpop.permute.xlu0 %1837 }
 0x372   : > { %v1858_v59 = vpop.permute.xlu1 %1857 }
 0x373   : > { %v1882_v54 = vsel %vm652_vm5, %v1858_v59, %v1860_v36 }
 0x374   : > { %1914 = vst [vmem:[#allocation5 + $0x1d0] sm:$0xf] %v1882_v54 }
 0x379   : > { %v1856_v6 = vpop.permute.xlu0 %1855 }
 0x37a   : > { %v1881_v16 = vsel %vm652_vm5, %v1856_v6, %v1858_v59  ;;  %v1864_v40 = vpop.permute.xlu1 %1863 }
 0x37b   : > { %1913 = vst [vmem:[#allocation5 + $0x1b0] sm:$0xf] %v1881_v16  ;;  %v1885_v53 = vsel %vm652_vm5, %v1864_v40, %v1866_v35 }
 0x37c   : > { %1917 = vst [vmem:[#allocation5 + $0x2c0] sm:$0xf] %v1885_v53 }
 0x381   : > { %v1862_v10 = vpop.permute.xlu0 %1861 }
 0x382   : > { %v1883_v41 = vsel %vm652_vm5, %v1860_v36, %v1862_v10  ;;  %v1884_v7 = vsel %vm652_vm5, %v1862_v10, %v1864_v40  ;;  %v1870_v58 = vpop.permute.xlu1 %1869 }
 0x383   : > { %1915 = vst [vmem:[#allocation5 + $0x228] sm:$0xf] %v1883_v41  ;;  %v1888_v56 = vsel %vm652_vm5, %v1870_v58, %v1872_v1 }
 0x384   : > { %1916 = vst [vmem:[#allocation5 + $0x200] sm:$0xf] %v1884_v7 }
 0x385   : > { %1920 = vst [vmem:[#allocation5 + $0xf0] sm:$0xf] %v1888_v56 }
 0x389   : > { %v1868_v28 = vpop.permute.xlu0 %1867 }
 0x38a   : > { %v1886_v11 = vsel %vm652_vm5, %v1866_v35, %v1868_v28  ;;  %v1887_v42 = vsel %vm652_vm5, %v1868_v28, %v1870_v58  ;;  %v4333_v38 = vpop.permute.xlu1 %1941  ;;  %v1930_v35 = vld [vmem:[#allocation3 + $0x70] sm:$0xf]  ;;  %v1934_v58 = vld [vmem:[#allocation3 + $0x28] sm:$0xf] }
 0x38b   : > { %1918 = vst [vmem:[#allocation5 + $0x128] sm:$0xf] %v1886_v11  ;;  %v1956_v39 = vsel %vm694_vm3, %v4333_v38, %v4329_v14 }
 0x38c   : > { %1919 = vst [vmem:[#allocation5 + $0x148] sm:$0xf] %v1887_v42  ;;  %v1973_v57 = vmul.f32 %v1956_v39, %v4224_v32  ;;  %v1982_v47 = vmul.f32 %v1956_v39, %v1932_v43 }
 0x38e   : > { %v2009_v26 = vrot.slane %v1973_v57, 4  ;;  %v2020_v36 = vrot.slane %v1982_v47, 4 }
 0x390   : > { %2038 = vrot.lane.b32.xlu1 %v2009_v26, %s3468_s22  ;;  %v4341_v59 = vsel %vm389_vm0, %v2009_v26, %v2020_v36 }
 0x391   : > { %v1940_v54 = vpop.permute.xlu0 %1939 }
 0x392   : > { %v4343_v6 = vpop.permute.xlu1 %1947  ;;  %v1971_v16 = vmul.f32 %v1940_v54, %v4114_v51  ;;  %v1980_v53 = vmul.f32 %v1940_v54, %v1930_v35 }
 0x394   : > { %v2007_v40 = vrot.slane %v1971_v16, 4  ;;  %v2016_v10 = vrot.slane %v1980_v53, 4  ;;  %v1937_v16 = vld [vmem:[#allocation3 + $0x60] sm:$0xf] }
 0x396   : > { %2034 = vrot.lane.b32.xlu2 %v2007_v40, %s3468_s22  ;;  %v2017_v43 = vsel %vm389_vm0, %v2007_v40, %v2016_v10 }
 0x399   : > { %v1946_v1 = vpop.permute.xlu0 %1945 }
 0x39a   : > { %v1958_v41 = vsel %vm694_vm3, %v1946_v1, %v4343_v6  ;;  %v4349_v7 = vpop.permute.xlu1 %1953 }
 0x39b   : > { %v1975_v56 = vmul.f32 %v1958_v41, %v4200_v21  ;;  %v1984_v11 = vmul.f32 %v1958_v41, %v1934_v58 }
 0x39d   : > { %v2011_v28 = vrot.slane %v1975_v56, 4  ;;  %v2024_v42 = vrot.slane %v1984_v11, 4  ;;  %v1488_v11 = vmul.f32 %v4129_v45, %v4200_v21  ;;  %v1642_v45 = vrot.slane %v4224_v32, 4 }
 0x39e   : > { %2052 = vrot.lane.b32.xlu2 %v2017_v43, %s3468_s22 }
 0x39f   : > { %2042 = vrot.lane.b32.xlu0 %v2011_v28, %s3468_s22  ;;  %v2025_v47 = vsel %vm389_vm0, %v2011_v28, %v2024_v42  ;;  %v1486_v42 = vmul.f32 %v4133_v29, %v4224_v32  ;;  %v1617_v29 = vld [vmem:[#allocation3 + $0x28] sm:$0xf] }
 0x3a1   : > { %v4355_v51 = vpop.permute.xlu0 %1951 }
 0x3a2   : > { %v4357_v39 = vpop.permute.xlu1 %2172  ;;  %v1961_v57 = vsel %vm694_vm3, %v4355_v51, %v4349_v7 }
 0x3a3   : > { %v1978_v26 = vmul.f32 %v1961_v57, %v4210_v34  ;;  %v1987_v53 = vmul.f32 %v1961_v57, %v1937_v16  ;;  %v1644_v16 = vrot.slane %v4200_v21, 4  ;;  %v1955_v21 = vsel %vm694_vm3, %v1940_v54, %v4333_v38 }
 0x3a5   : > { %v2014_v40 = vrot.slane %v1978_v26, 4  ;;  %v2030_v41 = vrot.slane %v1987_v53, 4  ;;  %v1657_v53 = vrot.slane %v1617_v29, 4  ;;  %v1972_v29 = vmul.f32 %v1955_v21, %v4226_v49 }
 0x3a6   : > { %2168 = vrot.lane.b32.xlu2 %v3597_v25, %s3468_s22 }
 0x3a7   : > { %2060 = vrot.lane.b32.xlu0 %v2025_v47, %s3468_s22  ;;  %v2031_v56 = vsel %vm389_vm0, %v2014_v40, %v2030_v41 }
 0x3a9   : > { %v4367_v36 = vpop.permute.xlu0 %2170 }
 0x3aa   : > { %v4369_v35 = vpop.permute.xlu1 %2178 }
 0x3ab   : > { %5345 = vst [vmem:[#allocation6_spill] sm:$0xff] %v4369_v35  ;;  %v1933_v35 = vld [vmem:[#allocation3 + $0x20] sm:$0xf] }
 0x3ae   : > { %2174 = vrot.lane.b32.xlu2 %v3578_v18, %s3468_s22 }
 0x3af   : > { %2048 = vrot.lane.b32.xlu0 %v2014_v40, %s3468_s22  ;;  %v1615_v40 = vld [vmem:[#allocation3 + $0x10] sm:$0xf] }
 0x3b1   : > { %v4374_v10 = vpop.permute.xlu0 %2176 }
 0x3b2   : > { %5346 = vst [vmem:[#allocation7_spill] sm:$0xff] %v4374_v10  ;;  %v4376_v58 = vpop.permute.xlu1 %1526  ;;  %v1931_v10 = vld [vmem:[#allocation3 + $0x68] sm:$0xf] }
 0x3b6   : > { %2180 = vrot.lane.b32.xlu2 %v5344_v0, %s3468_s22 }
 0x3b7   : > { %2066 = vrot.lane.b32.xlu0 %v2031_v56, %s3468_s22  ;;  %v1653_v56 = vrot.slane %v1615_v40, 4 }
 0x3b9   : > { %v4382_v28 = vpop.permute.xlu0 %2182 }
 0x3ba   : > { %5347 = vst [vmem:[#allocation8_spill] sm:$0xff] %v4382_v28  ;;  %v4384_v43 = vpop.permute.xlu1 %1673 }
 0x3be   : > { %1528 = vrot.lane.b32.xlu2 %v1488_v11, %s3470_s24  ;;  %v1957_v11 = vsel %vm694_vm3, %v4329_v14, %v1946_v1  ;;  %v2008_v1 = vrot.slane %v1972_v29, 4 }
 0x3bf   : > { %1524 = vrot.lane.b32.xlu0 %v1486_v42, %s3470_s24  ;;  %v1658_v42 = vsel %vm389_vm0, %v1644_v16, %v1657_v53  ;;  %v1974_v28 = vmul.f32 %v1957_v11, %v4196_v52  ;;  %v1981_v53 = vmul.f32 %v1955_v21, %v1931_v10  ;;  %v1491_v10 = vmul.f32 %v4154_v37, %v4210_v34 }
 0x3c0   : > { %v1645_v21 = vrot.slane %v4241_v61, 4 }
 0x3c1   : > { %v4392_v57 = vpop.permute.xlu0 %1843  ;;  %v2010_v14 = vrot.slane %v1974_v28, 4  ;;  %v2018_v54 = vrot.slane %v1981_v53, 4  ;;  %v1489_v28 = vmul.f32 %v4157_v22, %v4241_v61  ;;  %v1807_v22 = vmul.f32 %v4276_v60, %v4237_v19  ;;  %v2160_v60 = vld [vmem:[#allocation3 + $0x10] sm:$0xf] }
 0x3c2   : > { %v4394_v47 = vpop.permute.xlu1 %1845  ;;  %v1485_v53 = vmul.f32 %v4121_v63, %v4226_v49 }
 0x3c3   : > { %v1876_v26 = vsel %vm652_vm5, %v4392_v57, %v4394_v47 }
 0x3c4   : > { %1908 = vst [vmem:[#allocation5 + $0x28] sm:$0xff] %v1876_v26  ;;  %v1654_v26 = vsel %vm389_vm0, %v1642_v45, %v1653_v56 }
 0x3c6   : > { %1675 = vrot.lane.b32.xlu2 %v1644_v16, %s3471_s25  ;;  %v1983_v16 = vmul.f32 %v1957_v11, %v1933_v35  ;;  %v2019_v35 = vsel %vm389_vm0, %v2008_v1, %v2018_v54  ;;  %v1647_v11 = vrot.slane %v4210_v34, 4  ;;  %v1618_v34 = vld [vmem:[#allocation3 + $0x50] sm:$0xf]  ;;  %v2159_v54 = vld [vmem:[#allocation3 + $0x68] sm:$0xf] }
 0x3c7   : > { %1671 = vrot.lane.b32.xlu0 %v1642_v45, %s3471_s25 }
 0x3c8   : > { %v2022_v38 = vrot.slane %v1983_v16, 4  ;;  %v1659_v16 = vrot.slane %v1618_v34, 4 }
 0x3ca   : > { %v4403_v41 = vpop.permute.xlu1 %1691 }
 0x3ce   : > { %1693 = vrot.lane.b32.xlu2 %v1658_v42, %s3471_s25  ;;  %v2023_v42 = vsel %vm389_vm0, %v2010_v14, %v2022_v38  ;;  %v1660_v38 = vsel %vm389_vm0, %v1645_v21, %v1659_v16 }
 0x3cf   : > { %1689 = vrot.lane.b32.xlu0 %v1654_v26, %s3471_s25  ;;  %v1620_v26 = vld [vmem:[#allocation3 + $0x60] sm:$0xf] }
 0x3d0   : > { %v1663_v37 = vrot.slane %v1620_v26, 4 }
 0x3d2   : > { %v4415_v40 = vpop.permute.xlu1 %1851 }
 0x3d6   : > { %2040 = vrot.lane.b32.xlu2 %v2010_v14, %s3468_s22  ;;  %v1664_v14 = vsel %vm389_vm0, %v1647_v11, %v1663_v37 }
 0x3d7   : > { %2036 = vrot.lane.b32.xlu0 %v2008_v1, %s3468_s22 }
 0x3da   : > { %v4419_v45 = vpop.permute.xlu1 %1839 }
 0x3db   : > { %v1873_v56 = vsel %vm652_vm5, %v4321_v46, %v4419_v45  ;;  %v4434_v46 = vpop.permute.xlu2 %1949 }
 0x3dc   : > { %1905 = vst [vmem:[#allocation5 + $0x50] sm:$0xff] %v1873_v56 }
 0x3de   : > { %2058 = vrot.lane.b32.xlu2 %v2023_v42, %s3468_s22 }
 0x3df   : > { %2054 = vrot.lane.b32.xlu0 %v2019_v35, %s3468_s22 }
 0x3e6   : > { %1534 = vrot.lane.b32.xlu2 %v1491_v10, %s3470_s24 }
 0x3e7   : > { %1530 = vrot.lane.b32.xlu0 %v1489_v28, %s3470_s24 }
 0x3ee   : > { %1681 = vrot.lane.b32.xlu2 %v1647_v11, %s3471_s25 }
 0x3ef   : > { %1677 = vrot.lane.b32.xlu0 %v1645_v21, %s3471_s25  ;;  %v1641_v21 = vrot.slane %v4226_v49, 4 }
 0x3f0   : > { %v4440_v29 = vpop.permute.xlu2 %2034 }
 0x3f6   : > { %1699 = vrot.lane.b32.xlu2 %v1664_v14, %s3471_s25  ;;  %v1492_v14 = vmul.f32 %v4147_v50, %v4215_v15  ;;  %v1648_v50 = vrot.slane %v4215_v15, 4 }
 0x3f7   : > { %1849 = vrot.lane.b32.xlu0 %v1807_v22, %s3469_s23 }
 0x3f8   : > { %v4447_v1 = vpop.permute.xlu2 %2052 }
 0x3fe   : > { %1522 = vrot.lane.b32.xlu2 %v1485_v53, %s3470_s24 }
 0x3ff   : > { %1695 = vrot.lane.b32.xlu0 %v1660_v38, %s3471_s25  ;;  %v1614_v38 = vld [vmem:[#allocation3 + $0x68] sm:$0xf] }
 0x400   : > { %v2169_v56 = vpop.permute.xlu2 %2168 }
 0x401   : > { %v2184_v42 = vsel %vm753_vm4, %v2169_v56, %v4367_v36  ;;  %v2200_v35 = vmul.f32 %v2169_v56, %v4226_v49  ;;  %v2209_v10 = vmul.f32 %v2169_v56, %v2159_v54  ;;  %v1803_v49 = vmul.f32 %v4246_v44, %v4224_v32  ;;  %v1621_v54 = vld [vmem:[#allocation3 + $0x78] sm:$0xf] }
 0x402   : > { %v2201_v28 = vmul.f32 %v2184_v42, %v4224_v32  ;;  %v2210_v11 = vmul.f32 %v2184_v42, %v2160_v60  ;;  %v1651_v42 = vrot.slane %v1614_v38, 4  ;;  %v1490_v32 = vmul.f32 %v4163_v33, %v4237_v19 }
 0x403   : > { %v2236_v26 = vrot.slane %v2200_v35, 4  ;;  %v2245_v63 = vrot.slane %v2209_v10, 4  ;;  %v1665_v35 = vrot.slane %v1621_v54, 4  ;;  %v1960_v54 = vsel %vm694_vm3, %v4434_v46, %v4355_v51  ;;  %v1936_v51 = vld [vmem:[#allocation3 + $0x30] sm:$0xf] }
 0x404   : > { %v2237_v37 = vrot.slane %v2201_v28, 4  ;;  %v2247_v22 = vrot.slane %v2210_v11, 4  ;;  %v1652_v44 = vsel %vm389_vm0, %v1641_v21, %v1651_v42 }
 0x405   : > { %2263 = vrot.lane.b32.xlu1 %v2236_v26, %s3467_s21  ;;  %v4463_v34 = vsel %vm389_vm0, %v2236_v26, %v2245_v63  ;;  %v1666_v10 = vsel %vm389_vm0, %v1648_v50, %v1665_v35 }
 0x406   : > { %1669 = vrot.lane.b32.xlu2 %v1641_v21, %s3471_s25  ;;  %v4467_v16 = vsel %vm389_vm0, %v2237_v37, %v2247_v22  ;;  %v1619_v22 = vld [vmem:[#allocation3 + $0x30] sm:$0xf] }
 0x407   : > { %1536 = vrot.lane.b32.xlu0 %v1492_v14, %s3470_s24  ;;  %v1661_v21 = vrot.slane %v1619_v22, 4 }
 0x408   : > { %v4470_v53 = vpop.permute.xlu2 %2174 }
 0x40d   : > { %2056 = vrot.lane.b32.xlu1 %v4341_v59, %s3468_s22  ;;  %v4490_v59 = vsel %vm753_vm4, %v4367_v36, %v4357_v39  ;;  %v1646_v36 = vrot.slane %v4237_v19, 4 }
 0x40e   : > { %1841 = vrot.lane.b32.xlu2 %v1803_v49, %s3469_s23  ;;  %v4499_v33 = vmul.f32 %v4490_v59, %v4196_v52 }
 0x40f   : > { %1683 = vrot.lane.b32.xlu0 %v1648_v50, %s3471_s25  ;;  %v1806_v50 = vmul.f32 %v4255_v24, %v4241_v61  ;;  %v1662_v38 = vsel %vm389_vm0, %v1646_v36, %v1661_v21  ;;  %v1977_v24 = vmul.f32 %v1960_v54, %v4237_v19  ;;  %v2039_v19 = vpop.permute.xlu1 %2038 }
 0x410   : > { %v4479_v60 = vpop.permute.xlu2 %2180  ;;  %v2238_v63 = vrot.slane %v4499_v33, 4  ;;  %v2186_v33 = vsel %vm753_vm4, %v4357_v39, %v4470_v53 }
 0x411   : > { %v4481_v56 = vpop.permute.xlu0 %2042 }
 0x415   : > { %1532 = vrot.lane.b32.xlu1 %v1490_v32, %s3470_s24 }
 0x416   : > { %1687 = vrot.lane.b32.xlu2 %v1652_v44, %s3471_s25 }
 0x417   : > { %1701 = vrot.lane.b32.xlu0 %v1666_v10, %s3471_s25 }
 0x418   : > { %v4495_v28 = vpop.permute.xlu2 %1528 }
 0x419   : > { %v1559_v11 = vsel %vm464_vm6, %v4376_v58, %v4495_v28  ;;  %v4504_v26 = vpop.permute.xlu0 %2060 }
 0x41a   : > { %1591 = vst [vmem:[#allocation5 + $0x160] sm:$0xff] %v1559_v11  ;;  %v2013_v11 = vrot.slane %v1977_v24, 4 }
 0x41d   : > { %1679 = vrot.lane.b32.xlu1 %v1646_v36, %s3471_s25 }
 0x41e   : > { %2265 = vrot.lane.b32.xlu2 %v2237_v37, %s3467_s21  ;;  %v1959_v37 = vsel %vm694_vm3, %v4343_v6, %v4434_v46  ;;  %v1935_v6 = vld [vmem:[#allocation3 + $0x50] sm:$0xf] }
 0x41f   : > { %2267 = vrot.lane.b32.xlu0 %v2238_v63, %s3467_s21  ;;  %v1976_v42 = vmul.f32 %v1959_v37, %v4241_v61  ;;  %v1985_v10 = vmul.f32 %v1959_v37, %v1935_v6  ;;  %v1986_v61 = vmul.f32 %v1960_v54, %v1936_v51  ;;  %v1809_v6 = vmul.f32 %v4264_v48, %v4215_v15  ;;  %v1938_v51 = vld [vmem:[#allocation3 + $0x78] sm:$0xf] }
 0x420   : > { %v4513_v52 = vpop.permute.xlu2 %1675 }
 0x421   : > { %v1706_v14 = vsel %vm535_vm7, %v4384_v43, %v4513_v52  ;;  %v4518_v49 = vpop.permute.xlu0 %2048  ;;  %v2012_v46 = vrot.slane %v1976_v42, 4  ;;  %v2028_v22 = vrot.slane %v1986_v61, 4 }
 0x422   : > { %1738 = vst [vmem:[#allocation5 + $0x270] sm:$0xf0] %v1706_v14 }
 0x425   : > { %1697 = vrot.lane.b32.xlu1 %v1662_v38, %s3471_s25 }
 0x426   : > { %1847 = vrot.lane.b32.xlu2 %v1806_v50, %s3469_s23 }
 0x427   : > { %2688 = vrot.lane.b32.xlu0 %v3578_v18, %s3470_s24  ;;  %v2026_v18 = vrot.slane %v1985_v10, 4  ;;  %v1988_v10 = vmul.f32 %v4349_v7, %v1938_v51 }
 0x428   : > { %v4535_v35 = vpop.permute.xlu2 %1693 }
 0x429   : > { %v1714_v32 = vsel %vm535_vm7, %v4403_v41, %v4535_v35  ;;  %v4540_v44 = vpop.permute.xlu0 %2066  ;;  %v2027_v38 = vsel %vm389_vm0, %v2012_v46, %v2026_v18 }
 0x42a   : > { %1746 = vst [vmem:[#allocation5 + $0xa0] sm:$0xff] %v1714_v32 }
 0x42d   : > { %2044 = vrot.lane.b32.xlu1 %v2012_v46, %s3468_s22 }
 0x42e   : > { %2046 = vrot.lane.b32.xlu2 %v2013_v11, %s3468_s22 }
 0x42f   : > { %2369 = vrot.lane.b32.xlu0 %v3569_v13, %s3469_s23  ;;  %v2029_v13 = vsel %vm389_vm0, %v2013_v11, %v2028_v22 }
 0x430   : > { %v2041_v36 = vpop.permute.xlu2 %2040 }
 0x431   : > { %v2072_v21 = vsel %vm753_vm4, %v2039_v19, %v2041_v36  ;;  %v2073_v14 = vsel %vm753_vm4, %v2041_v36, %v4481_v56  ;;  %v1525_v50 = vpop.permute.xlu0 %1524 }
 0x432   : > { %2104 = vst [vmem:[#allocation5 + $0x228] sm:$0xf0] %v2072_v21  ;;  %v1558_v37 = vsel %vm464_vm6, %v1525_v50, %v4376_v58 }
 0x433   : > { %2105 = vst [vmem:[#allocation5 + $0x200] sm:$0xf0] %v2073_v14 }
 0x434   : > { %1590 = vst [vmem:[#allocation5 + $0x70] sm:$0xff] %v1558_v37 }
 0x435   : > { %2062 = vrot.lane.b32.xlu1 %v2027_v38, %s3468_s22 }
 0x436   : > { %2064 = vrot.lane.b32.xlu2 %v2029_v13, %s3468_s22  ;;  %v2127_v13 = vld [vmem:[#allocation3 + $0x10] sm:$0xf] }
 0x437   : > { %2682 = vrot.lane.b32.xlu0 %v3597_v25, %s3470_s24  ;;  %v1979_v25 = vmul.f32 %v4349_v7, %v4215_v15  ;;  %2143 = vst [vmem:[#allocation5 + $0x2f8] sm:$0xf] %v2127_v13 }
 0x438   : > { %v4557_v54 = vpop.permute.xlu2 %2058 }
 0x439   : > { %v2081_v42 = vsel %vm753_vm4, %v4557_v54, %v4504_v26  ;;  %v1672_v58 = vpop.permute.xlu0 %1671  ;;  %v2015_v48 = vrot.slane %v1979_v25, 4 }
 0x43a   : > { %2113 = vst [vmem:[#allocation5 + $0x2b0] sm:$0xff] %v2081_v42  ;;  %v1705_v24 = vsel %vm535_vm7, %v1672_v58, %v4384_v43 }
 0x43b   : > { %1737 = vst [vmem:[#allocation5 + $0x338] sm:$0xf0] %v1705_v24 }
 0x43d   : > { %2684 = vrot.lane.b32.xlu1 %v3581_v20, %s3470_s24  ;;  %v2032_v20 = vrot.slane %v1988_v10, 4 }
 0x43e   : > { %1853 = vrot.lane.b32.xlu2 %v1809_v6, %s3469_s23 }
 0x43f   : > { %2696 = vrot.lane.b32.xlu0 %v3607_v30, %s3470_s24  ;;  %v2033_v7 = vsel %vm389_vm0, %v2015_v48, %v2032_v20 }
 0x440   : > { %v4573_v32 = vpop.permute.xlu2 %1534 }
 0x441   : > { %v1690_v46 = vpop.permute.xlu0 %1689 }
 0x442   : > { %v4577_v43 = vsel %vm535_vm7, %v1690_v46, %v4403_v41 }
 0x445   : > { %2050 = vrot.lane.b32.xlu1 %v2015_v48, %s3468_s22 }
 0x446   : > { %2686 = vrot.lane.b32.xlu2 %v3576_v17, %s3470_s24 }
 0x447   : > { %2377 = vrot.lane.b32.xlu0 %v3567_v12, %s3469_s23 }
 0x448   : > { %v4585_v30 = vpop.permute.xlu2 %1681 }
 0x449   : > { %v2037_v15 = vpop.permute.xlu0 %2036 }
 0x44a   : > { %v2070_v11 = vsel %vm753_vm4, %v4440_v29, %v2037_v15  ;;  %v2071_v41 = vsel %vm753_vm4, %v2037_v15, %v2039_v19 }
 0x44b   : > { %2102 = vst [vmem:[#allocation5 + $0x1b0] sm:$0xf0] %v2070_v11 }
 0x44c   : > { %2103 = vst [vmem:[#allocation5 + $0x1d0] sm:$0xf0] %v2071_v41 }
 0x44d   : > { %2068 = vrot.lane.b32.xlu1 %v2033_v7, %s3468_s22 }
 0x44e   : > { %2367 = vrot.lane.b32.xlu2 %v3553_v5, %s3469_s23 }
 0x450   : > { %v4594_v17 = vpop.permute.xlu2 %1699 }
 0x451   : > { %v2055_v12 = vpop.permute.xlu0 %2054 }
 0x452   : > { %v2078_v61 = vsel %vm753_vm4, %v4447_v1, %v2055_v12 }
 0x453   : > { %2110 = vst [vmem:[#allocation5 + $0x2f0] sm:$0xff] %v2078_v61 }
 0x455   : > { %2690 = vrot.lane.b32.xlu1 %v3600_v27, %s3470_s24 }
 0x456   : > { %2373 = vrot.lane.b32.xlu2 %v3547_v2, %s3469_s23 }
 0x458   : > { %v1523_v29 = vpop.permute.xlu2 %1522 }
 0x459   : > { %v1556_v18 = vsel %vm464_vm6, %v4205_v62, %v1523_v29  ;;  %v1557_v19 = vsel %vm464_vm6, %v1523_v29, %v1525_v50  ;;  %v1531_v5 = vpop.permute.xlu0 %1530 }
 0x45a   : > { %1588 = vst [vmem:[#allocation5 + $0x68] sm:$0xff] %v1556_v18  ;;  %v1560_v36 = vsel %vm464_vm6, %v4495_v28, %v1531_v5  ;;  %v2126_v28 = vld [vmem:[#allocation3 + $0x68] sm:$0xf] }
 0x45b   : > { %1589 = vst [vmem:[#allocation5 + $0x350] sm:$0xff] %v1557_v19 }
 0x45c   : > { %1592 = vst [vmem:[#allocation5 + $0xd0] sm:$0xff] %v1560_v36 }
 0x45d   : > { %2371 = vrot.lane.b32.xlu1 %v3559_v9, %s3469_s23  ;;  %2142 = vst [vmem:[#allocation5 + $0x280] sm:$0xf] %v2126_v28 }
 0x45e   : > { %2694 = vrot.lane.b32.xlu2 %v5344_v0, %s3470_s24 }
 0x460   : > { %v1670_v2 = vpop.permute.xlu2 %1669 }
 0x461   : > { %v1703_v27 = vsel %vm535_vm7, %v4239_v31, %v1670_v2  ;;  %v1704_v62 = vsel %vm535_vm7, %v1670_v2, %v1672_v58  ;;  %v1678_v1 = vpop.permute.xlu0 %1677 }
 0x462   : > { %1735 = vst [vmem:[#allocation5 + $0x118] sm:$0xf0] %v1703_v27  ;;  %v1707_v22 = vsel %vm535_vm7, %v4513_v52, %v1678_v1  ;;  %v2676_v27 = vld [vmem:[#allocation3 + $0x28] sm:$0xf] }
 0x463   : > { %1736 = vst [vmem:[#allocation5 + $0x210] sm:$0xf0] %v1704_v62 }
 0x464   : > { %1739 = vst [vmem:[#allocation5 + $0x1c8] sm:$0xf0] %v1707_v22 }
 0x465   : > { %2692 = vrot.lane.b32.xlu1 %v3587_v23, %s3470_s24 }
 0x466   : > { %2375 = vrot.lane.b32.xlu2 %v3549_v3, %s3469_s23 }
 0x468   : > { %v1842_v9 = vpop.permute.xlu2 %1841 }
 0x469   : > { %v1874_v0 = vsel %vm652_vm5, %v4419_v45, %v1842_v9  ;;  %v4624_v31 = vsel %vm652_vm5, %v1842_v9, %v4392_v57  ;;  %v1850_v21 = vpop.permute.xlu0 %1849 }
 0x46a   : > { %1906 = vst [vmem:[#allocation5 + $0x78] sm:$0xff] %v1874_v0  ;;  %v1879_v52 = vsel %vm652_vm5, %v1850_v21, %v4415_v40 }
 0x46b   : > { %1911 = vst [vmem:[#allocation5 + $0x8] sm:$0xff] %v1879_v52  ;;  %v4679_v52 = vld [vmem:[#allocation3 + $0x8] sm:$0xff] }
 0x46d   : > { %2365 = vrot.lane.b32.xlu1 %v3551_v4, %s3469_s23 }
 0x470   : > { %v1688_v23 = vpop.permute.xlu2 %1687 }
 0x471   : > { %v1711_v3 = vsel %vm535_vm7, %v4252_v55, %v1688_v23  ;;  %v1712_v14 = vsel %vm535_vm7, %v1688_v23, %v1690_v46  ;;  %v1696_v45 = vpop.permute.xlu0 %1695  ;;  %v2529_v23 = vld [vmem:[#allocation3 + $0x28] sm:$0xf] }
 0x472   : > { %1743 = vst [vmem:[#allocation5 + $0x218] sm:$0xff] %v1711_v3  ;;  %v1715_v57 = vsel %vm535_vm7, %v4535_v35, %v1696_v45  ;;  %v2675_v3 = vld [vmem:[#allocation3 + $0x20] sm:$0xf] }
 0x473   : > { %1744 = vst [vmem:[#allocation5 + $0x1f8] sm:$0xff] %v1712_v14 }
 0x474   : > { %1747 = vst [vmem:[#allocation5 + $0x1c0] sm:$0xff] %v1715_v57  ;;  %v2568_v57 = vrot.slane %v2529_v23, 4 }
 0x475   : > { %2379 = vrot.lane.b32.xlu1 %v3557_v8, %s3469_s23 }
 0x477   : > { %v2264_v50 = vpop.permute.xlu1 %2263 }
 0x478   : > { %v2266_v37 = vpop.permute.xlu2 %2265 }
 0x479   : > { %v2299_v4 = vsel %vm694_vm3, %v2264_v50, %v2266_v37  ;;  %v1537_v38 = vpop.permute.xlu0 %1536 }
 0x47a   : > { %2331 = vst [vmem:[#allocation5 + $0x280] sm:$0xf0] %v2299_v4  ;;  %v1563_v55 = vsel %vm464_vm6, %v4573_v32, %v1537_v38  ;;  %v4688_v38 = vld [vmem:[#allocation3 + $0x40] sm:$0xff] }
 0x47b   : > { %1595 = vst [vmem:[#allocation5 + $0x240] sm:$0xff] %v1563_v55 }
 0x47f   : > { %v2057_v42 = vpop.permute.xlu1 %2056 }
 0x480   : > { %v2079_v35 = vsel %vm753_vm4, %v2055_v12, %v2057_v42  ;;  %v4643_v58 = vsel %vm753_vm4, %v2057_v42, %v4557_v54  ;;  %v1848_v8 = vpop.permute.xlu2 %1847  ;;  %v2528_v42 = vld [vmem:[#allocation3 + $0x20] sm:$0xf] }
 0x481   : > { %2111 = vst [vmem:[#allocation5 + $0x300] sm:$0xff] %v2079_v35  ;;  %v1877_v24 = vsel %vm652_vm5, %v4394_v47, %v1848_v8  ;;  %v1878_v6 = vsel %vm652_vm5, %v1848_v8, %v1850_v21  ;;  %v1684_v25 = vpop.permute.xlu0 %1683  ;;  %v2555_v35 = vrot.slane %v4688_v38, 4  ;;  %v2566_v8 = vrot.slane %v2528_v42, 4 }
 0x482   : > { %v1710_v51 = vsel %vm535_vm7, %v4585_v30, %v1684_v25  ;;  %1909 = vst [vmem:[#allocation5 + $0x230] sm:$0xff] %v1877_v24 }
 0x483   : > { %1910 = vst [vmem:[#allocation5 + $0x360] sm:$0xff] %v1878_v6  ;;  %v2567_v25 = vsel %vm389_vm0, %v2555_v35, %v2566_v8 }
 0x484   : > { %1742 = vst [vmem:[#allocation5 + $0x190] sm:$0xf0] %v1710_v51 }
 0x487   : > { %v1533_v46 = vpop.permute.xlu1 %1532 }
 0x488   : > { %v1561_v48 = vsel %vm464_vm6, %v1531_v5, %v1533_v46  ;;  %v1562_v54 = vsel %vm464_vm6, %v1533_v46, %v4573_v32  ;;  %v2047_v10 = vpop.permute.xlu2 %2046 }
 0x489   : > { %1593 = vst [vmem:[#allocation5 + $0xd8] sm:$0xff] %v1561_v48  ;;  %v2076_v47 = vsel %vm753_vm4, %v2047_v10, %v4518_v49  ;;  %v1702_v20 = vpop.permute.xlu0 %1701 }
 0x48a   : > { %1594 = vst [vmem:[#allocation5 + $0x138] sm:$0xff] %v1562_v54  ;;  %v1718_v15 = vsel %vm535_vm7, %v4594_v17, %v1702_v20  ;;  %v2677_v54 = vld [vmem:[#allocation3 + $0x50] sm:$0xf] }
 0x48b   : > { %2108 = vst [vmem:[#allocation5 + $0x148] sm:$0xf0] %v2076_v47 }
 0x48c   : > { %1750 = vst [vmem:[#allocation5 + $0x328] sm:$0xff] %v1718_v15 }
 0x48f   : > { %v1680_v11 = vpop.permute.xlu1 %1679 }
 0x490   : > { %v1708_v41 = vsel %vm535_vm7, %v1678_v1, %v1680_v11  ;;  %v1709_v7 = vsel %vm535_vm7, %v1680_v11, %v4585_v30  ;;  %v2065_v12 = vpop.permute.xlu2 %2064 }
 0x491   : > { %1740 = vst [vmem:[#allocation5 + $0xc8] sm:$0xf0] %v1708_v41  ;;  %v2084_v32 = vsel %vm753_vm4, %v2065_v12, %v4540_v44  ;;  %v4662_v61 = vpop.permute.xlu0 %2267  ;;  %v2668_v41 = vld [vmem:[#allocation3 + $0x58] sm:$0xff] }
 0x492   : > { %1741 = vst [vmem:[#allocation5 + $0x58] sm:$0xf0] %v1709_v7  ;;  %v2300_v29 = vsel %vm694_vm3, %v2266_v37, %v4662_v61 }
 0x493   : > { %2116 = vst [vmem:[#allocation5 + $0x180] sm:$0xff] %v2084_v32 }
 0x494   : > { %2332 = vst [vmem:[#allocation5 + $0x2f8] sm:$0xf0] %v2300_v29  ;;  %v2530_v29 = vld [vmem:[#allocation3 + $0x50] sm:$0xf] }
 0x497   : > { %v1698_v18 = vpop.permute.xlu1 %1697 }
 0x498   : > { %v1716_v19 = vsel %vm535_vm7, %v1696_v45, %v1698_v18  ;;  %v1717_v5 = vsel %vm535_vm7, %v1698_v18, %v4594_v17  ;;  %v1854_v30 = vpop.permute.xlu2 %1853  ;;  %v2556_v45 = vrot.slane %v4679_v52, 4  ;;  %v2673_v18 = vld [vmem:[#allocation3 + $0x68] sm:$0xf] }
 0x499   : > { %1748 = vst [vmem:[#allocation5 + $0x100] sm:$0xff] %v1716_v19  ;;  %v1880_v36 = vsel %vm652_vm5, %v4415_v40, %v1854_v30  ;;  %v2689_v62 = vpop.permute.xlu0 %2688  ;;  %v2557_v19 = vrot.slane %v2668_v41, 4 }
 0x49a   : > { %1749 = vst [vmem:[#allocation5 + $0x2d8] sm:$0xff] %v1717_v5  ;;  %v2570_v5 = vrot.slane %v2530_v29, 4 }
 0x49b   : > { %1912 = vst [vmem:[#allocation5 + $0x290] sm:$0xff] %v1880_v36 }
 0x49f   : > { %v2045_v2 = vpop.permute.xlu1 %2044 }
 0x4a0   : > { %v2074_v1 = vsel %vm753_vm4, %v4481_v56, %v2045_v2  ;;  %v2075_v22 = vsel %vm753_vm4, %v2045_v2, %v2047_v10  ;;  %v2687_v28 = vpop.permute.xlu2 %2686 }
 0x4a1   : > { %2106 = vst [vmem:[#allocation5 + $0x2c0] sm:$0xf0] %v2074_v1  ;;  %v2700_v9 = vsel %vm464_vm6, %v2687_v28, %v2689_v62  ;;  %v2370_v46 = vpop.permute.xlu0 %2369  ;;  %v2360_v1 = vld [vmem:[#allocation3 + $0x50] sm:$0xf] }
 0x4a2   : > { %2107 = vst [vmem:[#allocation5 + $0x128] sm:$0xf0] %v2075_v22  ;;  %v2726_v17 = vmul.f32 %v2700_v9, %v2676_v27  ;;  %v2717_v56 = vmul.f32 %v2700_v9, %v4679_v52 }
 0x4a4   : > { %2774 = vrot.lane.b32.xlu0 %v2726_v17, %s3465_s17 }
 0x4a7   : > { %v2063_v0 = vpop.permute.xlu1 %2062 }
 0x4a8   : > { %v2082_v40 = vsel %vm753_vm4, %v4504_v26, %v2063_v0  ;;  %v2083_v21 = vsel %vm753_vm4, %v2063_v0, %v2065_v12  ;;  %v2569_v26 = vsel %vm389_vm0, %v2556_v45, %v2568_v57  ;;  %v4698_v51 = vpop.permute.xlu2 %2367 }
 0x4a9   : > { %2114 = vst [vmem:[#allocation5 + $0x140] sm:$0xff] %v2082_v40  ;;  %v2382_v48 = vsel %vm652_vm5, %v4698_v51, %v2370_v46  ;;  %v2683_v30 = vpop.permute.xlu0 %2682 }
 0x4aa   : > { %2115 = vst [vmem:[#allocation5 + $0x258] sm:$0xff] %v2083_v21  ;;  %v2723_v2 = vmul.f32 %v2683_v30, %v2673_v18 }
 0x4ac   : > { %2756 = vrot.lane.b32.xlu0 %v2717_v56, %s3465_s17  ;;  %v4726_v56 = vld [vmem:[#allocation3 + $0x48] sm:$0xff] }
 0x4af   : > { %v2685_v14 = vpop.permute.xlu1 %2684 }
 0x4b0   : > { %v2699_v50 = vsel %vm464_vm6, %v2685_v14, %v2687_v28  ;;  %v4717_v22 = vpop.permute.xlu2 %2373  ;;  %v2674_v28 = vld [vmem:[#allocation3 + $0x10] sm:$0xf]  ;;  %v2698_v9 = vsel %vm464_vm6, %v2683_v30, %v2685_v14  ;;  %v2679_v14 = vld [vmem:[#allocation3 + $0x60] sm:$0xf] }
 0x4b1   : > { %v2725_v37 = vmul.f32 %v2699_v50, %v2675_v3  ;;  %v2716_v13 = vmul.f32 %v2699_v50, %v4688_v38  ;;  %v2724_v40 = vmul.f32 %v2698_v9, %v2674_v28  ;;  %v2715_v3 = vmul.f32 %v2698_v9, %v4726_v56  ;;  %v2161_v50 = vld [vmem:[#allocation3 + $0x20] sm:$0xf] }
 0x4b2   : > { %v2211_v8 = vmul.f32 %v4490_v59, %v2161_v50 }
 0x4b3   : > { %2772 = vrot.lane.b32.xlu2 %v2725_v37, %s3465_s17  ;;  %v4733_v37 = vpop.permute.xlu0 %2696 }
 0x4b4   : > { %2604 = vrot.lane.b32.xlu0 %v2569_v26, %s3472_s26 }
 0x4b7   : > { %v2051_v4 = vpop.permute.xlu1 %2050 }
 0x4b8   : > { %v2077_v55 = vsel %vm753_vm4, %v4518_v49, %v2051_v4  ;;  %v2358_v49 = vld [vmem:[#allocation3 + $0x20] sm:$0xf]  ;;  %v2163_v4 = vld [vmem:[#allocation3 + $0x50] sm:$0xf] }
 0x4b9   : > { %2109 = vst [vmem:[#allocation5 + $0xf0] sm:$0xf0] %v2077_v55  ;;  %v2408_v10 = vmul.f32 %v2382_v48, %v2358_v49  ;;  %v5348_v55 = vld [vmem:[#allocation7_spill] sm:$0xff]  ;;  %v2249_v49 = vrot.slane %v2211_v8, 4 }
 0x4bb   : > { %2754 = vrot.lane.b32.xlu2 %v2716_v13, %s3465_s17  ;;  %v2187_v13 = vsel %vm753_vm4, %v4470_v53, %v5348_v55  ;;  %v2250_v59 = vsel %vm389_vm0, %v2238_v63, %v2249_v49  ;;  %v4769_v53 = vld [vmem:[#allocation3 + $0x38] sm:$0xff]  ;;  %v4778_v9 = vpop.permute.xlu0 %2377 }
 0x4bf   : > { %v2069_v24 = vpop.permute.xlu1 %2068 }
 0x4c0   : > { %v2085_v6 = vsel %vm753_vm4, %v4540_v44, %v2069_v24  ;;  %v2359_v44 = vld [vmem:[#allocation3 + $0x28] sm:$0xf]  ;;  %v3444_v24 = vld [vmem:[#allocation3 + $0x58] sm:$0xff] }
 0x4c1   : > { %2117 = vst [vmem:[#allocation5 + $0x110] sm:$0xff] %v2085_v6  ;;  %v2204_v6 = vmul.f32 %v3444_v24, %v2187_v13 }
 0x4c3   : > { %2602 = vrot.lane.b32.xlu2 %v2567_v25, %s3472_s26  ;;  %v2213_v25 = vmul.f32 %v2187_v13, %v2163_v4 }
 0x4c7   : > { %v2691_v47 = vpop.permute.xlu1 %2690 }
 0x4c8   : > { %v2701_v20 = vsel %vm464_vm6, %v2689_v62, %v2691_v47  ;;  %v2571_v62 = vsel %vm389_vm0, %v2557_v19, %v2570_v5 }
 0x4c9   : > { %v2727_v15 = vmul.f32 %v2701_v20, %v2677_v54  ;;  %v2718_v12 = vmul.f32 %v2701_v20, %v2668_v41  ;;  %v2253_v54 = vrot.slane %v2213_v25, 4  ;;  %v2680_v20 = vld [vmem:[#allocation3 + $0x78] sm:$0xf] }
 0x4cb   : > { %2776 = vrot.lane.b32.xlu1 %v2727_v15, %s3465_s17  ;;  %2455 = vrot.lane.b32.xlu2 %v2408_v10, %s3466_s20  ;;  %v4744_v10 = vld [vmem:[#allocation3 + $0x90] sm:$0xff] }
 0x4cf   : > { %v2372_v11 = vpop.permute.xlu1 %2371 }
 0x4d0   : > { %v2383_v7 = vsel %vm652_vm5, %v2370_v46, %v2372_v11  ;;  %v2384_v17 = vsel %vm652_vm5, %v2372_v11, %v4717_v22  ;;  %v2240_v46 = vrot.slane %v2204_v6, 4  ;;  %v2560_v6 = vrot.slane %v4769_v53, 4 }
 0x4d1   : > { %v2409_v32 = vmul.f32 %v2383_v7, %v2359_v44  ;;  %v2410_v0 = vmul.f32 %v2384_v17, %v2360_v1  ;;  %v2400_v21 = vmul.f32 %v4679_v52, %v2383_v7  ;;  %v2401_v23 = vmul.f32 %v2668_v41, %v2384_v17  ;;  %v2695_v52 = vpop.permute.xlu2 %2694  ;;  %v2162_v41 = vld [vmem:[#allocation3 + $0x28] sm:$0xf]  ;;  %v4760_v7 = vld [vmem:[#allocation3 + $0x18] sm:$0xff] }
 0x4d2   : > { %v2704_v15 = vsel %vm464_vm6, %v2695_v52, %v4733_v37  ;;  %v2553_v44 = vrot.slane %v4744_v10, 4  ;;  %v2212_v29 = vmul.f32 %v2186_v33, %v2162_v41  ;;  %v2554_v17 = vrot.slane %v4726_v56, 4  ;;  %v2525_v41 = vld [vmem:[#allocation3 + $0x88] sm:$0xff] }
 0x4d3   : > { %2758 = vrot.lane.b32.xlu1 %v2718_v12, %s3465_s17  ;;  %2457 = vrot.lane.b32.xlu0 %v2409_v32, %s3466_s20  ;;  %v2730_v63 = vmul.f32 %v2704_v15, %v2680_v20  ;;  %v3445_v12 = vld [vmem:[#allocation3 + $0x8] sm:$0xff]  ;;  %v2559_v50 = vrot.slane %v4760_v7, 4 }
 0x4d4   : > { %2584 = vrot.lane.b32.xlu2 %v2555_v35, %s3472_s26  ;;  %v2399_v35 = vmul.f32 %v2382_v48, %v4688_v38  ;;  %v2254_v38 = vsel %vm389_vm0, %v2240_v46, %v2253_v54  ;;  %v2526_v48 = vld [vmem:[#allocation3 + $0x68] sm:$0xf]  ;;  %v2203_v32 = vmul.f32 %v3445_v12, %v2186_v33  ;;  %v2251_v39 = vrot.slane %v2212_v29, 4  ;;  %v2534_v33 = vld [vmem:[#allocation3 + $0x98] sm:$0xf] }
 0x4d5   : > { %v2562_v11 = vrot.slane %v2526_v48, 4  ;;  %v2561_v12 = vrot.slane %v2525_v41, 4  ;;  %v2128_v41 = vld [vmem:[#allocation3 + $0x20] sm:$0xf] }
 0x4d6   : > { %2144 = vst [vmem:[#allocation5 + $0x98] sm:$0xf] %v2128_v41 }
 0x4d7   : > { %v2693_v36 = vpop.permute.xlu1 %2692 }
 0x4d8   : > { %v4711_v27 = vsel %vm464_vm6, %v2691_v47, %v2693_v36  ;;  %v2703_v57 = vsel %vm464_vm6, %v2693_v36, %v2695_v52  ;;  %v2714_v47 = vmul.f32 %v2683_v30, %v4744_v10  ;;  %v2239_v30 = vrot.slane %v2203_v32, 4 }
 0x4d9   : > { %v2729_v26 = vmul.f32 %v2703_v57, %v2679_v14  ;;  %v2720_v18 = vmul.f32 %v2703_v57, %v4760_v7  ;;  %v4767_v5 = vpop.permute.xlu2 %2375  ;;  %v2721_v36 = vmul.f32 %v2704_v15, %v4769_v53  ;;  %v2532_v14 = vld [vmem:[#allocation3 + $0x60] sm:$0xf]  ;;  %v2578_v32 = vrot.slane %v2534_v33, 4 }
 0x4db   : > { %2606 = vrot.lane.b32.xlu1 %v2571_v62, %s3472_s26  ;;  %2586 = vrot.lane.b32.xlu0 %v2556_v45, %s3472_s26  ;;  %v2681_v45 = vld [vmem:[#allocation3 + $0x98] sm:$0xf]  ;;  %v2527_v62 = vld [vmem:[#allocation3 + $0x10] sm:$0xf] }
 0x4dc   : > { %2768 = vrot.lane.b32.xlu2 %v2723_v2, %s3465_s17  ;;  %v2731_v42 = vmul.f32 %v4733_v37, %v2681_v45  ;;  %v2252_v2 = vsel %vm389_vm0, %v2239_v30, %v2251_v39 }
 0x4df   : > { %v2366_v1 = vpop.permute.xlu1 %2365 }
 0x4e0   : > { %v2397_v54 = vmul.f32 %v4744_v10, %v2366_v1 }
 0x4e3   : > { %2770 = vrot.lane.b32.xlu0 %v2724_v40, %s3465_s17  ;;  %2459 = vrot.lane.b32.xlu1 %v2410_v0, %s3466_s20  ;;  %v2564_v0 = vrot.slane %v2527_v62, 4  ;;  %v2357_v40 = vld [vmem:[#allocation3 + $0x10] sm:$0xf] }
 0x4e4   : > { %2439 = vrot.lane.b32.xlu2 %v2400_v21, %s3466_s20  ;;  %v2381_v21 = vsel %vm652_vm5, %v2366_v1, %v4698_v51  ;;  %v4792_v51 = vld [vmem:[#allocation3 + $0x88] sm:$0xff] }
 0x4e5   : > { %v2722_v4 = vmul.f32 %v4733_v37, %v4792_v51 }
 0x4eb   : > { %2588 = vrot.lane.b32.xlu1 %v2557_v19, %s3472_s26  ;;  %2441 = vrot.lane.b32.xlu0 %v2401_v23, %s3466_s20  ;;  %v2563_v19 = vsel %vm389_vm0, %v2553_v44, %v2562_v11  ;;  %v2407_v23 = vmul.f32 %v2381_v21, %v2357_v40  ;;  %v2398_v11 = vmul.f32 %v4726_v56, %v2381_v21  ;;  %v2362_v56 = vld [vmem:[#allocation3 + $0x60] sm:$0xf]  ;;  %v3446_v21 = vld [vmem:[#allocation3 + $0x18] sm:$0xff] }
 0x4ec   : > { %2752 = vrot.lane.b32.xlu2 %v2715_v3, %s3465_s17  ;;  %v2565_v3 = vsel %vm389_vm0, %v2554_v17, %v2564_v0 }
 0x4f3   : > { %2437 = vrot.lane.b32.xlu1 %v2399_v35, %s3466_s20  ;;  %2780 = vrot.lane.b32.xlu0 %v2729_v26, %s3465_s17  ;;  %v2574_v26 = vrot.slane %v2532_v14, 4  ;;  %v2356_v35 = vld [vmem:[#allocation3 + $0x68] sm:$0xf] }
 0x4f4   : > { %2784 = vrot.lane.b32.xlu2 %v2731_v42, %s3465_s17  ;;  %v2533_v42 = vld [vmem:[#allocation3 + $0x78] sm:$0xf]  ;;  %v2406_v49 = vmul.f32 %v2366_v1, %v2356_v35 }
 0x4f5   : > { %v2575_v13 = vsel %vm389_vm0, %v2559_v50, %v2574_v26  ;;  %v2576_v25 = vrot.slane %v2533_v42, 4 }
 0x4fb   : > { %2750 = vrot.lane.b32.xlu1 %v2714_v47, %s3465_s17  ;;  %2285 = vrot.lane.b32.xlu0 %v2250_v59, %s3467_s21  ;;  %v2577_v47 = vsel %vm389_vm0, %v2560_v6, %v2576_v25  ;;  %v2380_v59 = vpop.permute.xlu1 %2379 }
 0x4fc   : > { %2289 = vrot.lane.b32.xlu2 %v2254_v38, %s3467_s21  ;;  %v2363_v38 = vld [vmem:[#allocation3 + $0x78] sm:$0xf]  ;;  %v2387_v15 = vsel %vm652_vm5, %v4778_v9, %v2380_v59  ;;  %v2405_v25 = vmul.f32 %v2380_v59, %v4792_v51 }
 0x4fd   : > { %v2404_v40 = vmul.f32 %v4769_v53, %v2387_v15 }
 0x503   : > { %2782 = vrot.lane.b32.xlu1 %v2730_v63, %s3465_s17  ;;  %2598 = vrot.lane.b32.xlu0 %v2563_v19, %s3472_s26  ;;  %v2364_v63 = vld [vmem:[#allocation3 + $0x98] sm:$0xf]  ;;  %v2579_v19 = vsel %vm389_vm0, %v2561_v12, %v2578_v32 }
 0x504   : > { %2762 = vrot.lane.b32.xlu2 %v2720_v18, %s3465_s17  ;;  %v2414_v18 = vmul.f32 %v2380_v59, %v2364_v63 }
 0x50b   : > { %2287 = vrot.lane.b32.xlu1 %v2252_v2, %s3467_s21  ;;  %2764 = vrot.lane.b32.xlu0 %v2721_v36, %s3465_s17 }
 0x50c   : > { %2269 = vrot.lane.b32.xlu2 %v2239_v30, %s3467_s21  ;;  %v2386_v30 = vsel %vm652_vm5, %v4767_v5, %v4778_v9  ;;  %v5349_v9 = vld [vmem:[#allocation6_spill] sm:$0xff] }
 0x50d   : > { %v4776_v28 = vpop.permute.xlu2 %2772  ;;  %v2412_v36 = vmul.f32 %v2386_v30, %v2362_v56  ;;  %v2189_v0 = vsel %vm753_vm4, %v5349_v9, %v4479_v60 }
 0x513   : > { %2600 = vrot.lane.b32.xlu1 %v2565_v3, %s3472_s26  ;;  %2271 = vrot.lane.b32.xlu0 %v2240_v46, %s3467_s21 }
 0x514   : > { %2453 = vrot.lane.b32.xlu2 %v2407_v23, %s3466_s20  ;;  %v4851_v23 = vmul.f32 %v3446_v21, %v2189_v0 }
 0x515   : > { %v4787_v45 = vpop.permute.xlu2 %2754 }
 0x516   : > { %v2775_v52 = vpop.permute.xlu0 %2774  ;;  %v2242_v42 = vrot.slane %v4851_v23, 4 }
 0x517   : > { %v2796_v57 = vsel %vm406_vm1, %v4776_v28, %v2775_v52 }
 0x518   : > { %2828 = vst [vmem:[#allocation5 + $0xf8] sm:$0xf] %v2796_v57 }
 0x51b   : > { %2766 = vrot.lane.b32.xlu1 %v2722_v4, %s3465_s17  ;;  %2580 = vrot.lane.b32.xlu0 %v2553_v44, %s3472_s26  ;;  %v2413_v44 = vmul.f32 %v2387_v15, %v2363_v38 }
 0x51c   : > { %2610 = vrot.lane.b32.xlu2 %v2575_v13, %s3472_s26  ;;  %v5350_v13 = vld [vmem:[#allocation8_spill] sm:$0xff] }
 0x51d   : > { %v4802_v8 = vpop.permute.xlu2 %2602 }
 0x51e   : > { %v2757_v24 = vpop.permute.xlu0 %2756 }
 0x51f   : > { %v2788_v37 = vsel %vm406_vm1, %v4787_v45, %v2757_v24  ;;  %v2941_v46 = vld [vmem:[#allocation5 + $0xf8] sm:$0xf] }
 0x520   : > { %3403 = vmatpush.msk.msra.mxu2 %vm389_vm0, %v2941_v46 }
 0x522   : > { %3018 = vmatpush.msra.mxu2 %v2788_v37 }
 0x523   : > { %2451 = vrot.lane.b32.xlu1 %v2406_v49, %s3466_s20  ;;  %2612 = vrot.lane.b32.xlu0 %v2577_v47, %s3472_s26  ;;  %v3447_v49 = vld [vmem:[#allocation3 + $0x38] sm:$0xff] }
 0x524   : > { %2433 = vrot.lane.b32.xlu2 %v2397_v54, %s3466_s20  ;;  %v2531_v54 = vld [vmem:[#allocation3 + $0x30] sm:$0xf] }
 0x525   : > { %v4813_v48 = vpop.permute.xlu2 %2455  ;;  %v2572_v63 = vrot.slane %v2531_v54, 4 }
 0x526   : > { %v4815_v20 = vpop.permute.xlu0 %2604 }
 0x527   : > { %v2626_v10 = vsel %vm1060_vm8, %v4802_v8, %v4815_v20 }
 0x528   : > { %3019 = vmatpush.msra.mxu2 %v2626_v10 }
 0x52b   : > { %2582 = vrot.lane.b32.xlu1 %v2554_v17, %s3472_s26  ;;  %2435 = vrot.lane.b32.xlu0 %v2398_v11, %s3466_s20  ;;  %v2165_v17 = vld [vmem:[#allocation3 + $0x60] sm:$0xf] }
 0x52c   : > { %2465 = vrot.lane.b32.xlu2 %v2413_v44, %s3466_s20  ;;  %v2215_v3 = vmul.f32 %v2189_v0, %v2165_v17  ;;  %v2167_v17 = vld [vmem:[#allocation3 + $0x98] sm:$0xf] }
 0x52e   : > { %v4826_v29 = vpop.permute.xlu2 %2584  ;;  %v2257_v35 = vrot.slane %v2215_v3, 4  ;;  %v2361_v3 = vld [vmem:[#allocation3 + $0x30] sm:$0xf] }
 0x530   : > { %v2258_v46 = vsel %vm389_vm0, %v2242_v42, %v2257_v35 }
 0x533   : > { %2614 = vrot.lane.b32.xlu1 %v2579_v19, %s3472_s26  ;;  %2467 = vrot.lane.b32.xlu0 %v2414_v18, %s3466_s20 }
 0x534   : > { %2594 = vrot.lane.b32.xlu2 %v2560_v6, %s3472_s26 }
 0x536   : > { %v4835_v39 = vpop.permute.xlu2 %2768 }
 0x53b   : > { %2596 = vrot.lane.b32.xlu0 %v2561_v12, %s3472_s26  ;;  %2463 = vrot.lane.b32.xlu1 %v2412_v36, %s3466_s20  ;;  %v2403_v12 = vmul.f32 %v2386_v30, %v4760_v7  ;;  %v2208_v7 = vmul.f32 %v5350_v13, %v4792_v51  ;;  %v2217_v51 = vmul.f32 %v5350_v13, %v2167_v17 }
 0x53c   : > { %2281 = vrot.lane.b32.xlu2 %v4463_v34, %s3467_s21 }
 0x53d   : > { %v4841_v2 = vpop.permute.xlu1 %2776  ;;  %v2261_v23 = vrot.slane %v2217_v51, 4  ;;  %v2869_v51 = vld [vmem:[#allocation5 + $0x228] sm:$0xff] }
 0x53e   : > { %v2797_v62 = vsel %vm406_vm1, %v2775_v52, %v4841_v2  ;;  %v4845_v1 = vpop.permute.xlu2 %2439  ;;  %v2678_v52 = vld [vmem:[#allocation3 + $0x30] sm:$0xf] }
 0x53f   : > { %2829 = vst [vmem:[#allocation5 + $0x1f0] sm:$0xf] %v2797_v62 }
 0x543   : > { %2283 = vrot.lane.b32.xlu0 %v4467_v16, %s3467_s21  ;;  %2592 = vrot.lane.b32.xlu1 %v2559_v50, %s3472_s26  ;;  %v2166_v16 = vld [vmem:[#allocation3 + $0x78] sm:$0xf]  ;;  %v2190_v50 = vsel %vm753_vm4, %v4479_v60, %v5350_v13 }
 0x544   : > { %2447 = vrot.lane.b32.xlu2 %v2404_v40, %s3466_s20  ;;  %v4879_v37 = vmul.f32 %v3447_v49, %v2190_v50  ;;  %v2216_v60 = vmul.f32 %v2190_v50, %v2166_v16  ;;  %v2385_v16 = vsel %vm652_vm5, %v4717_v22, %v4767_v5 }
 0x545   : > { %v4859_v34 = vpop.permute.xlu1 %2758  ;;  %v2458_v14 = vpop.permute.xlu0 %2457  ;;  %v2411_v50 = vmul.f32 %v2385_v16, %v2361_v3 }
 0x546   : > { %v2789_v53 = vsel %vm406_vm1, %v2757_v24, %v4859_v34  ;;  %v2479_v57 = vsel %vm594_vm2, %v4813_v48, %v2458_v14  ;;  %v4865_v26 = vpop.permute.xlu2 %2752  ;;  %v2942_v4 = vld [vmem:[#allocation5 + $0x1f0] sm:$0xf]  ;;  %v2728_v24 = vmul.f32 %v4711_v27, %v2678_v52  ;;  %v2243_v59 = vrot.slane %v4879_v37, 4 }
 0x547   : > { %v4874_v6 = vsel %vm406_vm1, %v4865_v26, %v4787_v45  ;;  %3405 = vmatpush.msk.msra.mxu3 %vm389_vm0, %v2942_v4  ;;  %2511 = vst [vmem:[#allocation5 + $0x260] sm:$0xf] %v2479_v57  ;;  %v4884_v45 = vld [vmem:[#allocation3 + $0x80] sm:$0xff]  ;;  %v2259_v15 = vrot.slane %v2216_v60, 4  ;;  %v2164_v57 = vld [vmem:[#allocation3 + $0x30] sm:$0xf]  ;;  %v2188_v4 = vsel %vm753_vm4, %v5348_v55, %v5349_v9 }
 0x548   : > { %v2558_v33 = vrot.slane %v4884_v45, 4  ;;  %v2719_v40 = vmul.f32 %v4711_v27, %v4884_v45 }
 0x549   : > { %3038 = vmatpush.msra.mxu3 %v2789_v53  ;;  %v2260_v32 = vsel %vm389_vm0, %v2243_v59, %v2259_v15 }
 0x54b   : > { %2449 = vrot.lane.b32.xlu0 %v2405_v25, %s3466_s20  ;;  %2778 = vrot.lane.b32.xlu1 %v2728_v24, %s3465_s17  ;;  %v2214_v24 = vmul.f32 %v2188_v4, %v2164_v57  ;;  %v2402_v25 = vmul.f32 %v2385_v16, %v4884_v45  ;;  %v2886_v57 = vld [vmem:[#allocation5 + $0x1e0] sm:$0xff] }
 0x54c   : > { %2293 = vrot.lane.b32.xlu2 %v2258_v46, %s3467_s21 }
 0x54d   : > { %v4887_v47 = vpop.permute.xlu1 %2606  ;;  %v2587_v38 = vpop.permute.xlu0 %2586  ;;  %v2255_v49 = vrot.slane %v2214_v24, 4  ;;  %v2854_v24 = vld [vmem:[#allocation5 + $0xa0] sm:$0xff] }
 0x54e   : > { %v2627_v10 = vsel %vm1060_vm8, %v4815_v20, %v4887_v47  ;;  %v2618_v44 = vsel %vm1060_vm8, %v4826_v29, %v2587_v38  ;;  %v4895_v11 = vpop.permute.xlu2 %2784  ;;  %v2573_v20 = vsel %vm389_vm0, %v2558_v33, %v2572_v63 }
 0x54f   : > { %3039 = vmatpush.msra.mxu3 %v2627_v10  ;;  %2650 = vst [vmem:[#allocation5 + $0x260] sm:$0xf0] %v2618_v44 }
 0x553   : > { %2295 = vrot.lane.b32.xlu0 %v2260_v32, %s3467_s21  ;;  %2445 = vrot.lane.b32.xlu1 %v2403_v12, %s3466_s20 }
 0x554   : > { %2608 = vrot.lane.b32.xlu2 %v2573_v20, %s3472_s26 }
 0x555   : > { %v2771_v18 = vpop.permute.xlu0 %2770  ;;  %v4908_v19 = vpop.permute.xlu1 %2459 }
 0x556   : > { %v2794_v56 = vsel %vm406_vm1, %v4835_v39, %v2771_v18  ;;  %v2795_v30 = vsel %vm406_vm1, %v2771_v18, %v4776_v28  ;;  %v2480_v36 = vsel %vm594_vm2, %v2458_v14, %v4908_v19  ;;  %v4918_v62 = vpop.permute.xlu2 %2289  ;;  %v2917_v0 = vld [vmem:[#allocation5 + $0x260] sm:$0xff]  ;;  %v2244_v39 = vrot.slane %v2208_v7, 4  ;;  %v2885_v7 = vld [vmem:[#allocation5 + $0x238] sm:$0xff] }
 0x557   : > { %2826 = vst [vmem:[#allocation5 + $0x1e8] sm:$0xf] %v2794_v56  ;;  %3020 = vmatpush.msra.mxu2 %v2917_v0 }
 0x558   : > { %2827 = vst [vmem:[#allocation5 + $0x320] sm:$0xf] %v2795_v30  ;;  %v2262_v55 = vsel %vm389_vm0, %v2244_v39, %v2261_v23  ;;  %v2845_v23 = vld [vmem:[#allocation5 + $0x338] sm:$0xff] }
 0x559   : > { %2512 = vst [vmem:[#allocation5 + $0x358] sm:$0xf] %v2480_v36 }
 0x55b   : > { %2275 = vrot.lane.b32.xlu0 %v2242_v42, %s3467_s21  ;;  %2760 = vrot.lane.b32.xlu1 %v2719_v40, %s3465_s17  ;;  %v3448_v42 = vld [vmem:[#allocation3 + $0x80] sm:$0xff] }
 0x55c   : > { %2279 = vrot.lane.b32.xlu2 %v2244_v39, %s3467_s21  ;;  %v2205_v35 = vmul.f32 %v3448_v42, %v2188_v4 }
 0x55d   : > { %v4926_v28 = vpop.permute.xlu1 %2588  ;;  %v4928_v21 = vpop.permute.xlu0 %2441 }
 0x55e   : > { %v2619_v14 = vsel %vm1060_vm8, %v2587_v38, %v4926_v28  ;;  %v2472_v27 = vsel %vm594_vm2, %v4845_v1, %v4928_v21  ;;  %v4935_v52 = vpop.permute.xlu2 %2762  ;;  %v2939_v53 = vld [vmem:[#allocation5 + $0x1e8] sm:$0xf]  ;;  %v2241_v9 = vrot.slane %v2205_v35, 4 }
 0x55f   : > { %2651 = vst [vmem:[#allocation5 + $0x358] sm:$0xf0] %v2619_v14  ;;  %3399 = vmatpush.msk.msra.mxu0 %vm389_vm0, %v2939_v53  ;;  %v2940_v13 = vld [vmem:[#allocation5 + $0x320] sm:$0xf]  ;;  %v2837_v14 = vld [vmem:[#allocation5 + $0x70] sm:$0xff]  ;;  %v2862_v35 = vld [vmem:[#allocation5 + $0x28] sm:$0xff] }
 0x560   : > { %3401 = vmatpush.msk.msra.mxu1 %vm389_vm0, %v2940_v13  ;;  %v2256_v38 = vsel %vm389_vm0, %v2241_v9, %v2255_v49 }
 0x562   : > { %2998 = vmatpush.msra.mxu1 %v4874_v6 }
 0x563   : > { %2297 = vrot.lane.b32.xlu1 %v2262_v55, %s3467_s21  ;;  %2461 = vrot.lane.b32.xlu0 %v2411_v50, %s3466_s20  ;;  %v2870_v50 = vld [vmem:[#allocation5 + $0x200] sm:$0xff] }
 0x564   : > { %2443 = vrot.lane.b32.xlu2 %v2402_v25, %s3466_s20  ;;  %v2846_v25 = vld [vmem:[#allocation5 + $0x270] sm:$0xff] }
 0x565   : > { %v4951_v22 = vpop.permute.xlu1 %2437  ;;  %v4953_v5 = vpop.permute.xlu0 %2780 }
 0x566   : > { %v2471_v60 = vsel %vm594_vm2, %v4951_v22, %v4845_v1  ;;  %v2270_v46 = vpop.permute.xlu2 %2269  ;;  %v2918_v6 = vld [vmem:[#allocation5 + $0x358] sm:$0xff] }
 0x567   : > { %v2301_v54 = vsel %vm694_vm3, %v4662_v61, %v2270_v46  ;;  %3040 = vmatpush.msra.mxu3 %v2918_v6  ;;  %3021 = vmatpush.msra.mxu2 %v2471_v60  ;;  %v2129_v61 = vld [vmem:[#allocation3 + $0x28] sm:$0xf]  ;;  %v2838_v6 = vld [vmem:[#allocation5 + $0x160] sm:$0xff] }
 0x568   : > { %2333 = vst [vmem:[#allocation5 + $0x98] sm:$0xf0] %v2301_v54 }
 0x569   : > { %3041 = vmatpush.msra.mxu3 %v2472_v27  ;;  %2145 = vst [vmem:[#allocation5 + $0x288] sm:$0xf] %v2129_v61 }
 0x56b   : > { %2277 = vrot.lane.b32.xlu1 %v2243_v59, %s3467_s21  ;;  %2291 = vrot.lane.b32.xlu0 %v2256_v38, %s3467_s21 }
 0x56d   : > { %v2751_v15 = vpop.permute.xlu1 %2750  ;;  %v4965_v10 = vpop.permute.xlu0 %2285 }
 0x56e   : > { %v2786_v1 = vsel %vm406_vm1, %v2751_v15, %v4865_v26  ;;  %v2454_v44 = vpop.permute.xlu2 %2453 }
 0x56f   : > { %v2478_v41 = vsel %vm594_vm2, %v2454_v44, %v4813_v48  ;;  %2978 = vmatpush.msra.mxu0 %v2786_v1 }
 0x570   : > { %2510 = vst [vmem:[#allocation5 + $0xb8] sm:$0xf] %v2478_v41 }
 0x573   : > { %2590 = vrot.lane.b32.xlu1 %v2558_v33, %s3472_s26 }
 0x575   : > { %v2783_v37 = vpop.permute.xlu1 %2782  ;;  %v2599_v59 = vpop.permute.xlu0 %2598 }
 0x576   : > { %v2800_v63 = vsel %vm406_vm1, %v4953_v5, %v2783_v37  ;;  %v2801_v26 = vsel %vm406_vm1, %v2783_v37, %v4895_v11  ;;  %v4978_v12 = vpop.permute.xlu2 %2610  ;;  %v2893_v11 = vld [vmem:[#allocation5 + $0x98] sm:$0xff] }
 0x577   : > { %2832 = vst [vmem:[#allocation5 + $0x10] sm:$0xf] %v2800_v63 }
 0x578   : > { %2833 = vst [vmem:[#allocation5 + $0x268] sm:$0xf] %v2801_v26 }
 0x57b   : > { %2273 = vrot.lane.b32.xlu1 %v2241_v9, %s3467_s21 }
 0x57d   : > { %v2288_v48 = vpop.permute.xlu1 %2287  ;;  %v2765_v32 = vpop.permute.xlu0 %2764 }
 0x57e   : > { %v2309_v45 = vsel %vm694_vm3, %v4965_v10, %v2288_v48  ;;  %v2310_v33 = vsel %vm694_vm3, %v2288_v48, %v4918_v62  ;;  %v2792_v20 = vsel %vm406_vm1, %v4935_v52, %v2765_v32  ;;  %v2434_v18 = vpop.permute.xlu2 %2433  ;;  %v2945_v53 = vld [vmem:[#allocation5 + $0x10] sm:$0xf] }
 0x57f   : > { %3022 = vmatpush.msra.mxu2 %v2309_v45  ;;  %3042 = vmatpush.msra.mxu3 %v2310_v33  ;;  %v2946_v15 = vld [vmem:[#allocation5 + $0x268] sm:$0xf] }
 0x581   : > { %3023 = vmatpush.msra.mxu2 %v2893_v11 }
 0x583   : > { %3024 = vmatpush.msra.mxu2 %v2885_v7 }
 0x585   : > { %v2601_v56 = vpop.permute.xlu1 %2600  ;;  %v4987_v30 = vpop.permute.xlu0 %2271  ;;  %3025 = vmatpush.msra.mxu2 %v4643_v58 }
 0x586   : > { %v2624_v36 = vsel %vm1060_vm8, %v2599_v59, %v2601_v56  ;;  %v2625_v17 = vsel %vm1060_vm8, %v2601_v56, %v4802_v8  ;;  %v2302_v0 = vsel %vm694_vm3, %v2270_v46, %v4987_v30  ;;  %v4995_v40 = vpop.permute.xlu2 %2465 }
 0x587   : > { %2979 = vmatpush.msra.mxu0 %v2624_v36  ;;  %2999 = vmatpush.msra.mxu1 %v2625_v17  ;;  %2334 = vst [vmem:[#allocation5 + $0x288] sm:$0xf0] %v2302_v0  ;;  %v2892_v17 = vld [vmem:[#allocation5 + $0x2f8] sm:$0xff]  ;;  %v2883_v0 = vld [vmem:[#allocation5 + $0x170] sm:$0xff] }
 0x588   : > { %3026 = vmatpush.msra.mxu2 %v2869_v51 }
 0x58a   : > { %3027 = vmatpush.msra.mxu2 %v4624_v31  ;;  %v3449_v31 = vld [vmem:[#allocation5 + $0x2b0] sm:$0xff] }
 0x58c   : > { %3028 = vmatpush.msra.mxu2 %v4577_v43 }
 0x58d   : > { %v2767_v58 = vpop.permute.xlu1 %2766  ;;  %v2581_v39 = vpop.permute.xlu0 %2580 }
 0x58e   : > { %v2793_v3 = vsel %vm406_vm1, %v2765_v32, %v2767_v58  ;;  %v5000_v8 = vpop.permute.xlu2 %2594  ;;  %3029 = vmatpush.msra.mxu2 %v2845_v23  ;;  %v2894_v27 = vld [vmem:[#allocation5 + $0x288] sm:$0xff] }
 0x58f   : > { %3043 = vmatpush.msra.mxu3 %v2894_v27  ;;  %v2867_v27 = vld [vmem:[#allocation5 + $0x1b0] sm:$0xff] }
 0x590   : > { %3030 = vmatpush.msra.mxu2 %v2837_v14 }
 0x591   : > { %3044 = vmatpush.msra.mxu3 %v2886_v57  ;;  %v2868_v57 = vld [vmem:[#allocation5 + $0x1d0] sm:$0xff] }
 0x592   : > { %3411 = vmatpush.msk.msrb.mxu2 %vm389_vm0, %v2945_v53 }
 0x593   : > { %3045 = vmatpush.msra.mxu3 %v3449_v31 }
 0x594   : > { %3098 = vmatpush.msrb.mxu2 %v2792_v20 }
 0x595   : > { %v2452_v43 = vpop.permute.xlu1 %2451  ;;  %v2613_v4 = vpop.permute.xlu0 %2612  ;;  %3046 = vmatpush.msra.mxu3 %v2870_v50  ;;  %v2844_v50 = vld [vmem:[#allocation5 + $0x210] sm:$0xff] }
 0x596   : > { %v2477_v16 = vsel %vm594_vm2, %v2452_v43, %v2454_v44  ;;  %v2630_v13 = vsel %vm1060_vm8, %v4978_v12, %v2613_v4  ;;  %v2282_v42 = vpop.permute.xlu2 %2281  ;;  %v2859_v43 = vld [vmem:[#allocation5 + $0x50] sm:$0xff] }
 0x597   : > { %2509 = vst [vmem:[#allocation5 + $0x130] sm:$0xf] %v2477_v16  ;;  %3099 = vmatpush.msrb.mxu2 %v2630_v13  ;;  %3047 = vmatpush.msra.mxu3 %v2862_v35  ;;  %v2843_v16 = vld [vmem:[#allocation5 + $0x118] sm:$0xff] }
 0x599   : > { %3048 = vmatpush.msra.mxu3 %v2854_v24 }
 0x59b   : > { %3049 = vmatpush.msra.mxu3 %v2846_v25  ;;  %v2835_v25 = vld [vmem:[#allocation5 + $0x68] sm:$0xff] }
 0x59d   : > { %v2583_v55 = vpop.permute.xlu1 %2582  ;;  %v2436_v9 = vpop.permute.xlu0 %2435  ;;  %3050 = vmatpush.msra.mxu3 %v2838_v6 }
 0x59e   : > { %v2616_v49 = vsel %vm1060_vm8, %v2581_v39, %v2583_v55  ;;  %v2617_v60 = vsel %vm1060_vm8, %v2583_v55, %v4826_v29  ;;  %v2469_v46 = vsel %vm594_vm2, %v2434_v18, %v2436_v9  ;;  %v5010_v54 = vpop.permute.xlu2 %2447  ;;  %v2470_v38 = vsel %vm594_vm2, %v2436_v9, %v4951_v22  ;;  %v2876_v39 = vld [vmem:[#allocation5 + $0x300] sm:$0xff]  ;;  %v2836_v55 = vld [vmem:[#allocation5 + $0x350] sm:$0xff] }
 0x59f   : > { %2648 = vst [vmem:[#allocation5 + $0x130] sm:$0xf0] %v2616_v49  ;;  %3413 = vmatpush.msk.msrb.mxu3 %vm389_vm0, %v2946_v15  ;;  %v2132_v49 = vld [vmem:[#allocation3 + $0x60] sm:$0xf] }
 0x5a0   : > { %2649 = vst [vmem:[#allocation5 + $0xb8] sm:$0xf0] %v2617_v60 }
 0x5a1   : > { %3118 = vmatpush.msrb.mxu3 %v2793_v3  ;;  %2148 = vst [vmem:[#allocation5 + $0x1a0] sm:$0xf] %v2132_v49 }
 0x5a5   : > { %v2615_v1 = vpop.permute.xlu1 %2614  ;;  %v2468_v44 = vpop.permute.xlu0 %2467 }
 0x5a6   : > { %v2631_v61 = vsel %vm1060_vm8, %v2613_v4, %v2615_v1  ;;  %v2484_v29 = vsel %vm594_vm2, %v4995_v40, %v2468_v44  ;;  %v5018_v41 = vpop.permute.xlu2 %2293  ;;  %v2915_v37 = vld [vmem:[#allocation5 + $0x130] sm:$0xff]  ;;  %v2852_v4 = vld [vmem:[#allocation5 + $0x1f8] sm:$0xff] }
 0x5a7   : > { %2980 = vmatpush.msra.mxu0 %v2915_v37  ;;  %v2916_v59 = vld [vmem:[#allocation5 + $0xb8] sm:$0xff]  ;;  %3119 = vmatpush.msrb.mxu3 %v2631_v61  ;;  %2516 = vst [vmem:[#allocation5 + $0x30] sm:$0xf] %v2484_v29 }
 0x5a8   : > { %3000 = vmatpush.msra.mxu1 %v2916_v59  ;;  %v5078_v59 = vld [vmem:[%s5324_s3] sm:$0xff] }
 0x5a9   : > { %2981 = vmatpush.msra.mxu0 %v2469_v46  ;;  %v2133_v46 = vld [vmem:[#allocation3 + $0x78] sm:$0xf]  ;;  %3404 = vmatmul.msk.f32.vlgmr.msra.gmra.mxu2 %vm2947_vm10, %v5078_v59 }
 0x5aa   : > { %3001 = vmatpush.msra.mxu1 %v2470_v38  ;;  %2149 = vst [vmem:[#allocation5 + $0x108] sm:$0xf] %v2133_v46  ;;  %3406 = vmatmul.msk.f32.vlgmr.msra.gmra.mxu3 %vm2947_vm10, %v5078_v59 }
 0x5ad   : > { %v2597_v22 = vpop.permute.xlu0 %2596  ;;  %v5020_v63 = vpop.permute.xlu1 %2463 }
 0x5ae   : > { %v2623_v26 = vsel %vm1060_vm8, %v5000_v8, %v2597_v22  ;;  %v2483_v48 = vsel %vm594_vm2, %v5020_v63, %v4995_v40  ;;  %v2609_v32 = vpop.permute.xlu2 %2608  ;;  %v2884_v40 = vld [vmem:[#allocation5 + $0x120] sm:$0xff] }
 0x5af   : > { %2655 = vst [vmem:[#allocation5 + $0x30] sm:$0xf0] %v2623_v26  ;;  %v5029_v45 = vsel %vm1060_vm8, %v4887_v47, %v2609_v32  ;;  %v5033_v33 = vsel %vm1060_vm8, %v2609_v32, %v4978_v12  ;;  %v2891_v12 = vld [vmem:[#allocation5 + $0x280] sm:$0xff] }
 0x5b0   : > { %2515 = vst [vmem:[#allocation5 + $0x248] sm:$0xf] %v2483_v48 }
 0x5b5   : > { %v2284_v20 = vpop.permute.xlu0 %2283  ;;  %v5035_v18 = vpop.permute.xlu1 %2592 }
 0x5b6   : > { %v2307_v11 = vsel %vm694_vm3, %v2282_v42, %v2284_v20  ;;  %v2308_v7 = vsel %vm694_vm3, %v2284_v20, %v4965_v10  ;;  %v2622_v56 = vsel %vm1060_vm8, %v5035_v18, %v5000_v8  ;;  %v5043_v36 = vpop.permute.xlu2 %2279  ;;  %v2922_v47 = vld [vmem:[#allocation5 + $0x30] sm:$0xff] }
 0x5b7   : > { %3120 = vmatpush.msrb.mxu3 %v2922_v47  ;;  %2982 = vmatpush.msra.mxu0 %v2307_v11  ;;  %2654 = vst [vmem:[#allocation5 + $0x248] sm:$0xf0] %v2622_v56  ;;  %v2875_v10 = vld [vmem:[#allocation5 + $0x2f0] sm:$0xff]  ;;  %v2889_v56 = vld [vmem:[#allocation5 + $0x40] sm:$0xff]  ;;  %v2873_v47 = vld [vmem:[#allocation5 + $0x148] sm:$0xff] }
 0x5b8   : > { %3002 = vmatpush.msra.mxu1 %v2308_v7 }
 0x5b9   : > { %2983 = vmatpush.msra.mxu0 %v2891_v12 }
 0x5ba   : > { %3003 = vmatpush.msra.mxu1 %v2892_v17 }
 0x5bb   : > { %2984 = vmatpush.msra.mxu0 %v2883_v0 }
 0x5bc   : > { %3004 = vmatpush.msra.mxu1 %v2884_v40  ;;  %v2865_v40 = vld [vmem:[#allocation5 + $0x8] sm:$0xff] }
 0x5bd   : > { %v2450_v51 = vpop.permute.xlu0 %2449  ;;  %v2779_v58 = vpop.permute.xlu1 %2778  ;;  %2985 = vmatpush.msra.mxu0 %v2875_v10 }
 0x5be   : > { %v2476_v23 = vsel %vm594_vm2, %v5010_v54, %v2450_v51  ;;  %v2798_v3 = vsel %vm406_vm1, %v4841_v2, %v2779_v58  ;;  %v2799_v8 = vsel %vm406_vm1, %v2779_v58, %v4953_v5  ;;  %v2444_v14 = vpop.permute.xlu2 %2443  ;;  %3005 = vmatpush.msra.mxu1 %v2876_v39  ;;  %v2921_v31 = vld [vmem:[#allocation5 + $0x248] sm:$0xff]  ;;  %v2860_v2 = vld [vmem:[#allocation5 + $0x78] sm:$0xff]  ;;  %v2866_v51 = vld [vmem:[#allocation5 + $0x290] sm:$0xff] }
 0x5bf   : > { %v5053_v53 = vsel %vm594_vm2, %v4928_v21, %v2444_v14  ;;  %2986 = vmatpush.msra.mxu0 %v2867_v27  ;;  %3121 = vmatpush.msrb.mxu3 %v2476_v23  ;;  %2830 = vst [vmem:[#allocation5 + $0x38] sm:$0xf] %v2798_v3  ;;  %v2851_v5 = vld [vmem:[#allocation5 + $0x218] sm:$0xff]  ;;  %v2858_v39 = vld [vmem:[#allocation5 + $0x328] sm:$0xff]  ;;  %v2850_v23 = vld [vmem:[#allocation5 + $0x190] sm:$0xff] }
 0x5c0   : > { %3006 = vmatpush.msra.mxu1 %v2868_v57  ;;  %2831 = vst [vmem:[#allocation5 + $0xb0] sm:$0xf] %v2799_v8  ;;  %3100 = vmatpush.msrb.mxu2 %v2921_v31  ;;  %v2857_v58 = vld [vmem:[#allocation5 + $0x2d8] sm:$0xff]  ;;  %v2842_v8 = vld [vmem:[#allocation5 + $0x240] sm:$0xff] }
 0x5c1   : > { %2987 = vmatpush.msra.mxu0 %v2859_v43  ;;  %v2841_v3 = vld [vmem:[#allocation5 + $0x138] sm:$0xff]  ;;  %v2888_v57 = vld [vmem:[#allocation5 + $0x220] sm:$0xff] }
 0x5c2   : > { %3007 = vmatpush.msra.mxu1 %v2860_v2  ;;  %v2879_v31 = vld [vmem:[#allocation5 + $0x140] sm:$0xff]  ;;  %v2880_v43 = vld [vmem:[#allocation5 + $0x258] sm:$0xff] }
 0x5c3   : > { %2988 = vmatpush.msra.mxu0 %v2851_v5  ;;  %v2871_v2 = vld [vmem:[#allocation5 + $0x2c0] sm:$0xff]  ;;  %v2872_v5 = vld [vmem:[#allocation5 + $0x128] sm:$0xff] }
 0x5c4   : > { %3008 = vmatpush.msra.mxu1 %v2852_v4  ;;  %v2863_v4 = vld [vmem:[#allocation5 + $0x230] sm:$0xff] }
 0x5c5   : > { %v2296_v13 = vpop.permute.xlu0 %2295  ;;  %v2446_v21 = vpop.permute.xlu1 %2445  ;;  %2989 = vmatpush.msra.mxu0 %v2843_v16  ;;  %v2864_v16 = vld [vmem:[#allocation5 + $0x360] sm:$0xff] }
 0x5c6   : > { %v2313_v42 = vsel %vm694_vm3, %v5018_v41, %v2296_v13  ;;  %v5058_v35 = vsel %vm594_vm2, %v2444_v14, %v2446_v21  ;;  %v2475_v24 = vsel %vm594_vm2, %v2446_v21, %v5010_v54  ;;  %3009 = vmatpush.msra.mxu1 %v2844_v50  ;;  %v2943_v9 = vld [vmem:[#allocation5 + $0x38] sm:$0xf]  ;;  %v2856_v21 = vld [vmem:[#allocation5 + $0x100] sm:$0xff]  ;;  %v2847_v50 = vld [vmem:[#allocation5 + $0x1c8] sm:$0xff] }
 0x5c7   : > { %2990 = vmatpush.msra.mxu0 %v2835_v25  ;;  %3101 = vmatpush.msrb.mxu2 %v2475_v24  ;;  %v2944_v60 = vld [vmem:[#allocation5 + $0xb0] sm:$0xf]  ;;  %v2840_v24 = vld [vmem:[#allocation5 + $0xd8] sm:$0xff] }
 0x5c8   : > { %3010 = vmatpush.msra.mxu1 %v2836_v55  ;;  %3400 = vmatmul.msk.f32.vlgmr.msra.gmra.mxu0 %vm2947_vm10, %v5078_v59 }
 0x5c9   : > { %3407 = vmatpush.msk.msrb.mxu0 %vm389_vm0, %v2943_v9  ;;  %3102 = vmatpush.msrb.mxu2 %v2313_v42  ;;  %v2848_v42 = vld [vmem:[#allocation5 + $0xc8] sm:$0xff] }
 0x5ca   : > { %3409 = vmatpush.msk.msrb.mxu1 %vm389_vm0, %v2944_v60 }
 0x5cb   : > { %3402 = vmatmul.msk.f32.vlgmr.msra.gmra.mxu1 %vm2947_vm10, %v5078_v59 }
 0x5cd   : > { %v2276_v6 = vpop.permute.xlu0 %2275  ;;  %v2761_v38 = vpop.permute.xlu1 %2760 }
 0x5ce   : > { %v2790_v54 = vsel %vm406_vm1, %v4859_v34, %v2761_v38  ;;  %v2791_v15 = vsel %vm406_vm1, %v2761_v38, %v4935_v52  ;;  %v2130_v34 = vld [vmem:[#allocation3 + $0x50] sm:$0xf] }
 0x5cf   : > { %3058 = vmatpush.msrb.mxu0 %v2790_v54  ;;  %3078 = vmatpush.msrb.mxu1 %v2791_v15  ;;  %v2131_v52 = vld [vmem:[#allocation3 + $0x30] sm:$0xf]  ;;  %2146 = vst [vmem:[#allocation5 + $0x318] sm:$0xf] %v2130_v34 }
 0x5d0   : > { %2147 = vst [vmem:[#allocation5 + $0x298] sm:$0xf] %v2131_v52 }
 0x5d1   : > { %3059 = vmatpush.msrb.mxu0 %v5029_v45  ;;  %3079 = vmatpush.msrb.mxu1 %v5033_v33 }
 0x5d5   : > { %v2298_v1 = vpop.permute.xlu1 %2297  ;;  %v2462_v44 = vpop.permute.xlu0 %2461 }
 0x5d6   : > { %v2314_v61 = vsel %vm694_vm3, %v2296_v13, %v2298_v1  ;;  %v2481_v29 = vsel %vm594_vm2, %v4908_v19, %v2462_v44  ;;  %v2482_v37 = vsel %vm594_vm2, %v2462_v44, %v5020_v63  ;;  %v2855_v13 = vld [vmem:[#allocation5 + $0x1c0] sm:$0xff] }
 0x5d7   : > { %3122 = vmatpush.msrb.mxu3 %v2314_v61  ;;  %2513 = vst [vmem:[#allocation5 + $0x150] sm:$0xf] %v2481_v29 }
 0x5d8   : > { %2514 = vst [vmem:[#allocation5 + $0x2e0] sm:$0xf] %v2482_v37 }
 0x5dd   : > { %v2278_v19 = vpop.permute.xlu1 %2277  ;;  %v2292_v22 = vpop.permute.xlu0 %2291 }
 0x5de   : > { %v2305_v63 = vsel %vm694_vm3, %v2276_v6, %v2278_v19  ;;  %v2306_v26 = vsel %vm694_vm3, %v2278_v19, %v5043_v36  ;;  %v2311_v48 = vsel %vm694_vm3, %v4918_v62, %v2292_v22  ;;  %v2312_v32 = vsel %vm694_vm3, %v2292_v22, %v5018_v41  ;;  %v2890_v62 = vld [vmem:[#allocation5 + $0x250] sm:$0xff]  ;;  %v2881_v36 = vld [vmem:[#allocation5 + $0x180] sm:$0xff] }
 0x5df   : > { %2337 = vst [vmem:[#allocation5 + $0x1a0] sm:$0xf0] %v2305_v63  ;;  %v2882_v41 = vld [vmem:[#allocation5 + $0x110] sm:$0xff] }
 0x5e0   : > { %2338 = vst [vmem:[#allocation5 + $0x108] sm:$0xf0] %v2306_v26 }
 0x5e5   : > { %v2591_v45 = vpop.permute.xlu1 %2590 }
 0x5e6   : > { %v2620_v33 = vsel %vm1060_vm8, %v4926_v28, %v2591_v45  ;;  %v2621_v20 = vsel %vm1060_vm8, %v2591_v45, %v5035_v18  ;;  %v2897_v11 = vld [vmem:[#allocation5 + $0x1a0] sm:$0xff]  ;;  %v2874_v28 = vld [vmem:[#allocation5 + $0xf0] sm:$0xff] }
 0x5e7   : > { %2652 = vst [vmem:[#allocation5 + $0x150] sm:$0xf0] %v2620_v33  ;;  %3103 = vmatpush.msrb.mxu2 %v2897_v11  ;;  %v2898_v7 = vld [vmem:[#allocation5 + $0x108] sm:$0xff] }
 0x5e8   : > { %2653 = vst [vmem:[#allocation5 + $0x2e0] sm:$0xf0] %v2621_v20  ;;  %3123 = vmatpush.msrb.mxu3 %v2898_v7 }
 0x5e9   : > { %3104 = vmatpush.msrb.mxu2 %v2889_v56 }
 0x5ea   : > { %3124 = vmatpush.msrb.mxu3 %v2890_v62 }
 0x5eb   : > { %3105 = vmatpush.msrb.mxu2 %v2881_v36 }
 0x5ec   : > { %3125 = vmatpush.msrb.mxu3 %v2882_v41 }
 0x5ed   : > { %v2274_v12 = vpop.permute.xlu1 %2273  ;;  %3106 = vmatpush.msrb.mxu2 %v2873_v47 }
 0x5ee   : > { %v2303_v18 = vsel %vm694_vm3, %v4987_v30, %v2274_v12  ;;  %v2304_v17 = vsel %vm694_vm3, %v2274_v12, %v2276_v6  ;;  %3126 = vmatpush.msrb.mxu3 %v2874_v28  ;;  %v2919_v0 = vld [vmem:[#allocation5 + $0x150] sm:$0xff]  ;;  %v2849_v30 = vld [vmem:[#allocation5 + $0x58] sm:$0xff] }
 0x5ef   : > { %2335 = vst [vmem:[#allocation5 + $0x318] sm:$0xf0] %v2303_v18  ;;  %3060 = vmatpush.msrb.mxu0 %v2919_v0  ;;  %v2920_v10 = vld [vmem:[#allocation5 + $0x2e0] sm:$0xff]  ;;  %3107 = vmatpush.msrb.mxu2 %v2865_v40 }
 0x5f0   : > { %2336 = vst [vmem:[#allocation5 + $0x298] sm:$0xf0] %v2304_v17  ;;  %3080 = vmatpush.msrb.mxu1 %v2920_v10  ;;  %3127 = vmatpush.msrb.mxu3 %v2866_v51 }
 0x5f1   : > { %3061 = vmatpush.msrb.mxu0 %v5053_v53  ;;  %3108 = vmatpush.msrb.mxu2 %v2857_v58  ;;  %v2887_v53 = vld [vmem:[#allocation5 + $0x158] sm:$0xff] }
 0x5f2   : > { %3081 = vmatpush.msrb.mxu1 %v5058_v35  ;;  %3128 = vmatpush.msrb.mxu3 %v2858_v39  ;;  %v2839_v35 = vld [vmem:[#allocation5 + $0xd0] sm:$0xff] }
 0x5f3   : > { %3062 = vmatpush.msrb.mxu0 %v2311_v48  ;;  %3109 = vmatpush.msrb.mxu2 %v2849_v30 }
 0x5f4   : > { %3082 = vmatpush.msrb.mxu1 %v2312_v32  ;;  %3129 = vmatpush.msrb.mxu3 %v2850_v23 }
 0x5f5   : > { %3110 = vmatpush.msrb.mxu2 %v2841_v3 }
 0x5f6   : > { %3130 = vmatpush.msrb.mxu3 %v2842_v8  ;;  %v2895_v14 = vld [vmem:[#allocation5 + $0x318] sm:$0xff]  ;;  %3412 = vmatmul.msk.f32.vlgmr.msrb.gmra.mxu2 %vm2947_vm10, %v5078_v59 }
 0x5f7   : > { %3063 = vmatpush.msrb.mxu0 %v2895_v14  ;;  %v2896_v27 = vld [vmem:[#allocation5 + $0x298] sm:$0xff]  ;;  %3414 = vmatmul.msk.f32.vlgmr.msrb.gmra.mxu3 %vm2947_vm10, %v5078_v59 }
 0x5f8   : > { %3083 = vmatpush.msrb.mxu1 %v2896_v27 }
 0x5f9   : > { %3064 = vmatpush.msrb.mxu0 %v2887_v53 }
 0x5fa   : > { %3084 = vmatpush.msrb.mxu1 %v2888_v57 }
 0x5fb   : > { %3065 = vmatpush.msrb.mxu0 %v2879_v31 }
 0x5fc   : > { %3085 = vmatpush.msrb.mxu1 %v2880_v43 }
 0x5fd   : > { %3066 = vmatpush.msrb.mxu0 %v2871_v2 }
 0x5fe   : > { %3086 = vmatpush.msrb.mxu1 %v2872_v5 }
 0x5ff   : > { %3067 = vmatpush.msrb.mxu0 %v2863_v4 }
 0x600   : > { %3087 = vmatpush.msrb.mxu1 %v2864_v16 }
 0x601   : > { %3068 = vmatpush.msrb.mxu0 %v2855_v13 }
 0x602   : > { %3088 = vmatpush.msrb.mxu1 %v2856_v21 }
 0x603   : > { %3069 = vmatpush.msrb.mxu0 %v2847_v50 }
 0x604   : > { %3089 = vmatpush.msrb.mxu1 %v2848_v42 }
 0x605   : > { %3070 = vmatpush.msrb.mxu0 %v2839_v35 }
 0x606   : > { %3090 = vmatpush.msrb.mxu1 %v2840_v24  ;;  %3408 = vmatmul.msk.f32.vlgmr.msrb.gmra.mxu0 %vm2947_vm10, %v5078_v59 }
 0x607   : > { %3410 = vmatmul.msk.f32.vlgmr.msrb.gmra.mxu1 %vm2947_vm10, %v5078_v59 }
 0x62c   : > { %v3032_v9 = vpop.f32.mrf.mxu2 }
 0x62d   : > { %v3052_v49 = vpop.f32.mrf.mxu3  ;;  %3140 = vst [vmem:[%s3137_s16 + $0x10] sm:$0xff] %v3032_v9 }
 0x62e   : > { %3141 = vst [vmem:[%s3137_s16 + $0x18] sm:$0xff] %v3052_v49 }
 0x645   : > { %v2992_v25 = vpop.f32.mrf.mxu0 }
 0x646   : > { %3138 = vst [vmem:[%s3137_s16] sm:$0xff] %v2992_v25 }
 0x648   : > { %v3012_v55 = vpop.f32.mrf.mxu1 }
 0x649   : > { %3139 = vst [vmem:[%s3137_s16 + $0x8] sm:$0xff] %v3012_v55 }
 0x679   : > { %v3112_v60 = vpop.f32.mrf.mxu2 }
 0x67a   : > { %3144 = vst [vmem:[%s3137_s16 + $0x30] sm:$0xff] %v3112_v60  ;;  %v3132_v46 = vpop.f32.mrf.mxu3 }
 0x67b   : > { %3145 = vst [vmem:[%s3137_s16 + $0x38] sm:$0xff] %v3132_v46 }
 0x681   : > { %3149 = sbr.rel (%p3417_p5) target bundleno = 2116 (0x844), region = 60 }
 0x683   : > { %v3072_v6 = vpop.f32.mrf.mxu0 }
 0x684   : > { %3142 = vst [vmem:[%s3137_s16 + $0x20] sm:$0xff] %v3072_v6  ;;  %v3092_v38 = vpop.f32.mrf.mxu1 }
 0x685   : > { %3143 = vst [vmem:[%s3137_s16 + $0x28] sm:$0xff] %v3092_v38 }
 0x686   : > { %v3474_v40 = vmov 2048.0  }
 0x687   : > { %3452 = vrcp.f32 %v3474_v40 }
 0x68c   : > { %v5120_v54 = vld [vmem:[%s5329_s8] sm:$0xff]  ;;  %v5125_v15 = vld [vmem:[%s5329_s8 + $0x8] sm:$0xff]  ;;  %v5130_v1 = vld [vmem:[%s5329_s8 + $0x10] sm:$0xff] }
 0x68d   : > { %v5135_v44 = vld [vmem:[%s5329_s8 + $0x18] sm:$0xff]  ;;  %v5140_v61 = vld [vmem:[%s5329_s8 + $0x40] sm:$0xff]  ;;  %v5145_v29 = vld [vmem:[%s5329_s8 + $0x48] sm:$0xff]  ;;  %v3453_v10 = vpop.eup %3452 }
 0x68e   : > { %v5150_v37 = vld [vmem:[%s5329_s8 + $0x50] sm:$0xff]  ;;  %v5155_v34 = vld [vmem:[%s5329_s8 + $0x58] sm:$0xff]  ;;  %v3166_v52 = vadd.f32 %v5140_v61, %v5120_v54  ;;  %v3167_v59 = vadd.f32 %v5145_v29, %v5125_v15  ;;  %v5166_v22 = vld [vmem:[%s5329_s8 + $0x20] sm:$0xff]  ;;  %v3184_v51 = vmul.f32 2048.0, %v3453_v10  ;;  %vm3188_vm11 = vweird.f32 %v3453_v10 }
 0x68f   : > { %v3168_v19 = vadd.f32 %v5150_v37, %v5130_v1  ;;  %v5171_v63 = vld [vmem:[%s5329_s8 + $0x60] sm:$0xff]  ;;  %v3169_v26 = vadd.f32 %v5155_v34, %v5135_v44  ;;  %v5178_v32 = vld [vmem:[%s5329_s8 + $0x28] sm:$0xff]  ;;  %v5190_v11 = vld [vmem:[%s5329_s8 + $0x30] sm:$0xff] }
 0x690   : > { %v3174_v48 = vadd.f32 %v3167_v59, %v3166_v52  ;;  %v5183_v45 = vld [vmem:[%s5329_s8 + $0x68] sm:$0xff]  ;;  %v3170_v33 = vadd.f32 %v5171_v63, %v5166_v22  ;;  %v5195_v7 = vld [vmem:[%s5329_s8 + $0x70] sm:$0xff]  ;;  %v5202_v36 = vld [vmem:[%s5329_s8 + $0x38] sm:$0xff]  ;;  %v3185_v58 = vsub.f32 1.0, %v3184_v51 }
 0x691   : > { %v3171_v56 = vadd.f32 %v5183_v45, %v5178_v32  ;;  %v5207_v41 = vld [vmem:[%s5329_s8 + $0x78] sm:$0xff]  ;;  %v3172_v47 = vadd.f32 %v5195_v7, %v5190_v11 }
 0x692   : > { %v3175_v20 = vadd.f32 %v3174_v48, %v3168_v19  ;;  %v3173_v28 = vadd.f32 %v5207_v41, %v5202_v36  ;;  %v3186_v39 = vmul.f32 %v3453_v10, %v3185_v58 }
 0x694   : > { %v3176_v62 = vadd.f32 %v3175_v20, %v3169_v26  ;;  %v3187_v30 = vadd.f32 %v3453_v10, %v3186_v39 }
 0x696   : > { %v3177_v12 = vadd.f32 %v3176_v62, %v3170_v33  ;;  %v3189_v23 = vsel %vm3188_vm11, %v3453_v10, %v3187_v30 }
 0x698   : > { %v3178_v18 = vadd.f32 %v3177_v12, %v3171_v56 }
 0x69a   : > { %v3179_v17 = vadd.f32 %v3178_v18, %v3172_v47 }
 0x69c   : > { %v3180_v0 = vadd.f32 %v3179_v17, %v3173_v28 }
 0x69e   : > { %3181 = vadd.xlane.f32.xlu0 %v3180_v0 }
 0x711   : > { %v3182_v3 = vpop.xlane.xlu0 %3181 }
 0x712   : > { %v5213_v8 = vmul.f32 %v3189_v23, %v3182_v3 }
 0x714   : > { %v3191_v14 = vsub.f32 %v5120_v54, %v5213_v8  ;;  %v3192_v27 = vsub.f32 %v5125_v15, %v5213_v8  ;;  %v3193_v53 = vsub.f32 %v5130_v1, %v5213_v8  ;;  %v3199_v57 = vsub.f32 %v5140_v61, %v5213_v8 }
 0x715   : > { %v3200_v31 = vsub.f32 %v5145_v29, %v5213_v8  ;;  %v3201_v43 = vsub.f32 %v5150_v37, %v5213_v8  ;;  %v3194_v2 = vsub.f32 %v5135_v44, %v5213_v8  ;;  %v3202_v5 = vsub.f32 %v5155_v34, %v5213_v8 }
 0x716   : > { %v3207_v4 = vmul.f32 %v3191_v14, %v3191_v14  ;;  %v3208_v16 = vmul.f32 %v3192_v27, %v3192_v27  ;;  %v3195_v13 = vsub.f32 %v5166_v22, %v5213_v8  ;;  %v3203_v21 = vsub.f32 %v5171_v63, %v5213_v8 }
 0x717   : > { %v3209_v50 = vmul.f32 %v3193_v53, %v3193_v53  ;;  %v3215_v42 = vmul.f32 %v3199_v57, %v3199_v57  ;;  %v3216_v35 = vmul.f32 %v3200_v31, %v3200_v31  ;;  %v3217_v24 = vmul.f32 %v3201_v43, %v3201_v43 }
 0x718   : > { %v3196_v25 = vsub.f32 %v5178_v32, %v5213_v8  ;;  %v3204_v55 = vsub.f32 %v5183_v45, %v5213_v8  ;;  %v3210_v9 = vmul.f32 %v3194_v2, %v3194_v2  ;;  %v3218_v49 = vmul.f32 %v3202_v5, %v3202_v5 }
 0x719   : > { %v3223_v60 = vadd.f32 %v3215_v42, %v3207_v4  ;;  %v3224_v46 = vadd.f32 %v3216_v35, %v3208_v16  ;;  %v3197_v6 = vsub.f32 %v5190_v11, %v5213_v8  ;;  %v3205_v38 = vsub.f32 %v5195_v7, %v5213_v8  ;;  %v3254_v35 = vld [vmem:[%s5328_s7] sm:$0xff] }
 0x71a   : > { %v3211_v52 = vmul.f32 %v3195_v13, %v3195_v13  ;;  %v3219_v59 = vmul.f32 %v3203_v21, %v3203_v21  ;;  %v3225_v19 = vadd.f32 %v3217_v24, %v3209_v50  ;;  %v3198_v48 = vsub.f32 %v5202_v36, %v5213_v8  ;;  %v3241_v13 = vld [vmem:[%s5327_s6] sm:$0xff] }
 0x71b   : > { %v3231_v26 = vadd.f32 %v3224_v46, %v3223_v60  ;;  %v3206_v33 = vsub.f32 %v5207_v41, %v5213_v8  ;;  %v3212_v20 = vmul.f32 %v3196_v25, %v3196_v25  ;;  %v3220_v56 = vmul.f32 %v3204_v55, %v3204_v55 }
 0x71c   : > { %v3226_v62 = vadd.f32 %v3218_v49, %v3210_v9  ;;  %v3213_v12 = vmul.f32 %v3197_v6, %v3197_v6  ;;  %v3221_v28 = vmul.f32 %v3205_v38, %v3205_v38  ;;  %v3227_v18 = vadd.f32 %v3219_v59, %v3211_v52 }
 0x71d   : > { %v3232_v47 = vadd.f32 %v3231_v26, %v3225_v19  ;;  %v3214_v0 = vmul.f32 %v3198_v48, %v3198_v48  ;;  %v3222_v40 = vmul.f32 %v3206_v33, %v3206_v33  ;;  %v3228_v10 = vadd.f32 %v3220_v56, %v3212_v20 }
 0x71e   : > { %v3229_v58 = vadd.f32 %v3221_v28, %v3213_v12  ;;  %v3475_v27 = vmov 0  }
 0x71f   : > { %v3233_v17 = vadd.f32 %v3232_v47, %v3226_v62  ;;  %v3230_v30 = vadd.f32 %v3222_v40, %v3214_v0  ;;  %3450 = vset.pattern.permute.xlu1 %v3475_v27  ;;  %3451 = vset.pattern.permute.xlu0 %v3475_v27 }
 0x721   : > { %v3234_v51 = vadd.f32 %v3233_v17, %v3227_v18 }
 0x723   : > { %v3235_v39 = vadd.f32 %v3234_v51, %v3228_v10 }
 0x725   : > { %v3236_v3 = vadd.f32 %v3235_v39, %v3229_v58 }
 0x727   : > { %v3237_v14 = vadd.f32 %v3236_v3, %v3230_v30 }
 0x729   : > { %3238 = vadd.xlane.f32.xlu0 %v3237_v14 }
 0x79c   : > { %v3239_v53 = vpop.xlane.xlu0 %3238 }
 0x79d   : > { %v3240_v57 = vmul.f32 %v3239_v53, %v3189_v23 }
 0x79f   : > { %v3242_v31 = vadd.f32 1e-05, %v3240_v57 }
 0x7a1   : > { %3454 = vrsqrt.f32 %v3242_v31  ;;  %vm3249_vm13 = vweird.f32 %v3242_v31 }
 0x7a7   : > { %v3455_v43 = vpop.eup %3454 }
 0x7a8   : > { %v3244_v2 = vmul.f32 %v3455_v43, %v3242_v31  ;;  %vm3250_vm12 = vweird.f32 %v3455_v43 }
 0x7a9   : > { %vm3251_vm14 = vmor %vm3249_vm13, %vm3250_vm12 }
 0x7aa   : > { %v3245_v5 = vmul.f32 %v3455_v43, %v3244_v2 }
 0x7ac   : > { %v3246_v4 = vmul.f32 0.5, %v3245_v5 }
 0x7ae   : > { %v3247_v16 = vsub.f32 1.5, %v3246_v4 }
 0x7b0   : > { %v3248_v21 = vmul.f32 %v3455_v43, %v3247_v16 }
 0x7b2   : > { %v3252_v50 = vsel %vm3251_vm14, %v3455_v43, %v3248_v21 }
 0x7b3   : > { %v3253_v42 = vmul.f32 %v3252_v50, %v3241_v13 }
 0x7b5   : > { %3259 = vperm.xlu1 %3450, %v3253_v42   ;;  %v3255_v23 = vmul.f32 %v3253_v42, %v5213_v8 }
 0x7b7   : > { %v3256_v24 = vsub.f32 %v3254_v35, %v3255_v23 }
 0x7bd   : > { %3280 = vperm.xlu1 %3450, %v3256_v24  }
 0x827   : > { %v3260_v25 = vpop.permute.xlu1 %3259 }
 0x828   : > { %v3262_v55 = vmul.f32 %v3260_v25, %v5120_v54  ;;  %v3263_v9 = vmul.f32 %v3260_v25, %v5125_v15  ;;  %v3264_v49 = vmul.f32 %v3260_v25, %v5130_v1  ;;  %v3265_v60 = vmul.f32 %v3260_v25, %v5135_v44 }
 0x829   : > { %v3266_v6 = vmul.f32 %v3260_v25, %v5166_v22  ;;  %v3267_v59 = vmul.f32 %v3260_v25, %v5178_v32  ;;  %v3268_v26 = vmul.f32 %v3260_v25, %v5190_v11  ;;  %v3269_v54 = vmul.f32 %v3260_v25, %v5202_v36 }
 0x82a   : > { %v3270_v15 = vmul.f32 %v3260_v25, %v5140_v61  ;;  %v3271_v22 = vmul.f32 %v3260_v25, %v5145_v29  ;;  %v3272_v12 = vmul.f32 %v3260_v25, %v5150_v37  ;;  %v3273_v11 = vmul.f32 %v3260_v25, %v5155_v34 }
 0x82b   : > { %v3274_v29 = vmul.f32 %v3260_v25, %v5171_v63  ;;  %v3275_v37 = vmul.f32 %v3260_v25, %v5183_v45  ;;  %v3276_v34 = vmul.f32 %v3260_v25, %v5195_v7  ;;  %v3277_v63 = vmul.f32 %v3260_v25, %v5207_v41 }
 0x82f   : > { %v3281_v46 = vpop.permute.xlu1 %3280 }
 0x830   : > { %v3283_v38 = vadd.f32 %v3281_v46, %v3262_v55  ;;  %v3284_v8 = vadd.f32 %v3281_v46, %v3263_v9  ;;  %v3285_v52 = vadd.f32 %v3281_v46, %v3264_v49  ;;  %v3286_v19 = vadd.f32 %v3281_v46, %v3265_v60 }
 0x831   : > { %v3287_v48 = vadd.f32 %v3281_v46, %v3266_v6  ;;  %v3288_v33 = vadd.f32 %v3281_v46, %v3267_v59  ;;  %v3289_v1 = vadd.f32 %v3281_v46, %v3268_v26  ;;  %v3290_v62 = vadd.f32 %v3281_v46, %v3269_v54 }
 0x832   : > { %v3299_v20 = vmax.f32 %v3283_v38, 0.0  ;;  %v3300_v44 = vmax.f32 %v3284_v8, 0.0  ;;  %v3301_v56 = vmax.f32 %v3285_v52, 0.0  ;;  %v3302_v47 = vmax.f32 %v3286_v19, 0.0 }
 0x833   : > { %v3291_v32 = vadd.f32 %v3281_v46, %v3270_v15  ;;  %v3303_v28 = vmax.f32 %v3287_v48, 0.0  ;;  %v3292_v61 = vadd.f32 %v3281_v46, %v3271_v22  ;;  %v3304_v36 = vmax.f32 %v3288_v33, 0.0 }
 0x834   : > { %3315 = vst [vmem:[%s5329_s8] sm:$0xff] %v3299_v20  ;;  %v3293_v18 = vadd.f32 %v3281_v46, %v3272_v12  ;;  %v3305_v17 = vmax.f32 %v3289_v1, 0.0  ;;  %v3294_v0 = vadd.f32 %v3281_v46, %v3273_v11  ;;  %v3306_v40 = vmax.f32 %v3290_v62, 0.0 }
 0x835   : > { %3316 = vst [vmem:[%s5329_s8 + $0x8] sm:$0xff] %v3300_v44  ;;  %v3295_v10 = vadd.f32 %v3281_v46, %v3274_v29  ;;  %v3307_v51 = vmax.f32 %v3291_v32, 0.0  ;;  %v3296_v58 = vadd.f32 %v3281_v46, %v3275_v37  ;;  %v3308_v39 = vmax.f32 %v3292_v61, 0.0 }
 0x836   : > { %3317 = vst [vmem:[%s5329_s8 + $0x10] sm:$0xff] %v3301_v56  ;;  %v3297_v45 = vadd.f32 %v3281_v46, %v3276_v34  ;;  %v3309_v30 = vmax.f32 %v3293_v18, 0.0  ;;  %v3298_v7 = vadd.f32 %v3281_v46, %v3277_v63  ;;  %v3310_v3 = vmax.f32 %v3294_v0, 0.0 }
 0x837   : > { %3318 = vst [vmem:[%s5329_s8 + $0x18] sm:$0xff] %v3302_v47  ;;  %v3311_v14 = vmax.f32 %v3295_v10, 0.0  ;;  %v3312_v41 = vmax.f32 %v3296_v58, 0.0 }
 0x838   : > { %3319 = vst [vmem:[%s5329_s8 + $0x20] sm:$0xff] %v3303_v28  ;;  %v3313_v27 = vmax.f32 %v3297_v45, 0.0  ;;  %v3314_v53 = vmax.f32 %v3298_v7, 0.0 }
 0x839   : > { %3320 = vst [vmem:[%s5329_s8 + $0x28] sm:$0xff] %v3304_v36 }
 0x83a   : > { %3321 = vst [vmem:[%s5329_s8 + $0x30] sm:$0xff] %v3305_v17 }
 0x83b   : > { %3322 = vst [vmem:[%s5329_s8 + $0x38] sm:$0xff] %v3306_v40 }
 0x83c   : > { %3323 = vst [vmem:[%s5329_s8 + $0x40] sm:$0xff] %v3307_v51 }
 0x83d   : > { %3324 = vst [vmem:[%s5329_s8 + $0x48] sm:$0xff] %v3308_v39 }
 0x83e   : > { %3325 = vst [vmem:[%s5329_s8 + $0x50] sm:$0xff] %v3309_v30 }
 0x83f   : > { %3326 = vst [vmem:[%s5329_s8 + $0x58] sm:$0xff] %v3310_v3 }
 0x840   : > { %3327 = vst [vmem:[%s5329_s8 + $0x60] sm:$0xff] %v3311_v14 }
 0x841   : > { %3328 = vst [vmem:[%s5329_s8 + $0x68] sm:$0xff] %v3312_v41 }
 0x842   : > { %3329 = vst [vmem:[%s5329_s8 + $0x70] sm:$0xff] %v3313_v27 }
 0x843   : > { %3330 = vst [vmem:[%s5329_s8 + $0x78] sm:$0xff] %v3314_v53 }
 0x844 PF: > { %s18_s27 = sadd.s32 1, %s3462_s27  }
 0x845   : > { %p15_p6 = scmp.ge.s32.totalorder %s18_s27, 4  }
 0x847   :  { %17 = sbr.rel (!%p15_p6) target bundleno = 1 (0x1), region = 125 }

</bundles_post_ra>
